<compile_context>
chip_gen: v5e
topology: v5e:2x2
jax: 0.10.0
libtpu: 0.0.40
codegen_flags: <defaults>
</compile_context>

<pallas_src>
import functools

import jax
import jax.numpy as jnp
from jax.experimental import pallas as pl
from jax.experimental.pallas import tpu as pltpu


# ------------------------------------------------------------------ kernels --

def _pw_conv_kernel(x_ref, w_ref, b_ref, o_ref, *, act_tanh):
    """Pointwise conv, channels-first: out (Cout, TN) = W (Cout,Cin) @ x (Cin, TN).

    Cin is tiny (<= 8), so the contraction is an unrolled VPU outer-product
    accumulation over lane-dense (.., TN) rows rather than an MXU matmul.
    """
    x = x_ref[...]                                   # (Cin, TN) f32
    w = w_ref[...]                                   # (Cout, Cin) f32
    cin = x.shape[0]
    acc = w[:, 0:1] * x[0:1, :]                      # (Cout, TN)
    for ci in range(1, cin):
        acc = acc + w[:, ci:ci + 1] * x[ci:ci + 1, :]
    acc = acc + b_ref[...]                           # (Cout, 1) broadcast
    if act_tanh:
        acc = jnp.tanh(acc)
    o_ref[...] = acc.astype(o_ref.dtype)


def _pw_conv_res_tanh_kernel(x_ref, w_ref, b_ref, r_ref, o_ref):
    """tanh(W @ x + b + residual), same layout as _pw_conv_kernel."""
    x = x_ref[...]
    w = w_ref[...]
    cin = x.shape[0]
    acc = w[:, 0:1] * x[0:1, :]
    for ci in range(1, cin):
        acc = acc + w[:, ci:ci + 1] * x[ci:ci + 1, :]
    acc = acc + b_ref[...] + r_ref[...]
    o_ref[...] = jnp.tanh(acc).astype(o_ref.dtype)


def _koopman_kernel(xr_ref, xi_ref, wa_ref, wb_ref, wc_ref, or_ref, oi_ref):
    """Complex einsum 'btm,tfm->bfm' with modes M in the lane dim.

    Layout: x (T, B, TM), w (T, F, TM), out (F, B, TM).  3-multiply complex
    product with the weight combinations (wa=wr, wb=wi-wr, wc=wr+wi)
    precomputed in the wrapper; everything runs as unrolled VPU broadcast FMAs.
    """
    xr = xr_ref[...]                                 # (T, B, TM)
    xi = xi_ref[...]
    xs = xr + xi
    wa = wa_ref[...]                                 # (T, F, TM)
    wb = wb_ref[...]
    wc = wc_ref[...]
    t_dim = xr.shape[0]
    f_dim = wa.shape[1]
    for f in range(f_dim):
        acc_r = None
        acc_i = None
        for t in range(t_dim):
            k1 = wa[t, f:f + 1, :] * xs[t]           # (B, TM)
            k2 = wb[t, f:f + 1, :] * xr[t]
            k3 = wc[t, f:f + 1, :] * xi[t]
            rr = k1 - k3
            ii = k1 + k2
            acc_r = rr if acc_r is None else acc_r + rr
            acc_i = ii if acc_i is None else acc_i + ii
        or_ref[f, :, :] = acc_r
        oi_ref[f, :, :] = acc_i


# ----------------------------------------------------------------- wrappers --

def _round_up(a, b):
    return (a + b - 1) // b * b


def _choose_tn(n):
    """Lane tile for the pointwise convs: multiple of 128, large enough to
    amortize per-grid-step overhead, small enough for v7x/v5e VMEM, and when
    possible >= 2 grid steps so the parallel grid can use both v7x cores."""
    if n <= 256:
        return n
    half = (n // 2) // 128 * 128
    return max(128, min(1024, half))


def conv1x1_cf(x2, w, b, *, tanh=False, residual=None):
    """Channels-first 1x1 conv. x2: (Cin, N); w: (Cout, Cin); b: (Cout,).
    Optional residual (Cout, N) is added before a tanh. Returns (Cout, N)."""
    cin, n = x2.shape
    cout = w.shape[0]
    tn = _choose_tn(n)
    n_pad = _round_up(n, tn)
    if n_pad != n:
        x2 = jnp.pad(x2, ((0, 0), (0, n_pad - n)))
        if residual is not None:
            residual = jnp.pad(residual, ((0, 0), (0, n_pad - n)))
    grid = (n_pad // tn,)
    b2 = b.reshape(cout, 1)

    in_specs = [
        pl.BlockSpec((cin, tn), lambda i: (0, i)),
        pl.BlockSpec((cout, cin), lambda i: (0, 0)),
        pl.BlockSpec((cout, 1), lambda i: (0, 0)),
    ]
    args = [x2, w, b2]
    if residual is not None:
        in_specs.append(pl.BlockSpec((cout, tn), lambda i: (0, i)))
        args.append(residual)
        kernel = _pw_conv_res_tanh_kernel
    else:
        kernel = functools.partial(_pw_conv_kernel, act_tanh=tanh)

    out = pl.pallas_call(
        kernel,
        out_shape=jax.ShapeDtypeStruct((cout, n_pad), x2.dtype),
        grid=grid,
        in_specs=in_specs,
        out_specs=pl.BlockSpec((cout, tn), lambda i: (0, i)),
        compiler_params=pltpu.CompilerParams(dimension_semantics=("parallel",)),
    )(*args)
    return out[:, :n] if n_pad != n else out


def _koopman_pallas(xr, xi, wa, wb, wc):
    """xr/xi: (T, B, M) f32; w*: (T, F, M) f32. Returns (F, B, M) real/imag."""
    t_dim, b_dim, m_dim = xr.shape
    f_dim = wa.shape[1]
    tm = 128 if (m_dim >= 256 and m_dim % 128 == 0) else m_dim
    grid = (m_dim // tm,)

    x_spec = pl.BlockSpec((t_dim, b_dim, tm), lambda i: (0, 0, i))
    w_spec = pl.BlockSpec((t_dim, f_dim, tm), lambda i: (0, 0, i))
    o_spec = pl.BlockSpec((f_dim, b_dim, tm), lambda i: (0, 0, i))

    out_r, out_i = pl.pallas_call(
        _koopman_kernel,
        out_shape=(jax.ShapeDtypeStruct((f_dim, b_dim, m_dim), jnp.float32),
                   jax.ShapeDtypeStruct((f_dim, b_dim, m_dim), jnp.float32)),
        grid=grid,
        in_specs=[x_spec, x_spec, w_spec, w_spec, w_spec],
        out_specs=(o_spec, o_spec),
        compiler_params=pltpu.CompilerParams(dimension_semantics=("parallel",)),
    )(xr, xi, wa, wb, wc)
    return out_r, out_i


def _koopman_weights(koop_r, koop_i, mx, my):
    """(T, F, mx, my) real/imag -> lane-dense (T, F, 2*mx*my) 3-mult combos."""
    t_dim, f_dim = koop_r.shape[:2]
    wr = jnp.tile(koop_r.reshape(t_dim, f_dim, mx * my), (1, 1, 2))
    wi = jnp.tile(koop_i.reshape(t_dim, f_dim, mx * my), (1, 1, 2))
    return wr, wi - wr, wr + wi


def _koopman_modes(st_r, st_i, wa, wb, wc):
    """st_*: (T, B, 2, mx, my) -> (F, B, 2, mx, my) via the Pallas kernel."""
    t_dim, b_dim, two, mx, my = st_r.shape
    m_dim = two * mx * my
    o_r, o_i = _koopman_pallas(st_r.reshape(t_dim, b_dim, m_dim),
                               st_i.reshape(t_dim, b_dim, m_dim), wa, wb, wc)
    f_dim = o_r.shape[0]
    return (o_r.reshape(f_dim, b_dim, two, mx, my),
            o_i.reshape(f_dim, b_dim, two, mx, my))


def _project_col0(out_r, out_i):
    """Apply the exact rfft2(irfft2(.)) projection to the retained modes.

    Only the y-frequency-0 column changes: value <- 0.5*(value + conj(partner)),
    where the partner of x-frequency k is x-frequency (H-k) % H (which lands in
    the opposite retained block, or is zero / itself at the block edges).
    out_*: (F, B, 2, mx, my) with axis 2 = [top block, bottom block]."""
    t0r = out_r[:, :, 0, :, 0]
    b0r = out_r[:, :, 1, :, 0]
    t0i = out_i[:, :, 0, :, 0]
    b0i = out_i[:, :, 1, :, 0]
    # partner of top k: k=0 -> itself; k>=1 -> bottom index mx-k
    pt_r = jnp.concatenate([t0r[:, :, :1], b0r[:, :, :0:-1]], axis=-1)
    pt_i = jnp.concatenate([t0i[:, :, :1], b0i[:, :, :0:-1]], axis=-1)
    # partner of bottom j: j=0 -> non-retained mode (zero); j>=1 -> top index mx-j
    pb_r = jnp.concatenate([jnp.zeros_like(t0r[:, :, :1]), t0r[:, :, :0:-1]], axis=-1)
    pb_i = jnp.concatenate([jnp.zeros_like(t0i[:, :, :1]), t0i[:, :, :0:-1]], axis=-1)
    nt_r = 0.5 * (t0r + pt_r)
    nt_i = 0.5 * (t0i - pt_i)
    nb_r = 0.5 * (b0r + pb_r)
    nb_i = 0.5 * (b0i - pb_i)
    p_r = out_r.at[:, :, 0, :, 0].set(nt_r).at[:, :, 1, :, 0].set(nb_r)
    p_i = out_i.at[:, :, 0, :, 0].set(nt_i).at[:, :, 1, :, 0].set(nb_i)
    return p_r, p_i


def koopman_linear_march(x_sp, wa, wb, wc, mx, my, decompose):
    """linear_type=True decompose loop, entirely in Fourier space (exact).

    x_sp: (T, B, H, W) real f32. One rfft2 / irfft2 per forward total."""
    t_dim, b_dim, H, W = x_sp.shape
    assert 2 * mx < H and my <= W // 2, (
        "Fourier-space fast path requires non-overlapping retained x-modes and "
        "no retained Nyquist y-column.")
    X = jnp.fft.rfft2(x_sp)                                  # (T, B, H, Wf) c64
    top0 = X[:, :, :mx, :my]
    bot0 = X[:, :, H - mx:, :my]
    st_r = jnp.stack([jnp.real(top0), jnp.real(bot0)], axis=2)   # (T,B,2,mx,my)
    st_i = jnp.stack([jnp.imag(top0), jnp.imag(bot0)], axis=2)

    eff_r, eff_i = st_r, st_i            # projected state seen by the operator
    acc_r = jnp.zeros_like(st_r)         # raw spectral update accumulator
    acc_i = jnp.zeros_like(st_i)
    for _ in range(decompose):
        o_r, o_i = _koopman_modes(eff_r, eff_i, wa, wb, wc)
        acc_r = acc_r + o_r
        acc_i = acc_i + o_i
        p_r, p_i = _project_col0(o_r, o_i)
        eff_r = eff_r + p_r
        eff_i = eff_i + p_i

    fin_r = st_r + acc_r
    fin_i = st_i + acc_i
    top_fin = jax.lax.complex(fin_r[:, :, 0], fin_i[:, :, 0])    # (T,B,mx,my)
    bot_fin = jax.lax.complex(fin_r[:, :, 1], fin_i[:, :, 1])
    # assemble the final spectrum by concatenation (no full-size scatter)
    top_row = jnp.concatenate([top_fin, X[:, :, :mx, my:]], axis=-1)
    bot_row = jnp.concatenate([bot_fin, X[:, :, H - mx:, my:]], axis=-1)
    X_out = jnp.concatenate([top_row, X[:, :, mx:H - mx, :], bot_row], axis=2)
    return jnp.fft.irfft2(X_out, s=(H, W)).astype(x_sp.dtype)


def _koopman_apply_spatial(x_sp, wa, wb, wc, mx, my):
    """One Koopman application with spatial round trip (non-linear path)."""
    t_dim, b_dim, H, W = x_sp.shape
    X = jnp.fft.rfft2(x_sp)
    Wf = X.shape[-1]
    top = X[:, :, :mx, :my]
    bot = X[:, :, H - mx:, :my]
    st_r = jnp.stack([jnp.real(top), jnp.real(bot)], axis=2)
    st_i = jnp.stack([jnp.imag(top), jnp.imag(bot)], axis=2)
    o_r, o_i = _koopman_modes(st_r, st_i, wa, wb, wc)
    top_o = jax.lax.complex(o_r[:, :, 0], o_i[:, :, 0])
    bot_o = jax.lax.complex(o_r[:, :, 1], o_i[:, :, 1])
    zr = jnp.zeros(top_o.shape[:3] + (Wf - my,), X.dtype)
    zm = jnp.zeros(top_o.shape[:2] + (H - 2 * mx, Wf), X.dtype)
    out_ft = jnp.concatenate([jnp.concatenate([top_o, zr], axis=-1), zm,
                              jnp.concatenate([bot_o, zr], axis=-1)], axis=2)
    return jnp.fft.irfft2(out_ft, s=(H, W)).astype(x_sp.dtype)


# ---------------------------------------------------------------- KNO2d fwd --

def kno2d_forward(x5, params, *, modes_x, modes_y, decompose, linear_type=True):
    """x5: (B, 1, C_in, H, W). Returns (out, x_reconstruct), both (B,1,C_out,H,W)."""
    xs = x5[:, 0]                                            # (B, Cin, H, W)
    B, Cin, H, W = xs.shape
    N = B * H * W
    # single entry transpose into the flat channels-first lane-dense layout
    x2 = jnp.transpose(xs, (1, 0, 2, 3)).reshape(Cin, N)     # (Cin, N)

    enc_t = conv1x1_cf(x2, params['enc_w'], params['enc_b'], tanh=True)   # (op,N)
    op = enc_t.shape[0]
    rec = conv1x1_cf(enc_t, params['dec_w'], params['dec_b'])             # (Cout,N)

    wa, wb, wc = _koopman_weights(params['koop_r'], params['koop_i'],
                                  modes_x, modes_y)
    x_sp = enc_t.reshape(op, B, H, W)
    if linear_type:
        x_sp = koopman_linear_march(x_sp, wa, wb, wc, modes_x, modes_y, decompose)
    else:
        for _ in range(decompose):
            x1 = _koopman_apply_spatial(x_sp, wa, wb, wc, modes_x, modes_y)
            x_sp = jnp.tanh(x_sp + x1)
    xcur = x_sp.reshape(op, N)

    # tanh(w0(x_w) + x) fused in one Pallas kernel, then decoder
    xcur = conv1x1_cf(enc_t, params['w0_w'], params['w0_b'], residual=xcur)
    out = conv1x1_cf(xcur, params['dec_w'], params['dec_b'])              # (Cout,N)

    def unflatten(y):                                        # (C,N) -> (B,1,C,H,W)
        C = y.shape[0]
        return jnp.transpose(y.reshape(C, B, H, W), (1, 0, 2, 3))[:, None]

    return unflatten(out), unflatten(rec)


# -------------------------------------------------------------------- setup --

def init_params(key, in_ch, out_ch, op_size, modes_x, modes_y):
    ks = jax.random.split(key, 8)
    scale = 1.0 / (op_size * op_size)
    params = {
        'enc_w': 0.1 * jax.random.normal(ks[0], (op_size, in_ch), jnp.float32),
        'enc_b': 0.1 * jax.random.normal(ks[1], (op_size,), jnp.float32),
        'dec_w': 0.1 * jax.random.normal(ks[2], (out_ch, op_size), jnp.float32),
        'dec_b': 0.1 * jax.random.normal(ks[3], (out_ch,), jnp.float32),
        'w0_w': 0.1 * jax.random.normal(ks[4], (op_size, op_size), jnp.float32),
        'w0_b': 0.1 * jax.random.normal(ks[5], (op_size,), jnp.float32),
        # koopman_matrix: (T, F, mx, my) complex split into real/imag
        'koop_r': scale * jax.random.uniform(ks[6], (op_size, op_size, modes_x, modes_y),
                                             dtype=jnp.float32),
        'koop_i': scale * jax.random.uniform(ks[7], (op_size, op_size, modes_x, modes_y),
                                             dtype=jnp.float32),
    }
    return params


# -------------------------------------------------- pure-JAX reference check --

def _reference_forward(x5, params, *, modes_x, modes_y, decompose, linear_type=True):
    """Direct transcription of the PyTorch module (per-iteration FFTs)."""
    hi = jax.lax.Precision.HIGHEST
    xs = x5[:, 0]

    def conv(x, w, b):
        return (jnp.einsum('oc,bchw->bohw', w, x, precision=hi)
                + b[None, :, None, None])

    km = jax.lax.complex(params['koop_r'], params['koop_i'])

    def koop(x):
        B, C, H, W = x.shape
        x_ft = jnp.fft.rfft2(x)
        out_ft = jnp.zeros_like(x_ft)
        tm = jnp.einsum('btxy,tfxy->bfxy', x_ft[:, :, :modes_x, :modes_y], km,
                        precision=hi)
        bm = jnp.einsum('btxy,tfxy->bfxy', x_ft[:, :, H - modes_x:, :modes_y], km,
                        precision=hi)
        out_ft = out_ft.at[:, :, :modes_x, :modes_y].set(tm)
        out_ft = out_ft.at[:, :, H - modes_x:, :modes_y].set(bm)
        return jnp.fft.irfft2(out_ft, s=(H, W))

    e = jnp.tanh(conv(xs, params['enc_w'], params['enc_b']))
    rec = conv(e, params['dec_w'], params['dec_b'])[:, None]
    x = e
    for _ in range(decompose):
        x1 = koop(x)
        x = x + x1 if linear_type else jnp.tanh(x + x1)
    x = jnp.tanh(conv(e, params['w0_w'], params['w0_b']) + x)
    out = conv(x, params['dec_w'], params['dec_b'])[:, None]
    return out, rec


if __name__ == "__main__":
    B, IN_CH, OUT_CH, OP, H, W = 2, 4, 4, 8, 16, 16
    MODES_X, MODES_Y, DECOMPOSE = 4, 4, 6

    key = jax.random.PRNGKey(0)
    kx, kp = jax.random.split(key)
    x = jax.random.normal(kx, (B, 1, IN_CH, H, W), dtype=jnp.float32)
    params = init_params(kp, IN_CH, OUT_CH, OP, MODES_X, MODES_Y)

    fwd = jax.jit(functools.partial(kno2d_forward, modes_x=MODES_X, modes_y=MODES_Y,
                                    decompose=DECOMPOSE, linear_type=True))
    out, x_reconstruct = fwd(x, params)
    jax.block_until_ready((out, x_reconstruct))

    assert out.shape == (B, 1, OUT_CH, H, W), out.shape
    assert x_reconstruct.shape == (B, 1, OUT_CH, H, W), x_reconstruct.shape
    assert jnp.all(jnp.isfinite(out)) and jnp.all(jnp.isfinite(x_reconstruct))

    # correctness vs a pure-JAX transcription of the PyTorch module
    ref_fwd = jax.jit(functools.partial(_reference_forward, modes_x=MODES_X,
                                        modes_y=MODES_Y, decompose=DECOMPOSE,
                                        linear_type=True))
    ref_out, ref_rec = ref_fwd(x, params)
    jax.block_until_ready((ref_out, ref_rec))
    assert jnp.allclose(out, ref_out, atol=2e-2, rtol=2e-2), \
        float(jnp.max(jnp.abs(out - ref_out)))
    assert jnp.allclose(x_reconstruct, ref_rec, atol=2e-2, rtol=2e-2), \
        float(jnp.max(jnp.abs(x_reconstruct - ref_rec)))

    print("KERNEL_OK")
</pallas_src>

<mosaic_0001>
module attributes {stable_mosaic.version = 11 : i64} {
  func.func @_pw_conv_kernel(%arg0: i32, %arg1: memref<4x256xf32, #tpu.memory_space<vmem>>, %arg2: memref<8x4xf32, #tpu.memory_space<vmem>>, %arg3: memref<8x1xf32, #tpu.memory_space<vmem>>, %arg4: memref<8x256xf32, #tpu.memory_space<vmem>>) attributes {dimension_semantics = [#tpu.dimension_semantics<parallel>], iteration_bounds = array<i64: 2>, scalar_prefetch = 0 : i64, scratch_operands = 0 : i64, tpu.core_type = #tpu.core_type<tc>, window_params = [{transform_indices = @transform_0, window_bounds = array<i64: 4, 256>}, {pipeline_mode = #tpu.pipeline_mode<synchronous>, transform_indices = @transform_1, window_bounds = array<i64: 8, 4>}, {pipeline_mode = #tpu.pipeline_mode<synchronous>, transform_indices = @transform_2, window_bounds = array<i64: 8, 1>}, {transform_indices = @transform_3, window_bounds = array<i64: 8, 256>}]} {
    %c0 = arith.constant 0 : index
    %c0_0 = arith.constant 0 : index
    %0 = vector.load %arg1[%c0, %c0_0] : memref<4x256xf32, #tpu.memory_space<vmem>>, vector<4x256xf32>
    %c0_1 = arith.constant 0 : index
    %c0_2 = arith.constant 0 : index
    %1 = vector.load %arg2[%c0_1, %c0_2] : memref<8x4xf32, #tpu.memory_space<vmem>>, vector<8x4xf32>
    %2 = vector.extract_strided_slice %1 {offsets = [0, 0], sizes = [8, 1], strides = [1, 1]} : vector<8x4xf32> to vector<8x1xf32>
    %3 = vector.extract_strided_slice %0 {offsets = [0, 0], sizes = [1, 256], strides = [1, 1]} : vector<4x256xf32> to vector<1x256xf32>
    %4 = vector.broadcast %2 : vector<8x1xf32> to vector<8x256xf32>
    %5 = vector.broadcast %3 : vector<1x256xf32> to vector<8x256xf32>
    %6 = arith.mulf %4, %5 : vector<8x256xf32>
    %7 = vector.extract_strided_slice %1 {offsets = [0, 1], sizes = [8, 1], strides = [1, 1]} : vector<8x4xf32> to vector<8x1xf32>
    %8 = vector.extract_strided_slice %0 {offsets = [1, 0], sizes = [1, 256], strides = [1, 1]} : vector<4x256xf32> to vector<1x256xf32>
    %9 = vector.broadcast %7 : vector<8x1xf32> to vector<8x256xf32>
    %10 = vector.broadcast %8 : vector<1x256xf32> to vector<8x256xf32>
    %11 = arith.mulf %9, %10 : vector<8x256xf32>
    %12 = arith.addf %6, %11 : vector<8x256xf32>
    %13 = vector.extract_strided_slice %1 {offsets = [0, 2], sizes = [8, 1], strides = [1, 1]} : vector<8x4xf32> to vector<8x1xf32>
    %14 = vector.extract_strided_slice %0 {offsets = [2, 0], sizes = [1, 256], strides = [1, 1]} : vector<4x256xf32> to vector<1x256xf32>
    %15 = vector.broadcast %13 : vector<8x1xf32> to vector<8x256xf32>
    %16 = vector.broadcast %14 : vector<1x256xf32> to vector<8x256xf32>
    %17 = arith.mulf %15, %16 : vector<8x256xf32>
    %18 = arith.addf %12, %17 : vector<8x256xf32>
    %19 = vector.extract_strided_slice %1 {offsets = [0, 3], sizes = [8, 1], strides = [1, 1]} : vector<8x4xf32> to vector<8x1xf32>
    %20 = vector.extract_strided_slice %0 {offsets = [3, 0], sizes = [1, 256], strides = [1, 1]} : vector<4x256xf32> to vector<1x256xf32>
    %21 = vector.broadcast %19 : vector<8x1xf32> to vector<8x256xf32>
    %22 = vector.broadcast %20 : vector<1x256xf32> to vector<8x256xf32>
    %23 = arith.mulf %21, %22 : vector<8x256xf32>
    %24 = arith.addf %18, %23 : vector<8x256xf32>
    %c0_3 = arith.constant 0 : index
    %c0_4 = arith.constant 0 : index
    %25 = vector.load %arg3[%c0_3, %c0_4] : memref<8x1xf32, #tpu.memory_space<vmem>>, vector<8x1xf32>
    %26 = vector.broadcast %25 : vector<8x1xf32> to vector<8x256xf32>
    %27 = arith.addf %24, %26 : vector<8x256xf32>
    %28 = math.tanh %27 : vector<8x256xf32>
    %c0_5 = arith.constant 0 : index
    %c0_6 = arith.constant 0 : index
    %29 = vector.load %arg4[%c0_5, %c0_6] : memref<8x256xf32, #tpu.memory_space<vmem>>, vector<8x256xf32>
    tpu.vector_store %arg4[%c0_5, %c0_6], %28 {strides = array<i32>} : memref<8x256xf32, #tpu.memory_space<vmem>>, vector<8x256xf32>,
    return
  }
  func.func @transform_0(%arg0: i32) -> (i32, i32) {
    %c0_i32 = arith.constant 0 : i32
    %c0_i32_0 = arith.constant 0 : i32
    return %c0_i32, %arg0 : i32, i32
  }
  func.func @transform_1(%arg0: i32) -> (i32, i32) {
    %c0_i32 = arith.constant 0 : i32
    %c0_i32_0 = arith.constant 0 : i32
    %c0_i32_1 = arith.constant 0 : i32
    return %c0_i32, %c0_i32_0 : i32, i32
  }
  func.func @transform_2(%arg0: i32) -> (i32, i32) {
    %c0_i32 = arith.constant 0 : i32
    %c0_i32_0 = arith.constant 0 : i32
    %c0_i32_1 = arith.constant 0 : i32
    return %c0_i32, %c0_i32_0 : i32, i32
  }
  func.func @transform_3(%arg0: i32) -> (i32, i32) {
    %c0_i32 = arith.constant 0 : i32
    %c0_i32_0 = arith.constant 0 : i32
    return %c0_i32, %arg0 : i32, i32
  }
}

module attributes {stable_mosaic.version = 11 : i64} {
  func.func @_koopman_kernel(%arg0: i32, %arg1: memref<8x2x32xf32, #tpu.memory_space<vmem>>, %arg2: memref<8x2x32xf32, #tpu.memory_space<vmem>>, %arg3: memref<8x8x32xf32, #tpu.memory_space<vmem>>, %arg4: memref<8x8x32xf32, #tpu.memory_space<vmem>>, %arg5: memref<8x8x32xf32, #tpu.memory_space<vmem>>, %arg6: memref<8x2x32xf32, #tpu.memory_space<vmem>>, %arg7: memref<8x2x32xf32, #tpu.memory_space<vmem>>) attributes {dimension_semantics = [#tpu.dimension_semantics<parallel>], iteration_bounds = array<i64: 1>, scalar_prefetch = 0 : i64, scratch_operands = 0 : i64, tpu.core_type = #tpu.core_type<tc>, window_params = [{transform_indices = @transform_0, window_bounds = array<i64: 8, 2, 32>}, {transform_indices = @transform_1, window_bounds = array<i64: 8, 2, 32>}, {transform_indices = @transform_2, window_bounds = array<i64: 8, 8, 32>}, {transform_indices = @transform_3, window_bounds = array<i64: 8, 8, 32>}, {transform_indices = @transform_4, window_bounds = array<i64: 8, 8, 32>}, {transform_indices = @transform_5, window_bounds = array<i64: 8, 2, 32>}, {transform_indices = @transform_6, window_bounds = array<i64: 8, 2, 32>}]} {
    %c0 = arith.constant 0 : index
    %c0_0 = arith.constant 0 : index
    %c0_1 = arith.constant 0 : index
    %0 = vector.load %arg1[%c0, %c0_0, %c0_1] : memref<8x2x32xf32, #tpu.memory_space<vmem>>, vector<8x2x32xf32>
    %c0_2 = arith.constant 0 : index
    %c0_3 = arith.constant 0 : index
    %c0_4 = arith.constant 0 : index
    %1 = vector.load %arg2[%c0_2, %c0_3, %c0_4] : memref<8x2x32xf32, #tpu.memory_space<vmem>>, vector<8x2x32xf32>
    %2 = arith.addf %0, %1 : vector<8x2x32xf32>
    %c0_5 = arith.constant 0 : index
    %c0_6 = arith.constant 0 : index
    %c0_7 = arith.constant 0 : index
    %3 = vector.load %arg3[%c0_5, %c0_6, %c0_7] : memref<8x8x32xf32, #tpu.memory_space<vmem>>, vector<8x8x32xf32>
    %c0_8 = arith.constant 0 : index
    %c0_9 = arith.constant 0 : index
    %c0_10 = arith.constant 0 : index
    %4 = vector.load %arg4[%c0_8, %c0_9, %c0_10] : memref<8x8x32xf32, #tpu.memory_space<vmem>>, vector<8x8x32xf32>
    %c0_11 = arith.constant 0 : index
    %c0_12 = arith.constant 0 : index
    %c0_13 = arith.constant 0 : index
    %5 = vector.load %arg5[%c0_11, %c0_12, %c0_13] : memref<8x8x32xf32, #tpu.memory_space<vmem>>, vector<8x8x32xf32>
    %6 = vector.extract_strided_slice %3 {offsets = [0, 0, 0], sizes = [1, 1, 32], strides = [1, 1, 1]} : vector<8x8x32xf32> to vector<1x1x32xf32>
    %7 = vector.shape_cast %6 : vector<1x1x32xf32> to vector<1x32xf32>
    %8 = vector.extract_strided_slice %2 {offsets = [0, 0, 0], sizes = [1, 2, 32], strides = [1, 1, 1]} : vector<8x2x32xf32> to vector<1x2x32xf32>
    %9 = vector.shape_cast %8 : vector<1x2x32xf32> to vector<2x32xf32>
    %10 = vector.broadcast %7 : vector<1x32xf32> to vector<2x32xf32>
    %11 = arith.mulf %10, %9 : vector<2x32xf32>
    %12 = vector.extract_strided_slice %4 {offsets = [0, 0, 0], sizes = [1, 1, 32], strides = [1, 1, 1]} : vector<8x8x32xf32> to vector<1x1x32xf32>
    %13 = vector.shape_cast %12 : vector<1x1x32xf32> to vector<1x32xf32>
    %14 = vector.extract_strided_slice %0 {offsets = [0, 0, 0], sizes = [1, 2, 32], strides = [1, 1, 1]} : vector<8x2x32xf32> to vector<1x2x32xf32>
    %15 = vector.shape_cast %14 : vector<1x2x32xf32> to vector<2x32xf32>
    %16 = vector.broadcast %13 : vector<1x32xf32> to vector<2x32xf32>
    %17 = arith.mulf %16, %15 : vector<2x32xf32>
    %18 = vector.extract_strided_slice %5 {offsets = [0, 0, 0], sizes = [1, 1, 32], strides = [1, 1, 1]} : vector<8x8x32xf32> to vector<1x1x32xf32>
    %19 = vector.shape_cast %18 : vector<1x1x32xf32> to vector<1x32xf32>
    %20 = vector.extract_strided_slice %1 {offsets = [0, 0, 0], sizes = [1, 2, 32], strides = [1, 1, 1]} : vector<8x2x32xf32> to vector<1x2x32xf32>
    %21 = vector.shape_cast %20 : vector<1x2x32xf32> to vector<2x32xf32>
    %22 = vector.broadcast %19 : vector<1x32xf32> to vector<2x32xf32>
    %23 = arith.mulf %22, %21 : vector<2x32xf32>
    %24 = arith.subf %11, %23 : vector<2x32xf32>
    %25 = arith.addf %11, %17 : vector<2x32xf32>
    %26 = vector.extract_strided_slice %3 {offsets = [1, 0, 0], sizes = [1, 1, 32], strides = [1, 1, 1]} : vector<8x8x32xf32> to vector<1x1x32xf32>
    %27 = vector.shape_cast %26 : vector<1x1x32xf32> to vector<1x32xf32>
    %28 = vector.extract_strided_slice %2 {offsets = [1, 0, 0], sizes = [1, 2, 32], strides = [1, 1, 1]} : vector<8x2x32xf32> to vector<1x2x32xf32>
    %29 = vector.shape_cast %28 : vector<1x2x32xf32> to vector<2x32xf32>
    %30 = vector.broadcast %27 : vector<1x32xf32> to vector<2x32xf32>
    %31 = arith.mulf %30, %29 : vector<2x32xf32>
    %32 = vector.extract_strided_slice %4 {offsets = [1, 0, 0], sizes = [1, 1, 32], strides = [1, 1, 1]} : vector<8x8x32xf32> to vector<1x1x32xf32>
    %33 = vector.shape_cast %32 : vector<1x1x32xf32> to vector<1x32xf32>
    %34 = vector.extract_strided_slice %0 {offsets = [1, 0, 0], sizes = [1, 2, 32], strides = [1, 1, 1]} : vector<8x2x32xf32> to vector<1x2x32xf32>
    %35 = vector.shape_cast %34 : vector<1x2x32xf32> to vector<2x32xf32>
    %36 = vector.broadcast %33 : vector<1x32xf32> to vector<2x32xf32>
    %37 = arith.mulf %36, %35 : vector<2x32xf32>
    %38 = vector.extract_strided_slice %5 {offsets = [1, 0, 0], sizes = [1, 1, 32], strides = [1, 1, 1]} : vector<8x8x32xf32> to vector<1x1x32xf32>
    %39 = vector.shape_cast %38 : vector<1x1x32xf32> to vector<1x32xf32>
    %40 = vector.extract_strided_slice %1 {offsets = [1, 0, 0], sizes = [1, 2, 32], strides = [1, 1, 1]} : vector<8x2x32xf32> to vector<1x2x32xf32>
    %41 = vector.shape_cast %40 : vector<1x2x32xf32> to vector<2x32xf32>
    %42 = vector.broadcast %39 : vector<1x32xf32> to vector<2x32xf32>
    %43 = arith.mulf %42, %41 : vector<2x32xf32>
    %44 = arith.subf %31, %43 : vector<2x32xf32>
    %45 = arith.addf %31, %37 : vector<2x32xf32>
    %46 = arith.addf %24, %44 : vector<2x32xf32>
    %47 = arith.addf %25, %45 : vector<2x32xf32>
    %48 = vector.extract_strided_slice %3 {offsets = [2, 0, 0], sizes = [1, 1, 32], strides = [1, 1, 1]} : vector<8x8x32xf32> to vector<1x1x32xf32>
    %49 = vector.shape_cast %48 : vector<1x1x32xf32> to vector<1x32xf32>
    %50 = vector.extract_strided_slice %2 {offsets = [2, 0, 0], sizes = [1, 2, 32], strides = [1, 1, 1]} : vector<8x2x32xf32> to vector<1x2x32xf32>
    %51 = vector.shape_cast %50 : vector<1x2x32xf32> to vector<2x32xf32>
    %52 = vector.broadcast %49 : vector<1x32xf32> to vector<2x32xf32>
    %53 = arith.mulf %52, %51 : vector<2x32xf32>
    %54 = vector.extract_strided_slice %4 {offsets = [2, 0, 0], sizes = [1, 1, 32], strides = [1, 1, 1]} : vector<8x8x32xf32> to vector<1x1x32xf32>
    %55 = vector.shape_cast %54 : vector<1x1x32xf32> to vector<1x32xf32>
    %56 = vector.extract_strided_slice %0 {offsets = [2, 0, 0], sizes = [1, 2, 32], strides = [1, 1, 1]} : vector<8x2x32xf32> to vector<1x2x32xf32>
    %57 = vector.shape_cast %56 : vector<1x2x32xf32> to vector<2x32xf32>
    %58 = vector.broadcast %55 : vector<1x32xf32> to vector<2x32xf32>
    %59 = arith.mulf %58, %57 : vector<2x32xf32>
    %60 = vector.extract_strided_slice %5 {offsets = [2, 0, 0], sizes = [1, 1, 32], strides = [1, 1, 1]} : vector<8x8x32xf32> to vector<1x1x32xf32>
    %61 = vector.shape_cast %60 : vector<1x1x32xf32> to vector<1x32xf32>
    %62 = vector.extract_strided_slice %1 {offsets = [2, 0, 0], sizes = [1, 2, 32], strides = [1, 1, 1]} : vector<8x2x32xf32> to vector<1x2x32xf32>
    %63 = vector.shape_cast %62 : vector<1x2x32xf32> to vector<2x32xf32>
    %64 = vector.broadcast %61 : vector<1x32xf32> to vector<2x32xf32>
    %65 = arith.mulf %64, %63 : vector<2x32xf32>
    %66 = arith.subf %53, %65 : vector<2x32xf32>
    %67 = arith.addf %53, %59 : vector<2x32xf32>
    %68 = arith.addf %46, %66 : vector<2x32xf32>
    %69 = arith.addf %47, %67 : vector<2x32xf32>
    %70 = vector.extract_strided_slice %3 {offsets = [3, 0, 0], sizes = [1, 1, 32], strides = [1, 1, 1]} : vector<8x8x32xf32> to vector<1x1x32xf32>
    %71 = vector.shape_cast %70 : vector<1x1x32xf32> to vector<1x32xf32>
    %72 = vector.extract_strided_slice %2 {offsets = [3, 0, 0], sizes = [1, 2, 32], strides = [1, 1, 1]} : vector<8x2x32xf32> to vector<1x2x32xf32>
    %73 = vector.shape_cast %72 : vector<1x2x32xf32> to vector<2x32xf32>
    %74 = vector.broadcast %71 : vector<1x32xf32> to vector<2x32xf32>
    %75 = arith.mulf %74, %73 : vector<2x32xf32>
    %76 = vector.extract_strided_slice %4 {offsets = [3, 0, 0], sizes = [1, 1, 32], strides = [1, 1, 1]} : vector<8x8x32xf32> to vector<1x1x32xf32>
    %77 = vector.shape_cast %76 : vector<1x1x32xf32> to vector<1x32xf32>
    %78 = vector.extract_strided_slice %0 {offsets = [3, 0, 0], sizes = [1, 2, 32], strides = [1, 1, 1]} : vector<8x2x32xf32> to vector<1x2x32xf32>
    %79 = vector.shape_cast %78 : vector<1x2x32xf32> to vector<2x32xf32>
    %80 = vector.broadcast %77 : vector<1x32xf32> to vector<2x32xf32>
    %81 = arith.mulf %80, %79 : vector<2x32xf32>
    %82 = vector.extract_strided_slice %5 {offsets = [3, 0, 0], sizes = [1, 1, 32], strides = [1, 1, 1]} : vector<8x8x32xf32> to vector<1x1x32xf32>
    %83 = vector.shape_cast %82 : vector<1x1x32xf32> to vector<1x32xf32>
    %84 = vector.extract_strided_slice %1 {offsets = [3, 0, 0], sizes = [1, 2, 32], strides = [1, 1, 1]} : vector<8x2x32xf32> to vector<1x2x32xf32>
    %85 = vector.shape_cast %84 : vector<1x2x32xf32> to vector<2x32xf32>
    %86 = vector.broadcast %83 : vector<1x32xf32> to vector<2x32xf32>
    %87 = arith.mulf %86, %85 : vector<2x32xf32>
    %88 = arith.subf %75, %87 : vector<2x32xf32>
    %89 = arith.addf %75, %81 : vector<2x32xf32>
    %90 = arith.addf %68, %88 : vector<2x32xf32>
    %91 = arith.addf %69, %89 : vector<2x32xf32>
    %92 = vector.extract_strided_slice %3 {offsets = [4, 0, 0], sizes = [1, 1, 32], strides = [1, 1, 1]} : vector<8x8x32xf32> to vector<1x1x32xf32>
    %93 = vector.shape_cast %92 : vector<1x1x32xf32> to vector<1x32xf32>
    %94 = vector.extract_strided_slice %2 {offsets = [4, 0, 0], sizes = [1, 2, 32], strides = [1, 1, 1]} : vector<8x2x32xf32> to vector<1x2x32xf32>
    %95 = vector.shape_cast %94 : vector<1x2x32xf32> to vector<2x32xf32>
    %96 = vector.broadcast %93 : vector<1x32xf32> to vector<2x32xf32>
    %97 = arith.mulf %96, %95 : vector<2x32xf32>
    %98 = vector.extract_strided_slice %4 {offsets = [4, 0, 0], sizes = [1, 1, 32], strides = [1, 1, 1]} : vector<8x8x32xf32> to vector<1x1x32xf32>
    %99 = vector.shape_cast %98 : vector<1x1x32xf32> to vector<1x32xf32>
    %100 = vector.extract_strided_slice %0 {offsets = [4, 0, 0], sizes = [1, 2, 32], strides = [1, 1, 1]} : vector<8x2x32xf32> to vector<1x2x32xf32>
    %101 = vector.shape_cast %100 : vector<1x2x32xf32> to vector<2x32xf32>
    %102 = vector.broadcast %99 : vector<1x32xf32> to vector<2x32xf32>
    %103 = arith.mulf %102, %101 : vector<2x32xf32>
    %104 = vector.extract_strided_slice %5 {offsets = [4, 0, 0], sizes = [1, 1, 32], strides = [1, 1, 1]} : vector<8x8x32xf32> to vector<1x1x32xf32>
    %105 = vector.shape_cast %104 : vector<1x1x32xf32> to vector<1x32xf32>
    %106 = vector.extract_strided_slice %1 {offsets = [4, 0, 0], sizes = [1, 2, 32], strides = [1, 1, 1]} : vector<8x2x32xf32> to vector<1x2x32xf32>
    %107 = vector.shape_cast %106 : vector<1x2x32xf32> to vector<2x32xf32>
    %108 = vector.broadcast %105 : vector<1x32xf32> to vector<2x32xf32>
    %109 = arith.mulf %108, %107 : vector<2x32xf32>
    %110 = arith.subf %97, %109 : vector<2x32xf32>
    %111 = arith.addf %97, %103 : vector<2x32xf32>
    %112 = arith.addf %90, %110 : vector<2x32xf32>
    %113 = arith.addf %91, %111 : vector<2x32xf32>
    %114 = vector.extract_strided_slice %3 {offsets = [5, 0, 0], sizes = [1, 1, 32], strides = [1, 1, 1]} : vector<8x8x32xf32> to vector<1x1x32xf32>
    %115 = vector.shape_cast %114 : vector<1x1x32xf32> to vector<1x32xf32>
    %116 = vector.extract_strided_slice %2 {offsets = [5, 0, 0], sizes = [1, 2, 32], strides = [1, 1, 1]} : vector<8x2x32xf32> to vector<1x2x32xf32>
    %117 = vector.shape_cast %116 : vector<1x2x32xf32> to vector<2x32xf32>
    %118 = vector.broadcast %115 : vector<1x32xf32> to vector<2x32xf32>
    %119 = arith.mulf %118, %117 : vector<2x32xf32>
    %120 = vector.extract_strided_slice %4 {offsets = [5, 0, 0], sizes = [1, 1, 32], strides = [1, 1, 1]} : vector<8x8x32xf32> to vector<1x1x32xf32>
    %121 = vector.shape_cast %120 : vector<1x1x32xf32> to vector<1x32xf32>
    %122 = vector.extract_strided_slice %0 {offsets = [5, 0, 0], sizes = [1, 2, 32], strides = [1, 1, 1]} : vector<8x2x32xf32> to vector<1x2x32xf32>
    %123 = vector.shape_cast %122 : vector<1x2x32xf32> to vector<2x32xf32>
    %124 = vector.broadcast %121 : vector<1x32xf32> to vector<2x32xf32>
    %125 = arith.mulf %124, %123 : vector<2x32xf32>
    %126 = vector.extract_strided_slice %5 {offsets = [5, 0, 0], sizes = [1, 1, 32], strides = [1, 1, 1]} : vector<8x8x32xf32> to vector<1x1x32xf32>
    %127 = vector.shape_cast %126 : vector<1x1x32xf32> to vector<1x32xf32>
    %128 = vector.extract_strided_slice %1 {offsets = [5, 0, 0], sizes = [1, 2, 32], strides = [1, 1, 1]} : vector<8x2x32xf32> to vector<1x2x32xf32>
    %129 = vector.shape_cast %128 : vector<1x2x32xf32> to vector<2x32xf32>
    %130 = vector.broadcast %127 : vector<1x32xf32> to vector<2x32xf32>
    %131 = arith.mulf %130, %129 : vector<2x32xf32>
    %132 = arith.subf %119, %131 : vector<2x32xf32>
    %133 = arith.addf %119, %125 : vector<2x32xf32>
    %134 = arith.addf %112, %132 : vector<2x32xf32>
    %135 = arith.addf %113, %133 : vector<2x32xf32>
    %136 = vector.extract_strided_slice %3 {offsets = [6, 0, 0], sizes = [1, 1, 32], strides = [1, 1, 1]} : vector<8x8x32xf32> to vector<1x1x32xf32>
    %137 = vector.shape_cast %136 : vector<1x1x32xf32> to vector<1x32xf32>
    %138 = vector.extract_strided_slice %2 {offsets = [6, 0, 0], sizes = [1, 2, 32], strides = [1, 1, 1]} : vector<8x2x32xf32> to vector<1x2x32xf32>
    %139 = vector.shape_cast %138 : vector<1x2x32xf32> to vector<2x32xf32>
    %140 = vector.broadcast %137 : vector<1x32xf32> to vector<2x32xf32>
    %141 = arith.mulf %140, %139 : vector<2x32xf32>
    %142 = vector.extract_strided_slice %4 {offsets = [6, 0, 0], sizes = [1, 1, 32], strides = [1, 1, 1]} : vector<8x8x32xf32> to vector<1x1x32xf32>
    %143 = vector.shape_cast %142 : vector<1x1x32xf32> to vector<1x32xf32>
    %144 = vector.extract_strided_slice %0 {offsets = [6, 0, 0], sizes = [1, 2, 32], strides = [1, 1, 1]} : vector<8x2x32xf32> to vector<1x2x32xf32>
    %145 = vector.shape_cast %144 : vector<1x2x32xf32> to vector<2x32xf32>
    %146 = vector.broadcast %143 : vector<1x32xf32> to vector<2x32xf32>
    %147 = arith.mulf %146, %145 : vector<2x32xf32>
    %148 = vector.extract_strided_slice %5 {offsets = [6, 0, 0], sizes = [1, 1, 32], strides = [1, 1, 1]} : vector<8x8x32xf32> to vector<1x1x32xf32>
    %149 = vector.shape_cast %148 : vector<1x1x32xf32> to vector<1x32xf32>
    %150 = vector.extract_strided_slice %1 {offsets = [6, 0, 0], sizes = [1, 2, 32], strides = [1, 1, 1]} : vector<8x2x32xf32> to vector<1x2x32xf32>
    %151 = vector.shape_cast %150 : vector<1x2x32xf32> to vector<2x32xf32>
    %152 = vector.broadcast %149 : vector<1x32xf32> to vector<2x32xf32>
    %153 = arith.mulf %152, %151 : vector<2x32xf32>
    %154 = arith.subf %141, %153 : vector<2x32xf32>
    %155 = arith.addf %141, %147 : vector<2x32xf32>
    %156 = arith.addf %134, %154 : vector<2x32xf32>
    %157 = arith.addf %135, %155 : vector<2x32xf32>
    %158 = vector.extract_strided_slice %3 {offsets = [7, 0, 0], sizes = [1, 1, 32], strides = [1, 1, 1]} : vector<8x8x32xf32> to vector<1x1x32xf32>
    %159 = vector.shape_cast %158 : vector<1x1x32xf32> to vector<1x32xf32>
    %160 = vector.extract_strided_slice %2 {offsets = [7, 0, 0], sizes = [1, 2, 32], strides = [1, 1, 1]} : vector<8x2x32xf32> to vector<1x2x32xf32>
    %161 = vector.shape_cast %160 : vector<1x2x32xf32> to vector<2x32xf32>
    %162 = vector.broadcast %159 : vector<1x32xf32> to vector<2x32xf32>
    %163 = arith.mulf %162, %161 : vector<2x32xf32>
    %164 = vector.extract_strided_slice %4 {offsets = [7, 0, 0], sizes = [1, 1, 32], strides = [1, 1, 1]} : vector<8x8x32xf32> to vector<1x1x32xf32>
    %165 = vector.shape_cast %164 : vector<1x1x32xf32> to vector<1x32xf32>
    %166 = vector.extract_strided_slice %0 {offsets = [7, 0, 0], sizes = [1, 2, 32], strides = [1, 1, 1]} : vector<8x2x32xf32> to vector<1x2x32xf32>
    %167 = vector.shape_cast %166 : vector<1x2x32xf32> to vector<2x32xf32>
    %168 = vector.broadcast %165 : vector<1x32xf32> to vector<2x32xf32>
    %169 = arith.mulf %168, %167 : vector<2x32xf32>
    %170 = vector.extract_strided_slice %5 {offsets = [7, 0, 0], sizes = [1, 1, 32], strides = [1, 1, 1]} : vector<8x8x32xf32> to vector<1x1x32xf32>
    %171 = vector.shape_cast %170 : vector<1x1x32xf32> to vector<1x32xf32>
    %172 = vector.extract_strided_slice %1 {offsets = [7, 0, 0], sizes = [1, 2, 32], strides = [1, 1, 1]} : vector<8x2x32xf32> to vector<1x2x32xf32>
    %173 = vector.shape_cast %172 : vector<1x2x32xf32> to vector<2x32xf32>
    %174 = vector.broadcast %171 : vector<1x32xf32> to vector<2x32xf32>
    %175 = arith.mulf %174, %173 : vector<2x32xf32>
    %176 = arith.subf %163, %175 : vector<2x32xf32>
    %177 = arith.addf %163, %169 : vector<2x32xf32>
    %178 = arith.addf %156, %176 : vector<2x32xf32>
    %179 = arith.addf %157, %177 : vector<2x32xf32>
    %c0_14 = arith.constant 0 : index
    %c0_15 = arith.constant 0 : index
    %c0_16 = arith.constant 0 : index
    %180 = vector.load %arg6[%c0_14, %c0_15, %c0_16] : memref<8x2x32xf32, #tpu.memory_space<vmem>>, vector<1x2x32xf32>
    %181 = vector.shape_cast %180 : vector<1x2x32xf32> to vector<2x32xf32>
    %182 = vector.shape_cast %178 : vector<2x32xf32> to vector<1x2x32xf32>
    tpu.vector_store %arg6[%c0_14, %c0_15, %c0_16], %182 {strides = array<i32>} : memref<8x2x32xf32, #tpu.memory_space<vmem>>, vector<1x2x32xf32>,
    %c0_17 = arith.constant 0 : index
    %c0_18 = arith.constant 0 : index
    %c0_19 = arith.constant 0 : index
    %183 = vector.load %arg7[%c0_17, %c0_18, %c0_19] : memref<8x2x32xf32, #tpu.memory_space<vmem>>, vector<1x2x32xf32>
    %184 = vector.shape_cast %183 : vector<1x2x32xf32> to vector<2x32xf32>
    %185 = vector.shape_cast %179 : vector<2x32xf32> to vector<1x2x32xf32>
    tpu.vector_store %arg7[%c0_17, %c0_18, %c0_19], %185 {strides = array<i32>} : memref<8x2x32xf32, #tpu.memory_space<vmem>>, vector<1x2x32xf32>,
    %186 = vector.extract_strided_slice %3 {offsets = [0, 1, 0], sizes = [1, 1, 32], strides = [1, 1, 1]} : vector<8x8x32xf32> to vector<1x1x32xf32>
    %187 = vector.shape_cast %186 : vector<1x1x32xf32> to vector<1x32xf32>
    %188 = vector.extract_strided_slice %2 {offsets = [0, 0, 0], sizes = [1, 2, 32], strides = [1, 1, 1]} : vector<8x2x32xf32> to vector<1x2x32xf32>
    %189 = vector.shape_cast %188 : vector<1x2x32xf32> to vector<2x32xf32>
    %190 = vector.broadcast %187 : vector<1x32xf32> to vector<2x32xf32>
    %191 = arith.mulf %190, %189 : vector<2x32xf32>
    %192 = vector.extract_strided_slice %4 {offsets = [0, 1, 0], sizes = [1, 1, 32], strides = [1, 1, 1]} : vector<8x8x32xf32> to vector<1x1x32xf32>
    %193 = vector.shape_cast %192 : vector<1x1x32xf32> to vector<1x32xf32>
    %194 = vector.extract_strided_slice %0 {offsets = [0, 0, 0], sizes = [1, 2, 32], strides = [1, 1, 1]} : vector<8x2x32xf32> to vector<1x2x32xf32>
    %195 = vector.shape_cast %194 : vector<1x2x32xf32> to vector<2x32xf32>
    %196 = vector.broadcast %193 : vector<1x32xf32> to vector<2x32xf32>
    %197 = arith.mulf %196, %195 : vector<2x32xf32>
    %198 = vector.extract_strided_slice %5 {offsets = [0, 1, 0], sizes = [1, 1, 32], strides = [1, 1, 1]} : vector<8x8x32xf32> to vector<1x1x32xf32>
    %199 = vector.shape_cast %198 : vector<1x1x32xf32> to vector<1x32xf32>
    %200 = vector.extract_strided_slice %1 {offsets = [0, 0, 0], sizes = [1, 2, 32], strides = [1, 1, 1]} : vector<8x2x32xf32> to vector<1x2x32xf32>
    %201 = vector.shape_cast %200 : vector<1x2x32xf32> to vector<2x32xf32>
    %202 = vector.broadcast %199 : vector<1x32xf32> to vector<2x32xf32>
    %203 = arith.mulf %202, %201 : vector<2x32xf32>
    %204 = arith.subf %191, %203 : vector<2x32xf32>
    %205 = arith.addf %191, %197 : vector<2x32xf32>
    %206 = vector.extract_strided_slice %3 {offsets = [1, 1, 0], sizes = [1, 1, 32], strides = [1, 1, 1]} : vector<8x8x32xf32> to vector<1x1x32xf32>
    %207 = vector.shape_cast %206 : vector<1x1x32xf32> to vector<1x32xf32>
    %208 = vector.extract_strided_slice %2 {offsets = [1, 0, 0], sizes = [1, 2, 32], strides = [1, 1, 1]} : vector<8x2x32xf32> to vector<1x2x32xf32>
    %209 = vector.shape_cast %208 : vector<1x2x32xf32> to vector<2x32xf32>
    %210 = vector.broadcast %207 : vector<1x32xf32> to vector<2x32xf32>
    %211 = arith.mulf %210, %209 : vector<2x32xf32>
    %212 = vector.extract_strided_slice %4 {offsets = [1, 1, 0], sizes = [1, 1, 32], strides = [1, 1, 1]} : vector<8x8x32xf32> to vector<1x1x32xf32>
    %213 = vector.shape_cast %212 : vector<1x1x32xf32> to vector<1x32xf32>
    %214 = vector.extract_strided_slice %0 {offsets = [1, 0, 0], sizes = [1, 2, 32], strides = [1, 1, 1]} : vector<8x2x32xf32> to vector<1x2x32xf32>
    %215 = vector.shape_cast %214 : vector<1x2x32xf32> to vector<2x32xf32>
    %216 = vector.broadcast %213 : vector<1x32xf32> to vector<2x32xf32>
    %217 = arith.mulf %216, %215 : vector<2x32xf32>
    %218 = vector.extract_strided_slice %5 {offsets = [1, 1, 0], sizes = [1, 1, 32], strides = [1, 1, 1]} : vector<8x8x32xf32> to vector<1x1x32xf32>
    %219 = vector.shape_cast %218 : vector<1x1x32xf32> to vector<1x32xf32>
    %220 = vector.extract_strided_slice %1 {offsets = [1, 0, 0], sizes = [1, 2, 32], strides = [1, 1, 1]} : vector<8x2x32xf32> to vector<1x2x32xf32>
    %221 = vector.shape_cast %220 : vector<1x2x32xf32> to vector<2x32xf32>
    %222 = vector.broadcast %219 : vector<1x32xf32> to vector<2x32xf32>
    %223 = arith.mulf %222, %221 : vector<2x32xf32>
    %224 = arith.subf %211, %223 : vector<2x32xf32>
    %225 = arith.addf %211, %217 : vector<2x32xf32>
    %226 = arith.addf %204, %224 : vector<2x32xf32>
    %227 = arith.addf %205, %225 : vector<2x32xf32>
    %228 = vector.extract_strided_slice %3 {offsets = [2, 1, 0], sizes = [1, 1, 32], strides = [1, 1, 1]} : vector<8x8x32xf32> to vector<1x1x32xf32>
    %229 = vector.shape_cast %228 : vector<1x1x32xf32> to vector<1x32xf32>
    %230 = vector.extract_strided_slice %2 {offsets = [2, 0, 0], sizes = [1, 2, 32], strides = [1, 1, 1]} : vector<8x2x32xf32> to vector<1x2x32xf32>
    %231 = vector.shape_cast %230 : vector<1x2x32xf32> to vector<2x32xf32>
    %232 = vector.broadcast %229 : vector<1x32xf32> to vector<2x32xf32>
    %233 = arith.mulf %232, %231 : vector<2x32xf32>
    %234 = vector.extract_strided_slice %4 {offsets = [2, 1, 0], sizes = [1, 1, 32], strides = [1, 1, 1]} : vector<8x8x32xf32> to vector<1x1x32xf32>
    %235 = vector.shape_cast %234 : vector<1x1x32xf32> to vector<1x32xf32>
    %236 = vector.extract_strided_slice %0 {offsets = [2, 0, 0], sizes = [1, 2, 32], strides = [1, 1, 1]} : vector<8x2x32xf32> to vector<1x2x32xf32>
    %237 = vector.shape_cast %236 : vector<1x2x32xf32> to vector<2x32xf32>
    %238 = vector.broadcast %235 : vector<1x32xf32> to vector<2x32xf32>
    %239 = arith.mulf %238, %237 : vector<2x32xf32>
    %240 = vector.extract_strided_slice %5 {offsets = [2, 1, 0], sizes = [1, 1, 32], strides = [1, 1, 1]} : vector<8x8x32xf32> to vector<1x1x32xf32>
    %241 = vector.shape_cast %240 : vector<1x1x32xf32> to vector<1x32xf32>
    %242 = vector.extract_strided_slice %1 {offsets = [2, 0, 0], sizes = [1, 2, 32], strides = [1, 1, 1]} : vector<8x2x32xf32> to vector<1x2x32xf32>
    %243 = vector.shape_cast %242 : vector<1x2x32xf32> to vector<2x32xf32>
    %244 = vector.broadcast %241 : vector<1x32xf32> to vector<2x32xf32>
    %245 = arith.mulf %244, %243 : vector<2x32xf32>
    %246 = arith.subf %233, %245 : vector<2x32xf32>
    %247 = arith.addf %233, %239 : vector<2x32xf32>
    %248 = arith.addf %226, %246 : vector<2x32xf32>
    %249 = arith.addf %227, %247 : vector<2x32xf32>
    %250 = vector.extract_strided_slice %3 {offsets = [3, 1, 0], sizes = [1, 1, 32], strides = [1, 1, 1]} : vector<8x8x32xf32> to vector<1x1x32xf32>
    %251 = vector.shape_cast %250 : vector<1x1x32xf32> to vector<1x32xf32>
    %252 = vector.extract_strided_slice %2 {offsets = [3, 0, 0], sizes = [1, 2, 32], strides = [1, 1, 1]} : vector<8x2x32xf32> to vector<1x2x32xf32>
    %253 = vector.shape_cast %252 : vector<1x2x32xf32> to vector<2x32xf32>
    %254 = vector.broadcast %251 : vector<1x32xf32> to vector<2x32xf32>
    %255 = arith.mulf %254, %253 : vector<2x32xf32>
    %256 = vector.extract_strided_slice %4 {offsets = [3, 1, 0], sizes = [1, 1, 32], strides = [1, 1, 1]} : vector<8x8x32xf32> to vector<1x1x32xf32>
    %257 = vector.shape_cast %256 : vector<1x1x32xf32> to vector<1x32xf32>
    %258 = vector.extract_strided_slice %0 {offsets = [3, 0, 0], sizes = [1, 2, 32], strides = [1, 1, 1]} : vector<8x2x32xf32> to vector<1x2x32xf32>
    %259 = vector.shape_cast %258 : vector<1x2x32xf32> to vector<2x32xf32>
    %260 = vector.broadcast %257 : vector<1x32xf32> to vector<2x32xf32>
    %261 = arith.mulf %260, %259 : vector<2x32xf32>
    %262 = vector.extract_strided_slice %5 {offsets = [3, 1, 0], sizes = [1, 1, 32], strides = [1, 1, 1]} : vector<8x8x32xf32> to vector<1x1x32xf32>
    %263 = vector.shape_cast %262 : vector<1x1x32xf32> to vector<1x32xf32>
    %264 = vector.extract_strided_slice %1 {offsets = [3, 0, 0], sizes = [1, 2, 32], strides = [1, 1, 1]} : vector<8x2x32xf32> to vector<1x2x32xf32>
    %265 = vector.shape_cast %264 : vector<1x2x32xf32> to vector<2x32xf32>
    %266 = vector.broadcast %263 : vector<1x32xf32> to vector<2x32xf32>
    %267 = arith.mulf %266, %265 : vector<2x32xf32>
    %268 = arith.subf %255, %267 : vector<2x32xf32>
    %269 = arith.addf %255, %261 : vector<2x32xf32>
    %270 = arith.addf %248, %268 : vector<2x32xf32>
    %271 = arith.addf %249, %269 : vector<2x32xf32>
    %272 = vector.extract_strided_slice %3 {offsets = [4, 1, 0], sizes = [1, 1, 32], strides = [1, 1, 1]} : vector<8x8x32xf32> to vector<1x1x32xf32>
    %273 = vector.shape_cast %272 : vector<1x1x32xf32> to vector<1x32xf32>
    %274 = vector.extract_strided_slice %2 {offsets = [4, 0, 0], sizes = [1, 2, 32], strides = [1, 1, 1]} : vector<8x2x32xf32> to vector<1x2x32xf32>
    %275 = vector.shape_cast %274 : vector<1x2x32xf32> to vector<2x32xf32>
    %276 = vector.broadcast %273 : vector<1x32xf32> to vector<2x32xf32>
    %277 = arith.mulf %276, %275 : vector<2x32xf32>
    %278 = vector.extract_strided_slice %4 {offsets = [4, 1, 0], sizes = [1, 1, 32], strides = [1, 1, 1]} : vector<8x8x32xf32> to vector<1x1x32xf32>
    %279 = vector.shape_cast %278 : vector<1x1x32xf32> to vector<1x32xf32>
    %280 = vector.extract_strided_slice %0 {offsets = [4, 0, 0], sizes = [1, 2, 32], strides = [1, 1, 1]} : vector<8x2x32xf32> to vector<1x2x32xf32>
    %281 = vector.shape_cast %280 : vector<1x2x32xf32> to vector<2x32xf32>
    %282 = vector.broadcast %279 : vector<1x32xf32> to vector<2x32xf32>
    %283 = arith.mulf %282, %281 : vector<2x32xf32>
    %284 = vector.extract_strided_slice %5 {offsets = [4, 1, 0], sizes = [1, 1, 32], strides = [1, 1, 1]} : vector<8x8x32xf32> to vector<1x1x32xf32>
    %285 = vector.shape_cast %284 : vector<1x1x32xf32> to vector<1x32xf32>
    %286 = vector.extract_strided_slice %1 {offsets = [4, 0, 0], sizes = [1, 2, 32], strides = [1, 1, 1]} : vector<8x2x32xf32> to vector<1x2x32xf32>
    %287 = vector.shape_cast %286 : vector<1x2x32xf32> to vector<2x32xf32>
    %288 = vector.broadcast %285 : vector<1x32xf32> to vector<2x32xf32>
    %289 = arith.mulf %288, %287 : vector<2x32xf32>
    %290 = arith.subf %277, %289 : vector<2x32xf32>
    %291 = arith.addf %277, %283 : vector<2x32xf32>
    %292 = arith.addf %270, %290 : vector<2x32xf32>
    %293 = arith.addf %271, %291 : vector<2x32xf32>
    %294 = vector.extract_strided_slice %3 {offsets = [5, 1, 0], sizes = [1, 1, 32], strides = [1, 1, 1]} : vector<8x8x32xf32> to vector<1x1x32xf32>
    %295 = vector.shape_cast %294 : vector<1x1x32xf32> to vector<1x32xf32>
    %296 = vector.extract_strided_slice %2 {offsets = [5, 0, 0], sizes = [1, 2, 32], strides = [1, 1, 1]} : vector<8x2x32xf32> to vector<1x2x32xf32>
    %297 = vector.shape_cast %296 : vector<1x2x32xf32> to vector<2x32xf32>
    %298 = vector.broadcast %295 : vector<1x32xf32> to vector<2x32xf32>
    %299 = arith.mulf %298, %297 : vector<2x32xf32>
    %300 = vector.extract_strided_slice %4 {offsets = [5, 1, 0], sizes = [1, 1, 32], strides = [1, 1, 1]} : vector<8x8x32xf32> to vector<1x1x32xf32>
    %301 = vector.shape_cast %300 : vector<1x1x32xf32> to vector<1x32xf32>
    %302 = vector.extract_strided_slice %0 {offsets = [5, 0, 0], sizes = [1, 2, 32], strides = [1, 1, 1]} : vector<8x2x32xf32> to vector<1x2x32xf32>
    %303 = vector.shape_cast %302 : vector<1x2x32xf32> to vector<2x32xf32>
    %304 = vector.broadcast %301 : vector<1x32xf32> to vector<2x32xf32>
    %305 = arith.mulf %304, %303 : vector<2x32xf32>
    %306 = vector.extract_strided_slice %5 {offsets = [5, 1, 0], sizes = [1, 1, 32], strides = [1, 1, 1]} : vector<8x8x32xf32> to vector<1x1x32xf32>
    %307 = vector.shape_cast %306 : vector<1x1x32xf32> to vector<1x32xf32>
    %308 = vector.extract_strided_slice %1 {offsets = [5, 0, 0], sizes = [1, 2, 32], strides = [1, 1, 1]} : vector<8x2x32xf32> to vector<1x2x32xf32>
    %309 = vector.shape_cast %308 : vector<1x2x32xf32> to vector<2x32xf32>
    %310 = vector.broadcast %307 : vector<1x32xf32> to vector<2x32xf32>
    %311 = arith.mulf %310, %309 : vector<2x32xf32>
    %312 = arith.subf %299, %311 : vector<2x32xf32>
    %313 = arith.addf %299, %305 : vector<2x32xf32>
    %314 = arith.addf %292, %312 : vector<2x32xf32>
    %315 = arith.addf %293, %313 : vector<2x32xf32>
    %316 = vector.extract_strided_slice %3 {offsets = [6, 1, 0], sizes = [1, 1, 32], strides = [1, 1, 1]} : vector<8x8x32xf32> to vector<1x1x32xf32>
    %317 = vector.shape_cast %316 : vector<1x1x32xf32> to vector<1x32xf32>
    %318 = vector.extract_strided_slice %2 {offsets = [6, 0, 0], sizes = [1, 2, 32], strides = [1, 1, 1]} : vector<8x2x32xf32> to vector<1x2x32xf32>
    %319 = vector.shape_cast %318 : vector<1x2x32xf32> to vector<2x32xf32>
    %320 = vector.broadcast %317 : vector<1x32xf32> to vector<2x32xf32>
    %321 = arith.mulf %320, %319 : vector<2x32xf32>
    %322 = vector.extract_strided_slice %4 {offsets = [6, 1, 0], sizes = [1, 1, 32], strides = [1, 1, 1]} : vector<8x8x32xf32> to vector<1x1x32xf32>
    %323 = vector.shape_cast %322 : vector<1x1x32xf32> to vector<1x32xf32>
    %324 = vector.extract_strided_slice %0 {offsets = [6, 0, 0], sizes = [1, 2, 32], strides = [1, 1, 1]} : vector<8x2x32xf32> to vector<1x2x32xf32>
    %325 = vector.shape_cast %324 : vector<1x2x32xf32> to vector<2x32xf32>
    %326 = vector.broadcast %323 : vector<1x32xf32> to vector<2x32xf32>
    %327 = arith.mulf %326, %325 : vector<2x32xf32>
    %328 = vector.extract_strided_slice %5 {offsets = [6, 1, 0], sizes = [1, 1, 32], strides = [1, 1, 1]} : vector<8x8x32xf32> to vector<1x1x32xf32>
    %329 = vector.shape_cast %328 : vector<1x1x32xf32> to vector<1x32xf32>
    %330 = vector.extract_strided_slice %1 {offsets = [6, 0, 0], sizes = [1, 2, 32], strides = [1, 1, 1]} : vector<8x2x32xf32> to vector<1x2x32xf32>
    %331 = vector.shape_cast %330 : vector<1x2x32xf32> to vector<2x32xf32>
    %332 = vector.broadcast %329 : vector<1x32xf32> to vector<2x32xf32>
    %333 = arith.mulf %332, %331 : vector<2x32xf32>
    %334 = arith.subf %321, %333 : vector<2x32xf32>
    %335 = arith.addf %321, %327 : vector<2x32xf32>
    %336 = arith.addf %314, %334 : vector<2x32xf32>
    %337 = arith.addf %315, %335 : vector<2x32xf32>
    %338 = vector.extract_strided_slice %3 {offsets = [7, 1, 0], sizes = [1, 1, 32], strides = [1, 1, 1]} : vector<8x8x32xf32> to vector<1x1x32xf32>
    %339 = vector.shape_cast %338 : vector<1x1x32xf32> to vector<1x32xf32>
    %340 = vector.extract_strided_slice %2 {offsets = [7, 0, 0], sizes = [1, 2, 32], strides = [1, 1, 1]} : vector<8x2x32xf32> to vector<1x2x32xf32>
    %341 = vector.shape_cast %340 : vector<1x2x32xf32> to vector<2x32xf32>
    %342 = vector.broadcast %339 : vector<1x32xf32> to vector<2x32xf32>
    %343 = arith.mulf %342, %341 : vector<2x32xf32>
    %344 = vector.extract_strided_slice %4 {offsets = [7, 1, 0], sizes = [1, 1, 32], strides = [1, 1, 1]} : vector<8x8x32xf32> to vector<1x1x32xf32>
    %345 = vector.shape_cast %344 : vector<1x1x32xf32> to vector<1x32xf32>
    %346 = vector.extract_strided_slice %0 {offsets = [7, 0, 0], sizes = [1, 2, 32], strides = [1, 1, 1]} : vector<8x2x32xf32> to vector<1x2x32xf32>
    %347 = vector.shape_cast %346 : vector<1x2x32xf32> to vector<2x32xf32>
    %348 = vector.broadcast %345 : vector<1x32xf32> to vector<2x32xf32>
    %349 = arith.mulf %348, %347 : vector<2x32xf32>
    %350 = vector.extract_strided_slice %5 {offsets = [7, 1, 0], sizes = [1, 1, 32], strides = [1, 1, 1]} : vector<8x8x32xf32> to vector<1x1x32xf32>
    %351 = vector.shape_cast %350 : vector<1x1x32xf32> to vector<1x32xf32>
    %352 = vector.extract_strided_slice %1 {offsets = [7, 0, 0], sizes = [1, 2, 32], strides = [1, 1, 1]} : vector<8x2x32xf32> to vector<1x2x32xf32>
    %353 = vector.shape_cast %352 : vector<1x2x32xf32> to vector<2x32xf32>
    %354 = vector.broadcast %351 : vector<1x32xf32> to vector<2x32xf32>
    %355 = arith.mulf %354, %353 : vector<2x32xf32>
    %356 = arith.subf %343, %355 : vector<2x32xf32>
    %357 = arith.addf %343, %349 : vector<2x32xf32>
    %358 = arith.addf %336, %356 : vector<2x32xf32>
    %359 = arith.addf %337, %357 : vector<2x32xf32>
    %c1 = arith.constant 1 : index
    %c0_20 = arith.constant 0 : index
    %c0_21 = arith.constant 0 : index
    %360 = vector.load %arg6[%c1, %c0_20, %c0_21] : memref<8x2x32xf32, #tpu.memory_space<vmem>>, vector<1x2x32xf32>
    %361 = vector.shape_cast %360 : vector<1x2x32xf32> to vector<2x32xf32>
    %362 = vector.shape_cast %358 : vector<2x32xf32> to vector<1x2x32xf32>
    tpu.vector_store %arg6[%c1, %c0_20, %c0_21], %362 {strides = array<i32>} : memref<8x2x32xf32, #tpu.memory_space<vmem>>, vector<1x2x32xf32>,
    %c1_22 = arith.constant 1 : index
    %c0_23 = arith.constant 0 : index
    %c0_24 = arith.constant 0 : index
    %363 = vector.load %arg7[%c1_22, %c0_23, %c0_24] : memref<8x2x32xf32, #tpu.memory_space<vmem>>, vector<1x2x32xf32>
    %364 = vector.shape_cast %363 : vector<1x2x32xf32> to vector<2x32xf32>
    %365 = vector.shape_cast %359 : vector<2x32xf32> to vector<1x2x32xf32>
    tpu.vector_store %arg7[%c1_22, %c0_23, %c0_24], %365 {strides = array<i32>} : memref<8x2x32xf32, #tpu.memory_space<vmem>>, vector<1x2x32xf32>,
    %366 = vector.extract_strided_slice %3 {offsets = [0, 2, 0], sizes = [1, 1, 32], strides = [1, 1, 1]} : vector<8x8x32xf32> to vector<1x1x32xf32>
    %367 = vector.shape_cast %366 : vector<1x1x32xf32> to vector<1x32xf32>
    %368 = vector.extract_strided_slice %2 {offsets = [0, 0, 0], sizes = [1, 2, 32], strides = [1, 1, 1]} : vector<8x2x32xf32> to vector<1x2x32xf32>
    %369 = vector.shape_cast %368 : vector<1x2x32xf32> to vector<2x32xf32>
    %370 = vector.broadcast %367 : vector<1x32xf32> to vector<2x32xf32>
    %371 = arith.mulf %370, %369 : vector<2x32xf32>
    %372 = vector.extract_strided_slice %4 {offsets = [0, 2, 0], sizes = [1, 1, 32], strides = [1, 1, 1]} : vector<8x8x32xf32> to vector<1x1x32xf32>
    %373 = vector.shape_cast %372 : vector<1x1x32xf32> to vector<1x32xf32>
    %374 = vector.extract_strided_slice %0 {offsets = [0, 0, 0], sizes = [1, 2, 32], strides = [1, 1, 1]} : vector<8x2x32xf32> to vector<1x2x32xf32>
    %375 = vector.shape_cast %374 : vector<1x2x32xf32> to vector<2x32xf32>
    %376 = vector.broadcast %373 : vector<1x32xf32> to vector<2x32xf32>
    %377 = arith.mulf %376, %375 : vector<2x32xf32>
    %378 = vector.extract_strided_slice %5 {offsets = [0, 2, 0], sizes = [1, 1, 32], strides = [1, 1, 1]} : vector<8x8x32xf32> to vector<1x1x32xf32>
    %379 = vector.shape_cast %378 : vector<1x1x32xf32> to vector<1x32xf32>
    %380 = vector.extract_strided_slice %1 {offsets = [0, 0, 0], sizes = [1, 2, 32], strides = [1, 1, 1]} : vector<8x2x32xf32> to vector<1x2x32xf32>
    %381 = vector.shape_cast %380 : vector<1x2x32xf32> to vector<2x32xf32>
    %382 = vector.broadcast %379 : vector<1x32xf32> to vector<2x32xf32>
    %383 = arith.mulf %382, %381 : vector<2x32xf32>
    %384 = arith.subf %371, %383 : vector<2x32xf32>
    %385 = arith.addf %371, %377 : vector<2x32xf32>
    %386 = vector.extract_strided_slice %3 {offsets = [1, 2, 0], sizes = [1, 1, 32], strides = [1, 1, 1]} : vector<8x8x32xf32> to vector<1x1x32xf32>
    %387 = vector.shape_cast %386 : vector<1x1x32xf32> to vector<1x32xf32>
    %388 = vector.extract_strided_slice %2 {offsets = [1, 0, 0], sizes = [1, 2, 32], strides = [1, 1, 1]} : vector<8x2x32xf32> to vector<1x2x32xf32>
    %389 = vector.shape_cast %388 : vector<1x2x32xf32> to vector<2x32xf32>
    %390 = vector.broadcast %387 : vector<1x32xf32> to vector<2x32xf32>
    %391 = arith.mulf %390, %389 : vector<2x32xf32>
    %392 = vector.extract_strided_slice %4 {offsets = [1, 2, 0], sizes = [1, 1, 32], strides = [1, 1, 1]} : vector<8x8x32xf32> to vector<1x1x32xf32>
    %393 = vector.shape_cast %392 : vector<1x1x32xf32> to vector<1x32xf32>
    %394 = vector.extract_strided_slice %0 {offsets = [1, 0, 0], sizes = [1, 2, 32], strides = [1, 1, 1]} : vector<8x2x32xf32> to vector<1x2x32xf32>
    %395 = vector.shape_cast %394 : vector<1x2x32xf32> to vector<2x32xf32>
    %396 = vector.broadcast %393 : vector<1x32xf32> to vector<2x32xf32>
    %397 = arith.mulf %396, %395 : vector<2x32xf32>
    %398 = vector.extract_strided_slice %5 {offsets = [1, 2, 0], sizes = [1, 1, 32], strides = [1, 1, 1]} : vector<8x8x32xf32> to vector<1x1x32xf32>
    %399 = vector.shape_cast %398 : vector<1x1x32xf32> to vector<1x32xf32>
    %400 = vector.extract_strided_slice %1 {offsets = [1, 0, 0], sizes = [1, 2, 32], strides = [1, 1, 1]} : vector<8x2x32xf32> to vector<1x2x32xf32>
    %401 = vector.shape_cast %400 : vector<1x2x32xf32> to vector<2x32xf32>
    %402 = vector.broadcast %399 : vector<1x32xf32> to vector<2x32xf32>
    %403 = arith.mulf %402, %401 : vector<2x32xf32>
    %404 = arith.subf %391, %403 : vector<2x32xf32>
    %405 = arith.addf %391, %397 : vector<2x32xf32>
    %406 = arith.addf %384, %404 : vector<2x32xf32>
    %407 = arith.addf %385, %405 : vector<2x32xf32>
    %408 = vector.extract_strided_slice %3 {offsets = [2, 2, 0], sizes = [1, 1, 32], strides = [1, 1, 1]} : vector<8x8x32xf32> to vector<1x1x32xf32>
    %409 = vector.shape_cast %408 : vector<1x1x32xf32> to vector<1x32xf32>
    %410 = vector.extract_strided_slice %2 {offsets = [2, 0, 0], sizes = [1, 2, 32], strides = [1, 1, 1]} : vector<8x2x32xf32> to vector<1x2x32xf32>
    %411 = vector.shape_cast %410 : vector<1x2x32xf32> to vector<2x32xf32>
    %412 = vector.broadcast %409 : vector<1x32xf32> to vector<2x32xf32>
    %413 = arith.mulf %412, %411 : vector<2x32xf32>
    %414 = vector.extract_strided_slice %4 {offsets = [2, 2, 0], sizes = [1, 1, 32], strides = [1, 1, 1]} : vector<8x8x32xf32> to vector<1x1x32xf32>
    %415 = vector.shape_cast %414 : vector<1x1x32xf32> to vector<1x32xf32>
    %416 = vector.extract_strided_slice %0 {offsets = [2, 0, 0], sizes = [1, 2, 32], strides = [1, 1, 1]} : vector<8x2x32xf32> to vector<1x2x32xf32>
    %417 = vector.shape_cast %416 : vector<1x2x32xf32> to vector<2x32xf32>
    %418 = vector.broadcast %415 : vector<1x32xf32> to vector<2x32xf32>
    %419 = arith.mulf %418, %417 : vector<2x32xf32>
    %420 = vector.extract_strided_slice %5 {offsets = [2, 2, 0], sizes = [1, 1, 32], strides = [1, 1, 1]} : vector<8x8x32xf32> to vector<1x1x32xf32>
    %421 = vector.shape_cast %420 : vector<1x1x32xf32> to vector<1x32xf32>
    %422 = vector.extract_strided_slice %1 {offsets = [2, 0, 0], sizes = [1, 2, 32], strides = [1, 1, 1]} : vector<8x2x32xf32> to vector<1x2x32xf32>
    %423 = vector.shape_cast %422 : vector<1x2x32xf32> to vector<2x32xf32>
    %424 = vector.broadcast %421 : vector<1x32xf32> to vector<2x32xf32>
    %425 = arith.mulf %424, %423 : vector<2x32xf32>
    %426 = arith.subf %413, %425 : vector<2x32xf32>
    %427 = arith.addf %413, %419 : vector<2x32xf32>
    %428 = arith.addf %406, %426 : vector<2x32xf32>
    %429 = arith.addf %407, %427 : vector<2x32xf32>
    %430 = vector.extract_strided_slice %3 {offsets = [3, 2, 0], sizes = [1, 1, 32], strides = [1, 1, 1]} : vector<8x8x32xf32> to vector<1x1x32xf32>
    %431 = vector.shape_cast %430 : vector<1x1x32xf32> to vector<1x32xf32>
    %432 = vector.extract_strided_slice %2 {offsets = [3, 0, 0], sizes = [1, 2, 32], strides = [1, 1, 1]} : vector<8x2x32xf32> to vector<1x2x32xf32>
    %433 = vector.shape_cast %432 : vector<1x2x32xf32> to vector<2x32xf32>
    %434 = vector.broadcast %431 : vector<1x32xf32> to vector<2x32xf32>
    %435 = arith.mulf %434, %433 : vector<2x32xf32>
    %436 = vector.extract_strided_slice %4 {offsets = [3, 2, 0], sizes = [1, 1, 32], strides = [1, 1, 1]} : vector<8x8x32xf32> to vector<1x1x32xf32>
    %437 = vector.shape_cast %436 : vector<1x1x32xf32> to vector<1x32xf32>
    %438 = vector.extract_strided_slice %0 {offsets = [3, 0, 0], sizes = [1, 2, 32], strides = [1, 1, 1]} : vector<8x2x32xf32> to vector<1x2x32xf32>
    %439 = vector.shape_cast %438 : vector<1x2x32xf32> to vector<2x32xf32>
    %440 = vector.broadcast %437 : vector<1x32xf32> to vector<2x32xf32>
    %441 = arith.mulf %440, %439 : vector<2x32xf32>
    %442 = vector.extract_strided_slice %5 {offsets = [3, 2, 0], sizes = [1, 1, 32], strides = [1, 1, 1]} : vector<8x8x32xf32> to vector<1x1x32xf32>
    %443 = vector.shape_cast %442 : vector<1x1x32xf32> to vector<1x32xf32>
    %444 = vector.extract_strided_slice %1 {offsets = [3, 0, 0], sizes = [1, 2, 32], strides = [1, 1, 1]} : vector<8x2x32xf32> to vector<1x2x32xf32>
    %445 = vector.shape_cast %444 : vector<1x2x32xf32> to vector<2x32xf32>
    %446 = vector.broadcast %443 : vector<1x32xf32> to vector<2x32xf32>
    %447 = arith.mulf %446, %445 : vector<2x32xf32>
    %448 = arith.subf %435, %447 : vector<2x32xf32>
    %449 = arith.addf %435, %441 : vector<2x32xf32>
    %450 = arith.addf %428, %448 : vector<2x32xf32>
    %451 = arith.addf %429, %449 : vector<2x32xf32>
    %452 = vector.extract_strided_slice %3 {offsets = [4, 2, 0], sizes = [1, 1, 32], strides = [1, 1, 1]} : vector<8x8x32xf32> to vector<1x1x32xf32>
    %453 = vector.shape_cast %452 : vector<1x1x32xf32> to vector<1x32xf32>
    %454 = vector.extract_strided_slice %2 {offsets = [4, 0, 0], sizes = [1, 2, 32], strides = [1, 1, 1]} : vector<8x2x32xf32> to vector<1x2x32xf32>
    %455 = vector.shape_cast %454 : vector<1x2x32xf32> to vector<2x32xf32>
    %456 = vector.broadcast %453 : vector<1x32xf32> to vector<2x32xf32>
    %457 = arith.mulf %456, %455 : vector<2x32xf32>
    %458 = vector.extract_strided_slice %4 {offsets = [4, 2, 0], sizes = [1, 1, 32], strides = [1, 1, 1]} : vector<8x8x32xf32> to vector<1x1x32xf32>
    %459 = vector.shape_cast %458 : vector<1x1x32xf32> to vector<1x32xf32>
    %460 = vector.extract_strided_slice %0 {offsets = [4, 0, 0], sizes = [1, 2, 32], strides = [1, 1, 1]} : vector<8x2x32xf32> to vector<1x2x32xf32>
    %461 = vector.shape_cast %460 : vector<1x2x32xf32> to vector<2x32xf32>
    %462 = vector.broadcast %459 : vector<1x32xf32> to vector<2x32xf32>
    %463 = arith.mulf %462, %461 : vector<2x32xf32>
    %464 = vector.extract_strided_slice %5 {offsets = [4, 2, 0], sizes = [1, 1, 32], strides = [1, 1, 1]} : vector<8x8x32xf32> to vector<1x1x32xf32>
    %465 = vector.shape_cast %464 : vector<1x1x32xf32> to vector<1x32xf32>
    %466 = vector.extract_strided_slice %1 {offsets = [4, 0, 0], sizes = [1, 2, 32], strides = [1, 1, 1]} : vector<8x2x32xf32> to vector<1x2x32xf32>
    %467 = vector.shape_cast %466 : vector<1x2x32xf32> to vector<2x32xf32>
    %468 = vector.broadcast %465 : vector<1x32xf32> to vector<2x32xf32>
    %469 = arith.mulf %468, %467 : vector<2x32xf32>
    %470 = arith.subf %457, %469 : vector<2x32xf32>
    %471 = arith.addf %457, %463 : vector<2x32xf32>
    %472 = arith.addf %450, %470 : vector<2x32xf32>
    %473 = arith.addf %451, %471 : vector<2x32xf32>
    %474 = vector.extract_strided_slice %3 {offsets = [5, 2, 0], sizes = [1, 1, 32], strides = [1, 1, 1]} : vector<8x8x32xf32> to vector<1x1x32xf32>
    %475 = vector.shape_cast %474 : vector<1x1x32xf32> to vector<1x32xf32>
    %476 = vector.extract_strided_slice %2 {offsets = [5, 0, 0], sizes = [1, 2, 32], strides = [1, 1, 1]} : vector<8x2x32xf32> to vector<1x2x32xf32>
    %477 = vector.shape_cast %476 : vector<1x2x32xf32> to vector<2x32xf32>
    %478 = vector.broadcast %475 : vector<1x32xf32> to vector<2x32xf32>
    %479 = arith.mulf %478, %477 : vector<2x32xf32>
    %480 = vector.extract_strided_slice %4 {offsets = [5, 2, 0], sizes = [1, 1, 32], strides = [1, 1, 1]} : vector<8x8x32xf32> to vector<1x1x32xf32>
    %481 = vector.shape_cast %480 : vector<1x1x32xf32> to vector<1x32xf32>
    %482 = vector.extract_strided_slice %0 {offsets = [5, 0, 0], sizes = [1, 2, 32], strides = [1, 1, 1]} : vector<8x2x32xf32> to vector<1x2x32xf32>
    %483 = vector.shape_cast %482 : vector<1x2x32xf32> to vector<2x32xf32>
    %484 = vector.broadcast %481 : vector<1x32xf32> to vector<2x32xf32>
    %485 = arith.mulf %484, %483 : vector<2x32xf32>
    %486 = vector.extract_strided_slice %5 {offsets = [5, 2, 0], sizes = [1, 1, 32], strides = [1, 1, 1]} : vector<8x8x32xf32> to vector<1x1x32xf32>
    %487 = vector.shape_cast %486 : vector<1x1x32xf32> to vector<1x32xf32>
    %488 = vector.extract_strided_slice %1 {offsets = [5, 0, 0], sizes = [1, 2, 32], strides = [1, 1, 1]} : vector<8x2x32xf32> to vector<1x2x32xf32>
    %489 = vector.shape_cast %488 : vector<1x2x32xf32> to vector<2x32xf32>
    %490 = vector.broadcast %487 : vector<1x32xf32> to vector<2x32xf32>
    %491 = arith.mulf %490, %489 : vector<2x32xf32>
    %492 = arith.subf %479, %491 : vector<2x32xf32>
    %493 = arith.addf %479, %485 : vector<2x32xf32>
    %494 = arith.addf %472, %492 : vector<2x32xf32>
    %495 = arith.addf %473, %493 : vector<2x32xf32>
    %496 = vector.extract_strided_slice %3 {offsets = [6, 2, 0], sizes = [1, 1, 32], strides = [1, 1, 1]} : vector<8x8x32xf32> to vector<1x1x32xf32>
    %497 = vector.shape_cast %496 : vector<1x1x32xf32> to vector<1x32xf32>
    %498 = vector.extract_strided_slice %2 {offsets = [6, 0, 0], sizes = [1, 2, 32], strides = [1, 1, 1]} : vector<8x2x32xf32> to vector<1x2x32xf32>
    %499 = vector.shape_cast %498 : vector<1x2x32xf32> to vector<2x32xf32>
    %500 = vector.broadcast %497 : vector<1x32xf32> to vector<2x32xf32>
    %501 = arith.mulf %500, %499 : vector<2x32xf32>
    %502 = vector.extract_strided_slice %4 {offsets = [6, 2, 0], sizes = [1, 1, 32], strides = [1, 1, 1]} : vector<8x8x32xf32> to vector<1x1x32xf32>
    %503 = vector.shape_cast %502 : vector<1x1x32xf32> to vector<1x32xf32>
    %504 = vector.extract_strided_slice %0 {offsets = [6, 0, 0], sizes = [1, 2, 32], strides = [1, 1, 1]} : vector<8x2x32xf32> to vector<1x2x32xf32>
    %505 = vector.shape_cast %504 : vector<1x2x32xf32> to vector<2x32xf32>
    %506 = vector.broadcast %503 : vector<1x32xf32> to vector<2x32xf32>
    %507 = arith.mulf %506, %505 : vector<2x32xf32>
    %508 = vector.extract_strided_slice %5 {offsets = [6, 2, 0], sizes = [1, 1, 32], strides = [1, 1, 1]} : vector<8x8x32xf32> to vector<1x1x32xf32>
    %509 = vector.shape_cast %508 : vector<1x1x32xf32> to vector<1x32xf32>
    %510 = vector.extract_strided_slice %1 {offsets = [6, 0, 0], sizes = [1, 2, 32], strides = [1, 1, 1]} : vector<8x2x32xf32> to vector<1x2x32xf32>
    %511 = vector.shape_cast %510 : vector<1x2x32xf32> to vector<2x32xf32>
    %512 = vector.broadcast %509 : vector<1x32xf32> to vector<2x32xf32>
    %513 = arith.mulf %512, %511 : vector<2x32xf32>
    %514 = arith.subf %501, %513 : vector<2x32xf32>
    %515 = arith.addf %501, %507 : vector<2x32xf32>
    %516 = arith.addf %494, %514 : vector<2x32xf32>
    %517 = arith.addf %495, %515 : vector<2x32xf32>
    %518 = vector.extract_strided_slice %3 {offsets = [7, 2, 0], sizes = [1, 1, 32], strides = [1, 1, 1]} : vector<8x8x32xf32> to vector<1x1x32xf32>
    %519 = vector.shape_cast %518 : vector<1x1x32xf32> to vector<1x32xf32>
    %520 = vector.extract_strided_slice %2 {offsets = [7, 0, 0], sizes = [1, 2, 32], strides = [1, 1, 1]} : vector<8x2x32xf32> to vector<1x2x32xf32>
    %521 = vector.shape_cast %520 : vector<1x2x32xf32> to vector<2x32xf32>
    %522 = vector.broadcast %519 : vector<1x32xf32> to vector<2x32xf32>
    %523 = arith.mulf %522, %521 : vector<2x32xf32>
    %524 = vector.extract_strided_slice %4 {offsets = [7, 2, 0], sizes = [1, 1, 32], strides = [1, 1, 1]} : vector<8x8x32xf32> to vector<1x1x32xf32>
    %525 = vector.shape_cast %524 : vector<1x1x32xf32> to vector<1x32xf32>
    %526 = vector.extract_strided_slice %0 {offsets = [7, 0, 0], sizes = [1, 2, 32], strides = [1, 1, 1]} : vector<8x2x32xf32> to vector<1x2x32xf32>
    %527 = vector.shape_cast %526 : vector<1x2x32xf32> to vector<2x32xf32>
    %528 = vector.broadcast %525 : vector<1x32xf32> to vector<2x32xf32>
    %529 = arith.mulf %528, %527 : vector<2x32xf32>
    %530 = vector.extract_strided_slice %5 {offsets = [7, 2, 0], sizes = [1, 1, 32], strides = [1, 1, 1]} : vector<8x8x32xf32> to vector<1x1x32xf32>
    %531 = vector.shape_cast %530 : vector<1x1x32xf32> to vector<1x32xf32>
    %532 = vector.extract_strided_slice %1 {offsets = [7, 0, 0], sizes = [1, 2, 32], strides = [1, 1, 1]} : vector<8x2x32xf32> to vector<1x2x32xf32>
    %533 = vector.shape_cast %532 : vector<1x2x32xf32> to vector<2x32xf32>
    %534 = vector.broadcast %531 : vector<1x32xf32> to vector<2x32xf32>
    %535 = arith.mulf %534, %533 : vector<2x32xf32>
    %536 = arith.subf %523, %535 : vector<2x32xf32>
    %537 = arith.addf %523, %529 : vector<2x32xf32>
    %538 = arith.addf %516, %536 : vector<2x32xf32>
    %539 = arith.addf %517, %537 : vector<2x32xf32>
    %c2 = arith.constant 2 : index
    %c0_25 = arith.constant 0 : index
    %c0_26 = arith.constant 0 : index
    %540 = vector.load %arg6[%c2, %c0_25, %c0_26] : memref<8x2x32xf32, #tpu.memory_space<vmem>>, vector<1x2x32xf32>
    %541 = vector.shape_cast %540 : vector<1x2x32xf32> to vector<2x32xf32>
    %542 = vector.shape_cast %538 : vector<2x32xf32> to vector<1x2x32xf32>
    tpu.vector_store %arg6[%c2, %c0_25, %c0_26], %542 {strides = array<i32>} : memref<8x2x32xf32, #tpu.memory_space<vmem>>, vector<1x2x32xf32>,
    %c2_27 = arith.constant 2 : index
    %c0_28 = arith.constant 0 : index
    %c0_29 = arith.constant 0 : index
    %543 = vector.load %arg7[%c2_27, %c0_28, %c0_29] : memref<8x2x32xf32, #tpu.memory_space<vmem>>, vector<1x2x32xf32>
    %544 = vector.shape_cast %543 : vector<1x2x32xf32> to vector<2x32xf32>
    %545 = vector.shape_cast %539 : vector<2x32xf32> to vector<1x2x32xf32>
    tpu.vector_store %arg7[%c2_27, %c0_28, %c0_29], %545 {strides = array<i32>} : memref<8x2x32xf32, #tpu.memory_space<vmem>>, vector<1x2x32xf32>,
    %546 = vector.extract_strided_slice %3 {offsets = [0, 3, 0], sizes = [1, 1, 32], strides = [1, 1, 1]} : vector<8x8x32xf32> to vector<1x1x32xf32>
    %547 = vector.shape_cast %546 : vector<1x1x32xf32> to vector<1x32xf32>
    %548 = vector.extract_strided_slice %2 {offsets = [0, 0, 0], sizes = [1, 2, 32], strides = [1, 1, 1]} : vector<8x2x32xf32> to vector<1x2x32xf32>
    %549 = vector.shape_cast %548 : vector<1x2x32xf32> to vector<2x32xf32>
    %550 = vector.broadcast %547 : vector<1x32xf32> to vector<2x32xf32>
    %551 = arith.mulf %550, %549 : vector<2x32xf32>
    %552 = vector.extract_strided_slice %4 {offsets = [0, 3, 0], sizes = [1, 1, 32], strides = [1, 1, 1]} : vector<8x8x32xf32> to vector<1x1x32xf32>
    %553 = vector.shape_cast %552 : vector<1x1x32xf32> to vector<1x32xf32>
    %554 = vector.extract_strided_slice %0 {offsets = [0, 0, 0], sizes = [1, 2, 32], strides = [1, 1, 1]} : vector<8x2x32xf32> to vector<1x2x32xf32>
    %555 = vector.shape_cast %554 : vector<1x2x32xf32> to vector<2x32xf32>
    %556 = vector.broadcast %553 : vector<1x32xf32> to vector<2x32xf32>
    %557 = arith.mulf %556, %555 : vector<2x32xf32>
    %558 = vector.extract_strided_slice %5 {offsets = [0, 3, 0], sizes = [1, 1, 32], strides = [1, 1, 1]} : vector<8x8x32xf32> to vector<1x1x32xf32>
    %559 = vector.shape_cast %558 : vector<1x1x32xf32> to vector<1x32xf32>
    %560 = vector.extract_strided_slice %1 {offsets = [0, 0, 0], sizes = [1, 2, 32], strides = [1, 1, 1]} : vector<8x2x32xf32> to vector<1x2x32xf32>
    %561 = vector.shape_cast %560 : vector<1x2x32xf32> to vector<2x32xf32>
    %562 = vector.broadcast %559 : vector<1x32xf32> to vector<2x32xf32>
    %563 = arith.mulf %562, %561 : vector<2x32xf32>
    %564 = arith.subf %551, %563 : vector<2x32xf32>
    %565 = arith.addf %551, %557 : vector<2x32xf32>
    %566 = vector.extract_strided_slice %3 {offsets = [1, 3, 0], sizes = [1, 1, 32], strides = [1, 1, 1]} : vector<8x8x32xf32> to vector<1x1x32xf32>
    %567 = vector.shape_cast %566 : vector<1x1x32xf32> to vector<1x32xf32>
    %568 = vector.extract_strided_slice %2 {offsets = [1, 0, 0], sizes = [1, 2, 32], strides = [1, 1, 1]} : vector<8x2x32xf32> to vector<1x2x32xf32>
    %569 = vector.shape_cast %568 : vector<1x2x32xf32> to vector<2x32xf32>
    %570 = vector.broadcast %567 : vector<1x32xf32> to vector<2x32xf32>
    %571 = arith.mulf %570, %569 : vector<2x32xf32>
    %572 = vector.extract_strided_slice %4 {offsets = [1, 3, 0], sizes = [1, 1, 32], strides = [1, 1, 1]} : vector<8x8x32xf32> to vector<1x1x32xf32>
    %573 = vector.shape_cast %572 : vector<1x1x32xf32> to vector<1x32xf32>
    %574 = vector.extract_strided_slice %0 {offsets = [1, 0, 0], sizes = [1, 2, 32], strides = [1, 1, 1]} : vector<8x2x32xf32> to vector<1x2x32xf32>
    %575 = vector.shape_cast %574 : vector<1x2x32xf32> to vector<2x32xf32>
    %576 = vector.broadcast %573 : vector<1x32xf32> to vector<2x32xf32>
    %577 = arith.mulf %576, %575 : vector<2x32xf32>
    %578 = vector.extract_strided_slice %5 {offsets = [1, 3, 0], sizes = [1, 1, 32], strides = [1, 1, 1]} : vector<8x8x32xf32> to vector<1x1x32xf32>
    %579 = vector.shape_cast %578 : vector<1x1x32xf32> to vector<1x32xf32>
    %580 = vector.extract_strided_slice %1 {offsets = [1, 0, 0], sizes = [1, 2, 32], strides = [1, 1, 1]} : vector<8x2x32xf32> to vector<1x2x32xf32>
    %581 = vector.shape_cast %580 : vector<1x2x32xf32> to vector<2x32xf32>
    %582 = vector.broadcast %579 : vector<1x32xf32> to vector<2x32xf32>
    %583 = arith.mulf %582, %581 : vector<2x32xf32>
    %584 = arith.subf %571, %583 : vector<2x32xf32>
    %585 = arith.addf %571, %577 : vector<2x32xf32>
    %586 = arith.addf %564, %584 : vector<2x32xf32>
    %587 = arith.addf %565, %585 : vector<2x32xf32>
    %588 = vector.extract_strided_slice %3 {offsets = [2, 3, 0], sizes = [1, 1, 32], strides = [1, 1, 1]} : vector<8x8x32xf32> to vector<1x1x32xf32>
    %589 = vector.shape_cast %588 : vector<1x1x32xf32> to vector<1x32xf32>
    %590 = vector.extract_strided_slice %2 {offsets = [2, 0, 0], sizes = [1, 2, 32], strides = [1, 1, 1]} : vector<8x2x32xf32> to vector<1x2x32xf32>
    %591 = vector.shape_cast %590 : vector<1x2x32xf32> to vector<2x32xf32>
    %592 = vector.broadcast %589 : vector<1x32xf32> to vector<2x32xf32>
    %593 = arith.mulf %592, %591 : vector<2x32xf32>
    %594 = vector.extract_strided_slice %4 {offsets = [2, 3, 0], sizes = [1, 1, 32], strides = [1, 1, 1]} : vector<8x8x32xf32> to vector<1x1x32xf32>
    %595 = vector.shape_cast %594 : vector<1x1x32xf32> to vector<1x32xf32>
    %596 = vector.extract_strided_slice %0 {offsets = [2, 0, 0], sizes = [1, 2, 32], strides = [1, 1, 1]} : vector<8x2x32xf32> to vector<1x2x32xf32>
    %597 = vector.shape_cast %596 : vector<1x2x32xf32> to vector<2x32xf32>
    %598 = vector.broadcast %595 : vector<1x32xf32> to vector<2x32xf32>
    %599 = arith.mulf %598, %597 : vector<2x32xf32>
    %600 = vector.extract_strided_slice %5 {offsets = [2, 3, 0], sizes = [1, 1, 32], strides = [1, 1, 1]} : vector<8x8x32xf32> to vector<1x1x32xf32>
    %601 = vector.shape_cast %600 : vector<1x1x32xf32> to vector<1x32xf32>
    %602 = vector.extract_strided_slice %1 {offsets = [2, 0, 0], sizes = [1, 2, 32], strides = [1, 1, 1]} : vector<8x2x32xf32> to vector<1x2x32xf32>
    %603 = vector.shape_cast %602 : vector<1x2x32xf32> to vector<2x32xf32>
    %604 = vector.broadcast %601 : vector<1x32xf32> to vector<2x32xf32>
    %605 = arith.mulf %604, %603 : vector<2x32xf32>
    %606 = arith.subf %593, %605 : vector<2x32xf32>
    %607 = arith.addf %593, %599 : vector<2x32xf32>
    %608 = arith.addf %586, %606 : vector<2x32xf32>
    %609 = arith.addf %587, %607 : vector<2x32xf32>
    %610 = vector.extract_strided_slice %3 {offsets = [3, 3, 0], sizes = [1, 1, 32], strides = [1, 1, 1]} : vector<8x8x32xf32> to vector<1x1x32xf32>
    %611 = vector.shape_cast %610 : vector<1x1x32xf32> to vector<1x32xf32>
    %612 = vector.extract_strided_slice %2 {offsets = [3, 0, 0], sizes = [1, 2, 32], strides = [1, 1, 1]} : vector<8x2x32xf32> to vector<1x2x32xf32>
    %613 = vector.shape_cast %612 : vector<1x2x32xf32> to vector<2x32xf32>
    %614 = vector.broadcast %611 : vector<1x32xf32> to vector<2x32xf32>
    %615 = arith.mulf %614, %613 : vector<2x32xf32>
    %616 = vector.extract_strided_slice %4 {offsets = [3, 3, 0], sizes = [1, 1, 32], strides = [1, 1, 1]} : vector<8x8x32xf32> to vector<1x1x32xf32>
    %617 = vector.shape_cast %616 : vector<1x1x32xf32> to vector<1x32xf32>
    %618 = vector.extract_strided_slice %0 {offsets = [3, 0, 0], sizes = [1, 2, 32], strides = [1, 1, 1]} : vector<8x2x32xf32> to vector<1x2x32xf32>
    %619 = vector.shape_cast %618 : vector<1x2x32xf32> to vector<2x32xf32>
    %620 = vector.broadcast %617 : vector<1x32xf32> to vector<2x32xf32>
    %621 = arith.mulf %620, %619 : vector<2x32xf32>
    %622 = vector.extract_strided_slice %5 {offsets = [3, 3, 0], sizes = [1, 1, 32], strides = [1, 1, 1]} : vector<8x8x32xf32> to vector<1x1x32xf32>
    %623 = vector.shape_cast %622 : vector<1x1x32xf32> to vector<1x32xf32>
    %624 = vector.extract_strided_slice %1 {offsets = [3, 0, 0], sizes = [1, 2, 32], strides = [1, 1, 1]} : vector<8x2x32xf32> to vector<1x2x32xf32>
    %625 = vector.shape_cast %624 : vector<1x2x32xf32> to vector<2x32xf32>
    %626 = vector.broadcast %623 : vector<1x32xf32> to vector<2x32xf32>
    %627 = arith.mulf %626, %625 : vector<2x32xf32>
    %628 = arith.subf %615, %627 : vector<2x32xf32>
    %629 = arith.addf %615, %621 : vector<2x32xf32>
    %630 = arith.addf %608, %628 : vector<2x32xf32>
    %631 = arith.addf %609, %629 : vector<2x32xf32>
    %632 = vector.extract_strided_slice %3 {offsets = [4, 3, 0], sizes = [1, 1, 32], strides = [1, 1, 1]} : vector<8x8x32xf32> to vector<1x1x32xf32>
    %633 = vector.shape_cast %632 : vector<1x1x32xf32> to vector<1x32xf32>
    %634 = vector.extract_strided_slice %2 {offsets = [4, 0, 0], sizes = [1, 2, 32], strides = [1, 1, 1]} : vector<8x2x32xf32> to vector<1x2x32xf32>
    %635 = vector.shape_cast %634 : vector<1x2x32xf32> to vector<2x32xf32>
    %636 = vector.broadcast %633 : vector<1x32xf32> to vector<2x32xf32>
    %637 = arith.mulf %636, %635 : vector<2x32xf32>
    %638 = vector.extract_strided_slice %4 {offsets = [4, 3, 0], sizes = [1, 1, 32], strides = [1, 1, 1]} : vector<8x8x32xf32> to vector<1x1x32xf32>
    %639 = vector.shape_cast %638 : vector<1x1x32xf32> to vector<1x32xf32>
    %640 = vector.extract_strided_slice %0 {offsets = [4, 0, 0], sizes = [1, 2, 32], strides = [1, 1, 1]} : vector<8x2x32xf32> to vector<1x2x32xf32>
    %641 = vector.shape_cast %640 : vector<1x2x32xf32> to vector<2x32xf32>
    %642 = vector.broadcast %639 : vector<1x32xf32> to vector<2x32xf32>
    %643 = arith.mulf %642, %641 : vector<2x32xf32>
    %644 = vector.extract_strided_slice %5 {offsets = [4, 3, 0], sizes = [1, 1, 32], strides = [1, 1, 1]} : vector<8x8x32xf32> to vector<1x1x32xf32>
    %645 = vector.shape_cast %644 : vector<1x1x32xf32> to vector<1x32xf32>
    %646 = vector.extract_strided_slice %1 {offsets = [4, 0, 0], sizes = [1, 2, 32], strides = [1, 1, 1]} : vector<8x2x32xf32> to vector<1x2x32xf32>
    %647 = vector.shape_cast %646 : vector<1x2x32xf32> to vector<2x32xf32>
    %648 = vector.broadcast %645 : vector<1x32xf32> to vector<2x32xf32>
    %649 = arith.mulf %648, %647 : vector<2x32xf32>
    %650 = arith.subf %637, %649 : vector<2x32xf32>
    %651 = arith.addf %637, %643 : vector<2x32xf32>
    %652 = arith.addf %630, %650 : vector<2x32xf32>
    %653 = arith.addf %631, %651 : vector<2x32xf32>
    %654 = vector.extract_strided_slice %3 {offsets = [5, 3, 0], sizes = [1, 1, 32], strides = [1, 1, 1]} : vector<8x8x32xf32> to vector<1x1x32xf32>
    %655 = vector.shape_cast %654 : vector<1x1x32xf32> to vector<1x32xf32>
    %656 = vector.extract_strided_slice %2 {offsets = [5, 0, 0], sizes = [1, 2, 32], strides = [1, 1, 1]} : vector<8x2x32xf32> to vector<1x2x32xf32>
    %657 = vector.shape_cast %656 : vector<1x2x32xf32> to vector<2x32xf32>
    %658 = vector.broadcast %655 : vector<1x32xf32> to vector<2x32xf32>
    %659 = arith.mulf %658, %657 : vector<2x32xf32>
    %660 = vector.extract_strided_slice %4 {offsets = [5, 3, 0], sizes = [1, 1, 32], strides = [1, 1, 1]} : vector<8x8x32xf32> to vector<1x1x32xf32>
    %661 = vector.shape_cast %660 : vector<1x1x32xf32> to vector<1x32xf32>
    %662 = vector.extract_strided_slice %0 {offsets = [5, 0, 0], sizes = [1, 2, 32], strides = [1, 1, 1]} : vector<8x2x32xf32> to vector<1x2x32xf32>
    %663 = vector.shape_cast %662 : vector<1x2x32xf32> to vector<2x32xf32>
    %664 = vector.broadcast %661 : vector<1x32xf32> to vector<2x32xf32>
    %665 = arith.mulf %664, %663 : vector<2x32xf32>
    %666 = vector.extract_strided_slice %5 {offsets = [5, 3, 0], sizes = [1, 1, 32], strides = [1, 1, 1]} : vector<8x8x32xf32> to vector<1x1x32xf32>
    %667 = vector.shape_cast %666 : vector<1x1x32xf32> to vector<1x32xf32>
    %668 = vector.extract_strided_slice %1 {offsets = [5, 0, 0], sizes = [1, 2, 32], strides = [1, 1, 1]} : vector<8x2x32xf32> to vector<1x2x32xf32>
    %669 = vector.shape_cast %668 : vector<1x2x32xf32> to vector<2x32xf32>
    %670 = vector.broadcast %667 : vector<1x32xf32> to vector<2x32xf32>
    %671 = arith.mulf %670, %669 : vector<2x32xf32>
    %672 = arith.subf %659, %671 : vector<2x32xf32>
    %673 = arith.addf %659, %665 : vector<2x32xf32>
    %674 = arith.addf %652, %672 : vector<2x32xf32>
    %675 = arith.addf %653, %673 : vector<2x32xf32>
    %676 = vector.extract_strided_slice %3 {offsets = [6, 3, 0], sizes = [1, 1, 32], strides = [1, 1, 1]} : vector<8x8x32xf32> to vector<1x1x32xf32>
    %677 = vector.shape_cast %676 : vector<1x1x32xf32> to vector<1x32xf32>
    %678 = vector.extract_strided_slice %2 {offsets = [6, 0, 0], sizes = [1, 2, 32], strides = [1, 1, 1]} : vector<8x2x32xf32> to vector<1x2x32xf32>
    %679 = vector.shape_cast %678 : vector<1x2x32xf32> to vector<2x32xf32>
    %680 = vector.broadcast %677 : vector<1x32xf32> to vector<2x32xf32>
    %681 = arith.mulf %680, %679 : vector<2x32xf32>
    %682 = vector.extract_strided_slice %4 {offsets = [6, 3, 0], sizes = [1, 1, 32], strides = [1, 1, 1]} : vector<8x8x32xf32> to vector<1x1x32xf32>
    %683 = vector.shape_cast %682 : vector<1x1x32xf32> to vector<1x32xf32>
    %684 = vector.extract_strided_slice %0 {offsets = [6, 0, 0], sizes = [1, 2, 32], strides = [1, 1, 1]} : vector<8x2x32xf32> to vector<1x2x32xf32>
    %685 = vector.shape_cast %684 : vector<1x2x32xf32> to vector<2x32xf32>
    %686 = vector.broadcast %683 : vector<1x32xf32> to vector<2x32xf32>
    %687 = arith.mulf %686, %685 : vector<2x32xf32>
    %688 = vector.extract_strided_slice %5 {offsets = [6, 3, 0], sizes = [1, 1, 32], strides = [1, 1, 1]} : vector<8x8x32xf32> to vector<1x1x32xf32>
    %689 = vector.shape_cast %688 : vector<1x1x32xf32> to vector<1x32xf32>
    %690 = vector.extract_strided_slice %1 {offsets = [6, 0, 0], sizes = [1, 2, 32], strides = [1, 1, 1]} : vector<8x2x32xf32> to vector<1x2x32xf32>
    %691 = vector.shape_cast %690 : vector<1x2x32xf32> to vector<2x32xf32>
    %692 = vector.broadcast %689 : vector<1x32xf32> to vector<2x32xf32>
    %693 = arith.mulf %692, %691 : vector<2x32xf32>
    %694 = arith.subf %681, %693 : vector<2x32xf32>
    %695 = arith.addf %681, %687 : vector<2x32xf32>
    %696 = arith.addf %674, %694 : vector<2x32xf32>
    %697 = arith.addf %675, %695 : vector<2x32xf32>
    %698 = vector.extract_strided_slice %3 {offsets = [7, 3, 0], sizes = [1, 1, 32], strides = [1, 1, 1]} : vector<8x8x32xf32> to vector<1x1x32xf32>
    %699 = vector.shape_cast %698 : vector<1x1x32xf32> to vector<1x32xf32>
    %700 = vector.extract_strided_slice %2 {offsets = [7, 0, 0], sizes = [1, 2, 32], strides = [1, 1, 1]} : vector<8x2x32xf32> to vector<1x2x32xf32>
    %701 = vector.shape_cast %700 : vector<1x2x32xf32> to vector<2x32xf32>
    %702 = vector.broadcast %699 : vector<1x32xf32> to vector<2x32xf32>
    %703 = arith.mulf %702, %701 : vector<2x32xf32>
    %704 = vector.extract_strided_slice %4 {offsets = [7, 3, 0], sizes = [1, 1, 32], strides = [1, 1, 1]} : vector<8x8x32xf32> to vector<1x1x32xf32>
    %705 = vector.shape_cast %704 : vector<1x1x32xf32> to vector<1x32xf32>
    %706 = vector.extract_strided_slice %0 {offsets = [7, 0, 0], sizes = [1, 2, 32], strides = [1, 1, 1]} : vector<8x2x32xf32> to vector<1x2x32xf32>
    %707 = vector.shape_cast %706 : vector<1x2x32xf32> to vector<2x32xf32>
    %708 = vector.broadcast %705 : vector<1x32xf32> to vector<2x32xf32>
    %709 = arith.mulf %708, %707 : vector<2x32xf32>
    %710 = vector.extract_strided_slice %5 {offsets = [7, 3, 0], sizes = [1, 1, 32], strides = [1, 1, 1]} : vector<8x8x32xf32> to vector<1x1x32xf32>
    %711 = vector.shape_cast %710 : vector<1x1x32xf32> to vector<1x32xf32>
    %712 = vector.extract_strided_slice %1 {offsets = [7, 0, 0], sizes = [1, 2, 32], strides = [1, 1, 1]} : vector<8x2x32xf32> to vector<1x2x32xf32>
    %713 = vector.shape_cast %712 : vector<1x2x32xf32> to vector<2x32xf32>
    %714 = vector.broadcast %711 : vector<1x32xf32> to vector<2x32xf32>
    %715 = arith.mulf %714, %713 : vector<2x32xf32>
    %716 = arith.subf %703, %715 : vector<2x32xf32>
    %717 = arith.addf %703, %709 : vector<2x32xf32>
    %718 = arith.addf %696, %716 : vector<2x32xf32>
    %719 = arith.addf %697, %717 : vector<2x32xf32>
    %c3 = arith.constant 3 : index
    %c0_30 = arith.constant 0 : index
    %c0_31 = arith.constant 0 : index
    %720 = vector.load %arg6[%c3, %c0_30, %c0_31] : memref<8x2x32xf32, #tpu.memory_space<vmem>>, vector<1x2x32xf32>
    %721 = vector.shape_cast %720 : vector<1x2x32xf32> to vector<2x32xf32>
    %722 = vector.shape_cast %718 : vector<2x32xf32> to vector<1x2x32xf32>
    tpu.vector_store %arg6[%c3, %c0_30, %c0_31], %722 {strides = array<i32>} : memref<8x2x32xf32, #tpu.memory_space<vmem>>, vector<1x2x32xf32>,
    %c3_32 = arith.constant 3 : index
    %c0_33 = arith.constant 0 : index
    %c0_34 = arith.constant 0 : index
    %723 = vector.load %arg7[%c3_32, %c0_33, %c0_34] : memref<8x2x32xf32, #tpu.memory_space<vmem>>, vector<1x2x32xf32>
    %724 = vector.shape_cast %723 : vector<1x2x32xf32> to vector<2x32xf32>
    %725 = vector.shape_cast %719 : vector<2x32xf32> to vector<1x2x32xf32>
    tpu.vector_store %arg7[%c3_32, %c0_33, %c0_34], %725 {strides = array<i32>} : memref<8x2x32xf32, #tpu.memory_space<vmem>>, vector<1x2x32xf32>,
    %726 = vector.extract_strided_slice %3 {offsets = [0, 4, 0], sizes = [1, 1, 32], strides = [1, 1, 1]} : vector<8x8x32xf32> to vector<1x1x32xf32>
    %727 = vector.shape_cast %726 : vector<1x1x32xf32> to vector<1x32xf32>
    %728 = vector.extract_strided_slice %2 {offsets = [0, 0, 0], sizes = [1, 2, 32], strides = [1, 1, 1]} : vector<8x2x32xf32> to vector<1x2x32xf32>
    %729 = vector.shape_cast %728 : vector<1x2x32xf32> to vector<2x32xf32>
    %730 = vector.broadcast %727 : vector<1x32xf32> to vector<2x32xf32>
    %731 = arith.mulf %730, %729 : vector<2x32xf32>
    %732 = vector.extract_strided_slice %4 {offsets = [0, 4, 0], sizes = [1, 1, 32], strides = [1, 1, 1]} : vector<8x8x32xf32> to vector<1x1x32xf32>
    %733 = vector.shape_cast %732 : vector<1x1x32xf32> to vector<1x32xf32>
    %734 = vector.extract_strided_slice %0 {offsets = [0, 0, 0], sizes = [1, 2, 32], strides = [1, 1, 1]} : vector<8x2x32xf32> to vector<1x2x32xf32>
    %735 = vector.shape_cast %734 : vector<1x2x32xf32> to vector<2x32xf32>
    %736 = vector.broadcast %733 : vector<1x32xf32> to vector<2x32xf32>
    %737 = arith.mulf %736, %735 : vector<2x32xf32>
    %738 = vector.extract_strided_slice %5 {offsets = [0, 4, 0], sizes = [1, 1, 32], strides = [1, 1, 1]} : vector<8x8x32xf32> to vector<1x1x32xf32>
    %739 = vector.shape_cast %738 : vector<1x1x32xf32> to vector<1x32xf32>
    %740 = vector.extract_strided_slice %1 {offsets = [0, 0, 0], sizes = [1, 2, 32], strides = [1, 1, 1]} : vector<8x2x32xf32> to vector<1x2x32xf32>
    %741 = vector.shape_cast %740 : vector<1x2x32xf32> to vector<2x32xf32>
    %742 = vector.broadcast %739 : vector<1x32xf32> to vector<2x32xf32>
    %743 = arith.mulf %742, %741 : vector<2x32xf32>
    %744 = arith.subf %731, %743 : vector<2x32xf32>
    %745 = arith.addf %731, %737 : vector<2x32xf32>
    %746 = vector.extract_strided_slice %3 {offsets = [1, 4, 0], sizes = [1, 1, 32], strides = [1, 1, 1]} : vector<8x8x32xf32> to vector<1x1x32xf32>
    %747 = vector.shape_cast %746 : vector<1x1x32xf32> to vector<1x32xf32>
    %748 = vector.extract_strided_slice %2 {offsets = [1, 0, 0], sizes = [1, 2, 32], strides = [1, 1, 1]} : vector<8x2x32xf32> to vector<1x2x32xf32>
    %749 = vector.shape_cast %748 : vector<1x2x32xf32> to vector<2x32xf32>
    %750 = vector.broadcast %747 : vector<1x32xf32> to vector<2x32xf32>
    %751 = arith.mulf %750, %749 : vector<2x32xf32>
    %752 = vector.extract_strided_slice %4 {offsets = [1, 4, 0], sizes = [1, 1, 32], strides = [1, 1, 1]} : vector<8x8x32xf32> to vector<1x1x32xf32>
    %753 = vector.shape_cast %752 : vector<1x1x32xf32> to vector<1x32xf32>
    %754 = vector.extract_strided_slice %0 {offsets = [1, 0, 0], sizes = [1, 2, 32], strides = [1, 1, 1]} : vector<8x2x32xf32> to vector<1x2x32xf32>
    %755 = vector.shape_cast %754 : vector<1x2x32xf32> to vector<2x32xf32>
    %756 = vector.broadcast %753 : vector<1x32xf32> to vector<2x32xf32>
    %757 = arith.mulf %756, %755 : vector<2x32xf32>
    %758 = vector.extract_strided_slice %5 {offsets = [1, 4, 0], sizes = [1, 1, 32], strides = [1, 1, 1]} : vector<8x8x32xf32> to vector<1x1x32xf32>
    %759 = vector.shape_cast %758 : vector<1x1x32xf32> to vector<1x32xf32>
    %760 = vector.extract_strided_slice %1 {offsets = [1, 0, 0], sizes = [1, 2, 32], strides = [1, 1, 1]} : vector<8x2x32xf32> to vector<1x2x32xf32>
    %761 = vector.shape_cast %760 : vector<1x2x32xf32> to vector<2x32xf32>
    %762 = vector.broadcast %759 : vector<1x32xf32> to vector<2x32xf32>
    %763 = arith.mulf %762, %761 : vector<2x32xf32>
    %764 = arith.subf %751, %763 : vector<2x32xf32>
    %765 = arith.addf %751, %757 : vector<2x32xf32>
    %766 = arith.addf %744, %764 : vector<2x32xf32>
    %767 = arith.addf %745, %765 : vector<2x32xf32>
    %768 = vector.extract_strided_slice %3 {offsets = [2, 4, 0], sizes = [1, 1, 32], strides = [1, 1, 1]} : vector<8x8x32xf32> to vector<1x1x32xf32>
    %769 = vector.shape_cast %768 : vector<1x1x32xf32> to vector<1x32xf32>
    %770 = vector.extract_strided_slice %2 {offsets = [2, 0, 0], sizes = [1, 2, 32], strides = [1, 1, 1]} : vector<8x2x32xf32> to vector<1x2x32xf32>
    %771 = vector.shape_cast %770 : vector<1x2x32xf32> to vector<2x32xf32>
    %772 = vector.broadcast %769 : vector<1x32xf32> to vector<2x32xf32>
    %773 = arith.mulf %772, %771 : vector<2x32xf32>
    %774 = vector.extract_strided_slice %4 {offsets = [2, 4, 0], sizes = [1, 1, 32], strides = [1, 1, 1]} : vector<8x8x32xf32> to vector<1x1x32xf32>
    %775 = vector.shape_cast %774 : vector<1x1x32xf32> to vector<1x32xf32>
    %776 = vector.extract_strided_slice %0 {offsets = [2, 0, 0], sizes = [1, 2, 32], strides = [1, 1, 1]} : vector<8x2x32xf32> to vector<1x2x32xf32>
    %777 = vector.shape_cast %776 : vector<1x2x32xf32> to vector<2x32xf32>
    %778 = vector.broadcast %775 : vector<1x32xf32> to vector<2x32xf32>
    %779 = arith.mulf %778, %777 : vector<2x32xf32>
    %780 = vector.extract_strided_slice %5 {offsets = [2, 4, 0], sizes = [1, 1, 32], strides = [1, 1, 1]} : vector<8x8x32xf32> to vector<1x1x32xf32>
    %781 = vector.shape_cast %780 : vector<1x1x32xf32> to vector<1x32xf32>
    %782 = vector.extract_strided_slice %1 {offsets = [2, 0, 0], sizes = [1, 2, 32], strides = [1, 1, 1]} : vector<8x2x32xf32> to vector<1x2x32xf32>
    %783 = vector.shape_cast %782 : vector<1x2x32xf32> to vector<2x32xf32>
    %784 = vector.broadcast %781 : vector<1x32xf32> to vector<2x32xf32>
    %785 = arith.mulf %784, %783 : vector<2x32xf32>
    %786 = arith.subf %773, %785 : vector<2x32xf32>
    %787 = arith.addf %773, %779 : vector<2x32xf32>
    %788 = arith.addf %766, %786 : vector<2x32xf32>
    %789 = arith.addf %767, %787 : vector<2x32xf32>
    %790 = vector.extract_strided_slice %3 {offsets = [3, 4, 0], sizes = [1, 1, 32], strides = [1, 1, 1]} : vector<8x8x32xf32> to vector<1x1x32xf32>
    %791 = vector.shape_cast %790 : vector<1x1x32xf32> to vector<1x32xf32>
    %792 = vector.extract_strided_slice %2 {offsets = [3, 0, 0], sizes = [1, 2, 32], strides = [1, 1, 1]} : vector<8x2x32xf32> to vector<1x2x32xf32>
    %793 = vector.shape_cast %792 : vector<1x2x32xf32> to vector<2x32xf32>
    %794 = vector.broadcast %791 : vector<1x32xf32> to vector<2x32xf32>
    %795 = arith.mulf %794, %793 : vector<2x32xf32>
    %796 = vector.extract_strided_slice %4 {offsets = [3, 4, 0], sizes = [1, 1, 32], strides = [1, 1, 1]} : vector<8x8x32xf32> to vector<1x1x32xf32>
    %797 = vector.shape_cast %796 : vector<1x1x32xf32> to vector<1x32xf32>
    %798 = vector.extract_strided_slice %0 {offsets = [3, 0, 0], sizes = [1, 2, 32], strides = [1, 1, 1]} : vector<8x2x32xf32> to vector<1x2x32xf32>
    %799 = vector.shape_cast %798 : vector<1x2x32xf32> to vector<2x32xf32>
    %800 = vector.broadcast %797 : vector<1x32xf32> to vector<2x32xf32>
    %801 = arith.mulf %800, %799 : vector<2x32xf32>
    %802 = vector.extract_strided_slice %5 {offsets = [3, 4, 0], sizes = [1, 1, 32], strides = [1, 1, 1]} : vector<8x8x32xf32> to vector<1x1x32xf32>
    %803 = vector.shape_cast %802 : vector<1x1x32xf32> to vector<1x32xf32>
    %804 = vector.extract_strided_slice %1 {offsets = [3, 0, 0], sizes = [1, 2, 32], strides = [1, 1, 1]} : vector<8x2x32xf32> to vector<1x2x32xf32>
    %805 = vector.shape_cast %804 : vector<1x2x32xf32> to vector<2x32xf32>
    %806 = vector.broadcast %803 : vector<1x32xf32> to vector<2x32xf32>
    %807 = arith.mulf %806, %805 : vector<2x32xf32>
    %808 = arith.subf %795, %807 : vector<2x32xf32>
    %809 = arith.addf %795, %801 : vector<2x32xf32>
    %810 = arith.addf %788, %808 : vector<2x32xf32>
    %811 = arith.addf %789, %809 : vector<2x32xf32>
    %812 = vector.extract_strided_slice %3 {offsets = [4, 4, 0], sizes = [1, 1, 32], strides = [1, 1, 1]} : vector<8x8x32xf32> to vector<1x1x32xf32>
    %813 = vector.shape_cast %812 : vector<1x1x32xf32> to vector<1x32xf32>
    %814 = vector.extract_strided_slice %2 {offsets = [4, 0, 0], sizes = [1, 2, 32], strides = [1, 1, 1]} : vector<8x2x32xf32> to vector<1x2x32xf32>
    %815 = vector.shape_cast %814 : vector<1x2x32xf32> to vector<2x32xf32>
    %816 = vector.broadcast %813 : vector<1x32xf32> to vector<2x32xf32>
    %817 = arith.mulf %816, %815 : vector<2x32xf32>
    %818 = vector.extract_strided_slice %4 {offsets = [4, 4, 0], sizes = [1, 1, 32], strides = [1, 1, 1]} : vector<8x8x32xf32> to vector<1x1x32xf32>
    %819 = vector.shape_cast %818 : vector<1x1x32xf32> to vector<1x32xf32>
    %820 = vector.extract_strided_slice %0 {offsets = [4, 0, 0], sizes = [1, 2, 32], strides = [1, 1, 1]} : vector<8x2x32xf32> to vector<1x2x32xf32>
    %821 = vector.shape_cast %820 : vector<1x2x32xf32> to vector<2x32xf32>
    %822 = vector.broadcast %819 : vector<1x32xf32> to vector<2x32xf32>
    %823 = arith.mulf %822, %821 : vector<2x32xf32>
    %824 = vector.extract_strided_slice %5 {offsets = [4, 4, 0], sizes = [1, 1, 32], strides = [1, 1, 1]} : vector<8x8x32xf32> to vector<1x1x32xf32>
    %825 = vector.shape_cast %824 : vector<1x1x32xf32> to vector<1x32xf32>
    %826 = vector.extract_strided_slice %1 {offsets = [4, 0, 0], sizes = [1, 2, 32], strides = [1, 1, 1]} : vector<8x2x32xf32> to vector<1x2x32xf32>
    %827 = vector.shape_cast %826 : vector<1x2x32xf32> to vector<2x32xf32>
    %828 = vector.broadcast %825 : vector<1x32xf32> to vector<2x32xf32>
    %829 = arith.mulf %828, %827 : vector<2x32xf32>
    %830 = arith.subf %817, %829 : vector<2x32xf32>
    %831 = arith.addf %817, %823 : vector<2x32xf32>
    %832 = arith.addf %810, %830 : vector<2x32xf32>
    %833 = arith.addf %811, %831 : vector<2x32xf32>
    %834 = vector.extract_strided_slice %3 {offsets = [5, 4, 0], sizes = [1, 1, 32], strides = [1, 1, 1]} : vector<8x8x32xf32> to vector<1x1x32xf32>
    %835 = vector.shape_cast %834 : vector<1x1x32xf32> to vector<1x32xf32>
    %836 = vector.extract_strided_slice %2 {offsets = [5, 0, 0], sizes = [1, 2, 32], strides = [1, 1, 1]} : vector<8x2x32xf32> to vector<1x2x32xf32>
    %837 = vector.shape_cast %836 : vector<1x2x32xf32> to vector<2x32xf32>
    %838 = vector.broadcast %835 : vector<1x32xf32> to vector<2x32xf32>
    %839 = arith.mulf %838, %837 : vector<2x32xf32>
    %840 = vector.extract_strided_slice %4 {offsets = [5, 4, 0], sizes = [1, 1, 32], strides = [1, 1, 1]} : vector<8x8x32xf32> to vector<1x1x32xf32>
    %841 = vector.shape_cast %840 : vector<1x1x32xf32> to vector<1x32xf32>
    %842 = vector.extract_strided_slice %0 {offsets = [5, 0, 0], sizes = [1, 2, 32], strides = [1, 1, 1]} : vector<8x2x32xf32> to vector<1x2x32xf32>
    %843 = vector.shape_cast %842 : vector<1x2x32xf32> to vector<2x32xf32>
    %844 = vector.broadcast %841 : vector<1x32xf32> to vector<2x32xf32>
    %845 = arith.mulf %844, %843 : vector<2x32xf32>
    %846 = vector.extract_strided_slice %5 {offsets = [5, 4, 0], sizes = [1, 1, 32], strides = [1, 1, 1]} : vector<8x8x32xf32> to vector<1x1x32xf32>
    %847 = vector.shape_cast %846 : vector<1x1x32xf32> to vector<1x32xf32>
    %848 = vector.extract_strided_slice %1 {offsets = [5, 0, 0], sizes = [1, 2, 32], strides = [1, 1, 1]} : vector<8x2x32xf32> to vector<1x2x32xf32>
    %849 = vector.shape_cast %848 : vector<1x2x32xf32> to vector<2x32xf32>
    %850 = vector.broadcast %847 : vector<1x32xf32> to vector<2x32xf32>
    %851 = arith.mulf %850, %849 : vector<2x32xf32>
    %852 = arith.subf %839, %851 : vector<2x32xf32>
    %853 = arith.addf %839, %845 : vector<2x32xf32>
    %854 = arith.addf %832, %852 : vector<2x32xf32>
    %855 = arith.addf %833, %853 : vector<2x32xf32>
    %856 = vector.extract_strided_slice %3 {offsets = [6, 4, 0], sizes = [1, 1, 32], strides = [1, 1, 1]} : vector<8x8x32xf32> to vector<1x1x32xf32>
    %857 = vector.shape_cast %856 : vector<1x1x32xf32> to vector<1x32xf32>
    %858 = vector.extract_strided_slice %2 {offsets = [6, 0, 0], sizes = [1, 2, 32], strides = [1, 1, 1]} : vector<8x2x32xf32> to vector<1x2x32xf32>
    %859 = vector.shape_cast %858 : vector<1x2x32xf32> to vector<2x32xf32>
    %860 = vector.broadcast %857 : vector<1x32xf32> to vector<2x32xf32>
    %861 = arith.mulf %860, %859 : vector<2x32xf32>
    %862 = vector.extract_strided_slice %4 {offsets = [6, 4, 0], sizes = [1, 1, 32], strides = [1, 1, 1]} : vector<8x8x32xf32> to vector<1x1x32xf32>
    %863 = vector.shape_cast %862 : vector<1x1x32xf32> to vector<1x32xf32>
    %864 = vector.extract_strided_slice %0 {offsets = [6, 0, 0], sizes = [1, 2, 32], strides = [1, 1, 1]} : vector<8x2x32xf32> to vector<1x2x32xf32>
    %865 = vector.shape_cast %864 : vector<1x2x32xf32> to vector<2x32xf32>
    %866 = vector.broadcast %863 : vector<1x32xf32> to vector<2x32xf32>
    %867 = arith.mulf %866, %865 : vector<2x32xf32>
    %868 = vector.extract_strided_slice %5 {offsets = [6, 4, 0], sizes = [1, 1, 32], strides = [1, 1, 1]} : vector<8x8x32xf32> to vector<1x1x32xf32>
    %869 = vector.shape_cast %868 : vector<1x1x32xf32> to vector<1x32xf32>
    %870 = vector.extract_strided_slice %1 {offsets = [6, 0, 0], sizes = [1, 2, 32], strides = [1, 1, 1]} : vector<8x2x32xf32> to vector<1x2x32xf32>
    %871 = vector.shape_cast %870 : vector<1x2x32xf32> to vector<2x32xf32>
    %872 = vector.broadcast %869 : vector<1x32xf32> to vector<2x32xf32>
    %873 = arith.mulf %872, %871 : vector<2x32xf32>
    %874 = arith.subf %861, %873 : vector<2x32xf32>
    %875 = arith.addf %861, %867 : vector<2x32xf32>
    %876 = arith.addf %854, %874 : vector<2x32xf32>
    %877 = arith.addf %855, %875 : vector<2x32xf32>
    %878 = vector.extract_strided_slice %3 {offsets = [7, 4, 0], sizes = [1, 1, 32], strides = [1, 1, 1]} : vector<8x8x32xf32> to vector<1x1x32xf32>
    %879 = vector.shape_cast %878 : vector<1x1x32xf32> to vector<1x32xf32>
    %880 = vector.extract_strided_slice %2 {offsets = [7, 0, 0], sizes = [1, 2, 32], strides = [1, 1, 1]} : vector<8x2x32xf32> to vector<1x2x32xf32>
    %881 = vector.shape_cast %880 : vector<1x2x32xf32> to vector<2x32xf32>
    %882 = vector.broadcast %879 : vector<1x32xf32> to vector<2x32xf32>
    %883 = arith.mulf %882, %881 : vector<2x32xf32>
    %884 = vector.extract_strided_slice %4 {offsets = [7, 4, 0], sizes = [1, 1, 32], strides = [1, 1, 1]} : vector<8x8x32xf32> to vector<1x1x32xf32>
    %885 = vector.shape_cast %884 : vector<1x1x32xf32> to vector<1x32xf32>
    %886 = vector.extract_strided_slice %0 {offsets = [7, 0, 0], sizes = [1, 2, 32], strides = [1, 1, 1]} : vector<8x2x32xf32> to vector<1x2x32xf32>
    %887 = vector.shape_cast %886 : vector<1x2x32xf32> to vector<2x32xf32>
    %888 = vector.broadcast %885 : vector<1x32xf32> to vector<2x32xf32>
    %889 = arith.mulf %888, %887 : vector<2x32xf32>
    %890 = vector.extract_strided_slice %5 {offsets = [7, 4, 0], sizes = [1, 1, 32], strides = [1, 1, 1]} : vector<8x8x32xf32> to vector<1x1x32xf32>
    %891 = vector.shape_cast %890 : vector<1x1x32xf32> to vector<1x32xf32>
    %892 = vector.extract_strided_slice %1 {offsets = [7, 0, 0], sizes = [1, 2, 32], strides = [1, 1, 1]} : vector<8x2x32xf32> to vector<1x2x32xf32>
    %893 = vector.shape_cast %892 : vector<1x2x32xf32> to vector<2x32xf32>
    %894 = vector.broadcast %891 : vector<1x32xf32> to vector<2x32xf32>
    %895 = arith.mulf %894, %893 : vector<2x32xf32>
    %896 = arith.subf %883, %895 : vector<2x32xf32>
    %897 = arith.addf %883, %889 : vector<2x32xf32>
    %898 = arith.addf %876, %896 : vector<2x32xf32>
    %899 = arith.addf %877, %897 : vector<2x32xf32>
    %c4 = arith.constant 4 : index
    %c0_35 = arith.constant 0 : index
    %c0_36 = arith.constant 0 : index
    %900 = vector.load %arg6[%c4, %c0_35, %c0_36] : memref<8x2x32xf32, #tpu.memory_space<vmem>>, vector<1x2x32xf32>
    %901 = vector.shape_cast %900 : vector<1x2x32xf32> to vector<2x32xf32>
    %902 = vector.shape_cast %898 : vector<2x32xf32> to vector<1x2x32xf32>
    tpu.vector_store %arg6[%c4, %c0_35, %c0_36], %902 {strides = array<i32>} : memref<8x2x32xf32, #tpu.memory_space<vmem>>, vector<1x2x32xf32>,
    %c4_37 = arith.constant 4 : index
    %c0_38 = arith.constant 0 : index
    %c0_39 = arith.constant 0 : index
    %903 = vector.load %arg7[%c4_37, %c0_38, %c0_39] : memref<8x2x32xf32, #tpu.memory_space<vmem>>, vector<1x2x32xf32>
    %904 = vector.shape_cast %903 : vector<1x2x32xf32> to vector<2x32xf32>
    %905 = vector.shape_cast %899 : vector<2x32xf32> to vector<1x2x32xf32>
    tpu.vector_store %arg7[%c4_37, %c0_38, %c0_39], %905 {strides = array<i32>} : memref<8x2x32xf32, #tpu.memory_space<vmem>>, vector<1x2x32xf32>,
    %906 = vector.extract_strided_slice %3 {offsets = [0, 5, 0], sizes = [1, 1, 32], strides = [1, 1, 1]} : vector<8x8x32xf32> to vector<1x1x32xf32>
    %907 = vector.shape_cast %906 : vector<1x1x32xf32> to vector<1x32xf32>
    %908 = vector.extract_strided_slice %2 {offsets = [0, 0, 0], sizes = [1, 2, 32], strides = [1, 1, 1]} : vector<8x2x32xf32> to vector<1x2x32xf32>
    %909 = vector.shape_cast %908 : vector<1x2x32xf32> to vector<2x32xf32>
    %910 = vector.broadcast %907 : vector<1x32xf32> to vector<2x32xf32>
    %911 = arith.mulf %910, %909 : vector<2x32xf32>
    %912 = vector.extract_strided_slice %4 {offsets = [0, 5, 0], sizes = [1, 1, 32], strides = [1, 1, 1]} : vector<8x8x32xf32> to vector<1x1x32xf32>
    %913 = vector.shape_cast %912 : vector<1x1x32xf32> to vector<1x32xf32>
    %914 = vector.extract_strided_slice %0 {offsets = [0, 0, 0], sizes = [1, 2, 32], strides = [1, 1, 1]} : vector<8x2x32xf32> to vector<1x2x32xf32>
    %915 = vector.shape_cast %914 : vector<1x2x32xf32> to vector<2x32xf32>
    %916 = vector.broadcast %913 : vector<1x32xf32> to vector<2x32xf32>
    %917 = arith.mulf %916, %915 : vector<2x32xf32>
    %918 = vector.extract_strided_slice %5 {offsets = [0, 5, 0], sizes = [1, 1, 32], strides = [1, 1, 1]} : vector<8x8x32xf32> to vector<1x1x32xf32>
    %919 = vector.shape_cast %918 : vector<1x1x32xf32> to vector<1x32xf32>
    %920 = vector.extract_strided_slice %1 {offsets = [0, 0, 0], sizes = [1, 2, 32], strides = [1, 1, 1]} : vector<8x2x32xf32> to vector<1x2x32xf32>
    %921 = vector.shape_cast %920 : vector<1x2x32xf32> to vector<2x32xf32>
    %922 = vector.broadcast %919 : vector<1x32xf32> to vector<2x32xf32>
    %923 = arith.mulf %922, %921 : vector<2x32xf32>
    %924 = arith.subf %911, %923 : vector<2x32xf32>
    %925 = arith.addf %911, %917 : vector<2x32xf32>
    %926 = vector.extract_strided_slice %3 {offsets = [1, 5, 0], sizes = [1, 1, 32], strides = [1, 1, 1]} : vector<8x8x32xf32> to vector<1x1x32xf32>
    %927 = vector.shape_cast %926 : vector<1x1x32xf32> to vector<1x32xf32>
    %928 = vector.extract_strided_slice %2 {offsets = [1, 0, 0], sizes = [1, 2, 32], strides = [1, 1, 1]} : vector<8x2x32xf32> to vector<1x2x32xf32>
    %929 = vector.shape_cast %928 : vector<1x2x32xf32> to vector<2x32xf32>
    %930 = vector.broadcast %927 : vector<1x32xf32> to vector<2x32xf32>
    %931 = arith.mulf %930, %929 : vector<2x32xf32>
    %932 = vector.extract_strided_slice %4 {offsets = [1, 5, 0], sizes = [1, 1, 32], strides = [1, 1, 1]} : vector<8x8x32xf32> to vector<1x1x32xf32>
    %933 = vector.shape_cast %932 : vector<1x1x32xf32> to vector<1x32xf32>
    %934 = vector.extract_strided_slice %0 {offsets = [1, 0, 0], sizes = [1, 2, 32], strides = [1, 1, 1]} : vector<8x2x32xf32> to vector<1x2x32xf32>
    %935 = vector.shape_cast %934 : vector<1x2x32xf32> to vector<2x32xf32>
    %936 = vector.broadcast %933 : vector<1x32xf32> to vector<2x32xf32>
    %937 = arith.mulf %936, %935 : vector<2x32xf32>
    %938 = vector.extract_strided_slice %5 {offsets = [1, 5, 0], sizes = [1, 1, 32], strides = [1, 1, 1]} : vector<8x8x32xf32> to vector<1x1x32xf32>
    %939 = vector.shape_cast %938 : vector<1x1x32xf32> to vector<1x32xf32>
    %940 = vector.extract_strided_slice %1 {offsets = [1, 0, 0], sizes = [1, 2, 32], strides = [1, 1, 1]} : vector<8x2x32xf32> to vector<1x2x32xf32>
    %941 = vector.shape_cast %940 : vector<1x2x32xf32> to vector<2x32xf32>
    %942 = vector.broadcast %939 : vector<1x32xf32> to vector<2x32xf32>
    %943 = arith.mulf %942, %941 : vector<2x32xf32>
    %944 = arith.subf %931, %943 : vector<2x32xf32>
    %945 = arith.addf %931, %937 : vector<2x32xf32>
    %946 = arith.addf %924, %944 : vector<2x32xf32>
    %947 = arith.addf %925, %945 : vector<2x32xf32>
    %948 = vector.extract_strided_slice %3 {offsets = [2, 5, 0], sizes = [1, 1, 32], strides = [1, 1, 1]} : vector<8x8x32xf32> to vector<1x1x32xf32>
    %949 = vector.shape_cast %948 : vector<1x1x32xf32> to vector<1x32xf32>
    %950 = vector.extract_strided_slice %2 {offsets = [2, 0, 0], sizes = [1, 2, 32], strides = [1, 1, 1]} : vector<8x2x32xf32> to vector<1x2x32xf32>
    %951 = vector.shape_cast %950 : vector<1x2x32xf32> to vector<2x32xf32>
    %952 = vector.broadcast %949 : vector<1x32xf32> to vector<2x32xf32>
    %953 = arith.mulf %952, %951 : vector<2x32xf32>
    %954 = vector.extract_strided_slice %4 {offsets = [2, 5, 0], sizes = [1, 1, 32], strides = [1, 1, 1]} : vector<8x8x32xf32> to vector<1x1x32xf32>
    %955 = vector.shape_cast %954 : vector<1x1x32xf32> to vector<1x32xf32>
    %956 = vector.extract_strided_slice %0 {offsets = [2, 0, 0], sizes = [1, 2, 32], strides = [1, 1, 1]} : vector<8x2x32xf32> to vector<1x2x32xf32>
    %957 = vector.shape_cast %956 : vector<1x2x32xf32> to vector<2x32xf32>
    %958 = vector.broadcast %955 : vector<1x32xf32> to vector<2x32xf32>
    %959 = arith.mulf %958, %957 : vector<2x32xf32>
    %960 = vector.extract_strided_slice %5 {offsets = [2, 5, 0], sizes = [1, 1, 32], strides = [1, 1, 1]} : vector<8x8x32xf32> to vector<1x1x32xf32>
    %961 = vector.shape_cast %960 : vector<1x1x32xf32> to vector<1x32xf32>
    %962 = vector.extract_strided_slice %1 {offsets = [2, 0, 0], sizes = [1, 2, 32], strides = [1, 1, 1]} : vector<8x2x32xf32> to vector<1x2x32xf32>
    %963 = vector.shape_cast %962 : vector<1x2x32xf32> to vector<2x32xf32>
    %964 = vector.broadcast %961 : vector<1x32xf32> to vector<2x32xf32>
    %965 = arith.mulf %964, %963 : vector<2x32xf32>
    %966 = arith.subf %953, %965 : vector<2x32xf32>
    %967 = arith.addf %953, %959 : vector<2x32xf32>
    %968 = arith.addf %946, %966 : vector<2x32xf32>
    %969 = arith.addf %947, %967 : vector<2x32xf32>
    %970 = vector.extract_strided_slice %3 {offsets = [3, 5, 0], sizes = [1, 1, 32], strides = [1, 1, 1]} : vector<8x8x32xf32> to vector<1x1x32xf32>
    %971 = vector.shape_cast %970 : vector<1x1x32xf32> to vector<1x32xf32>
    %972 = vector.extract_strided_slice %2 {offsets = [3, 0, 0], sizes = [1, 2, 32], strides = [1, 1, 1]} : vector<8x2x32xf32> to vector<1x2x32xf32>
    %973 = vector.shape_cast %972 : vector<1x2x32xf32> to vector<2x32xf32>
    %974 = vector.broadcast %971 : vector<1x32xf32> to vector<2x32xf32>
    %975 = arith.mulf %974, %973 : vector<2x32xf32>
    %976 = vector.extract_strided_slice %4 {offsets = [3, 5, 0], sizes = [1, 1, 32], strides = [1, 1, 1]} : vector<8x8x32xf32> to vector<1x1x32xf32>
    %977 = vector.shape_cast %976 : vector<1x1x32xf32> to vector<1x32xf32>
    %978 = vector.extract_strided_slice %0 {offsets = [3, 0, 0], sizes = [1, 2, 32], strides = [1, 1, 1]} : vector<8x2x32xf32> to vector<1x2x32xf32>
    %979 = vector.shape_cast %978 : vector<1x2x32xf32> to vector<2x32xf32>
    %980 = vector.broadcast %977 : vector<1x32xf32> to vector<2x32xf32>
    %981 = arith.mulf %980, %979 : vector<2x32xf32>
    %982 = vector.extract_strided_slice %5 {offsets = [3, 5, 0], sizes = [1, 1, 32], strides = [1, 1, 1]} : vector<8x8x32xf32> to vector<1x1x32xf32>
    %983 = vector.shape_cast %982 : vector<1x1x32xf32> to vector<1x32xf32>
    %984 = vector.extract_strided_slice %1 {offsets = [3, 0, 0], sizes = [1, 2, 32], strides = [1, 1, 1]} : vector<8x2x32xf32> to vector<1x2x32xf32>
    %985 = vector.shape_cast %984 : vector<1x2x32xf32> to vector<2x32xf32>
    %986 = vector.broadcast %983 : vector<1x32xf32> to vector<2x32xf32>
    %987 = arith.mulf %986, %985 : vector<2x32xf32>
    %988 = arith.subf %975, %987 : vector<2x32xf32>
    %989 = arith.addf %975, %981 : vector<2x32xf32>
    %990 = arith.addf %968, %988 : vector<2x32xf32>
    %991 = arith.addf %969, %989 : vector<2x32xf32>
    %992 = vector.extract_strided_slice %3 {offsets = [4, 5, 0], sizes = [1, 1, 32], strides = [1, 1, 1]} : vector<8x8x32xf32> to vector<1x1x32xf32>
    %993 = vector.shape_cast %992 : vector<1x1x32xf32> to vector<1x32xf32>
    %994 = vector.extract_strided_slice %2 {offsets = [4, 0, 0], sizes = [1, 2, 32], strides = [1, 1, 1]} : vector<8x2x32xf32> to vector<1x2x32xf32>
    %995 = vector.shape_cast %994 : vector<1x2x32xf32> to vector<2x32xf32>
    %996 = vector.broadcast %993 : vector<1x32xf32> to vector<2x32xf32>
    %997 = arith.mulf %996, %995 : vector<2x32xf32>
    %998 = vector.extract_strided_slice %4 {offsets = [4, 5, 0], sizes = [1, 1, 32], strides = [1, 1, 1]} : vector<8x8x32xf32> to vector<1x1x32xf32>
    %999 = vector.shape_cast %998 : vector<1x1x32xf32> to vector<1x32xf32>
    %1000 = vector.extract_strided_slice %0 {offsets = [4, 0, 0], sizes = [1, 2, 32], strides = [1, 1, 1]} : vector<8x2x32xf32> to vector<1x2x32xf32>
    %1001 = vector.shape_cast %1000 : vector<1x2x32xf32> to vector<2x32xf32>
    %1002 = vector.broadcast %999 : vector<1x32xf32> to vector<2x32xf32>
    %1003 = arith.mulf %1002, %1001 : vector<2x32xf32>
    %1004 = vector.extract_strided_slice %5 {offsets = [4, 5, 0], sizes = [1, 1, 32], strides = [1, 1, 1]} : vector<8x8x32xf32> to vector<1x1x32xf32>
    %1005 = vector.shape_cast %1004 : vector<1x1x32xf32> to vector<1x32xf32>
    %1006 = vector.extract_strided_slice %1 {offsets = [4, 0, 0], sizes = [1, 2, 32], strides = [1, 1, 1]} : vector<8x2x32xf32> to vector<1x2x32xf32>
    %1007 = vector.shape_cast %1006 : vector<1x2x32xf32> to vector<2x32xf32>
    %1008 = vector.broadcast %1005 : vector<1x32xf32> to vector<2x32xf32>
    %1009 = arith.mulf %1008, %1007 : vector<2x32xf32>
    %1010 = arith.subf %997, %1009 : vector<2x32xf32>
    %1011 = arith.addf %997, %1003 : vector<2x32xf32>
    %1012 = arith.addf %990, %1010 : vector<2x32xf32>
    %1013 = arith.addf %991, %1011 : vector<2x32xf32>
    %1014 = vector.extract_strided_slice %3 {offsets = [5, 5, 0], sizes = [1, 1, 32], strides = [1, 1, 1]} : vector<8x8x32xf32> to vector<1x1x32xf32>
    %1015 = vector.shape_cast %1014 : vector<1x1x32xf32> to vector<1x32xf32>
    %1016 = vector.extract_strided_slice %2 {offsets = [5, 0, 0], sizes = [1, 2, 32], strides = [1, 1, 1]} : vector<8x2x32xf32> to vector<1x2x32xf32>
    %1017 = vector.shape_cast %1016 : vector<1x2x32xf32> to vector<2x32xf32>
    %1018 = vector.broadcast %1015 : vector<1x32xf32> to vector<2x32xf32>
    %1019 = arith.mulf %1018, %1017 : vector<2x32xf32>
    %1020 = vector.extract_strided_slice %4 {offsets = [5, 5, 0], sizes = [1, 1, 32], strides = [1, 1, 1]} : vector<8x8x32xf32> to vector<1x1x32xf32>
    %1021 = vector.shape_cast %1020 : vector<1x1x32xf32> to vector<1x32xf32>
    %1022 = vector.extract_strided_slice %0 {offsets = [5, 0, 0], sizes = [1, 2, 32], strides = [1, 1, 1]} : vector<8x2x32xf32> to vector<1x2x32xf32>
    %1023 = vector.shape_cast %1022 : vector<1x2x32xf32> to vector<2x32xf32>
    %1024 = vector.broadcast %1021 : vector<1x32xf32> to vector<2x32xf32>
    %1025 = arith.mulf %1024, %1023 : vector<2x32xf32>
    %1026 = vector.extract_strided_slice %5 {offsets = [5, 5, 0], sizes = [1, 1, 32], strides = [1, 1, 1]} : vector<8x8x32xf32> to vector<1x1x32xf32>
    %1027 = vector.shape_cast %1026 : vector<1x1x32xf32> to vector<1x32xf32>
    %1028 = vector.extract_strided_slice %1 {offsets = [5, 0, 0], sizes = [1, 2, 32], strides = [1, 1, 1]} : vector<8x2x32xf32> to vector<1x2x32xf32>
    %1029 = vector.shape_cast %1028 : vector<1x2x32xf32> to vector<2x32xf32>
    %1030 = vector.broadcast %1027 : vector<1x32xf32> to vector<2x32xf32>
    %1031 = arith.mulf %1030, %1029 : vector<2x32xf32>
    %1032 = arith.subf %1019, %1031 : vector<2x32xf32>
    %1033 = arith.addf %1019, %1025 : vector<2x32xf32>
    %1034 = arith.addf %1012, %1032 : vector<2x32xf32>
    %1035 = arith.addf %1013, %1033 : vector<2x32xf32>
    %1036 = vector.extract_strided_slice %3 {offsets = [6, 5, 0], sizes = [1, 1, 32], strides = [1, 1, 1]} : vector<8x8x32xf32> to vector<1x1x32xf32>
    %1037 = vector.shape_cast %1036 : vector<1x1x32xf32> to vector<1x32xf32>
    %1038 = vector.extract_strided_slice %2 {offsets = [6, 0, 0], sizes = [1, 2, 32], strides = [1, 1, 1]} : vector<8x2x32xf32> to vector<1x2x32xf32>
    %1039 = vector.shape_cast %1038 : vector<1x2x32xf32> to vector<2x32xf32>
    %1040 = vector.broadcast %1037 : vector<1x32xf32> to vector<2x32xf32>
    %1041 = arith.mulf %1040, %1039 : vector<2x32xf32>
    %1042 = vector.extract_strided_slice %4 {offsets = [6, 5, 0], sizes = [1, 1, 32], strides = [1, 1, 1]} : vector<8x8x32xf32> to vector<1x1x32xf32>
    %1043 = vector.shape_cast %1042 : vector<1x1x32xf32> to vector<1x32xf32>
    %1044 = vector.extract_strided_slice %0 {offsets = [6, 0, 0], sizes = [1, 2, 32], strides = [1, 1, 1]} : vector<8x2x32xf32> to vector<1x2x32xf32>
    %1045 = vector.shape_cast %1044 : vector<1x2x32xf32> to vector<2x32xf32>
    %1046 = vector.broadcast %1043 : vector<1x32xf32> to vector<2x32xf32>
    %1047 = arith.mulf %1046, %1045 : vector<2x32xf32>
    %1048 = vector.extract_strided_slice %5 {offsets = [6, 5, 0], sizes = [1, 1, 32], strides = [1, 1, 1]} : vector<8x8x32xf32> to vector<1x1x32xf32>
    %1049 = vector.shape_cast %1048 : vector<1x1x32xf32> to vector<1x32xf32>
    %1050 = vector.extract_strided_slice %1 {offsets = [6, 0, 0], sizes = [1, 2, 32], strides = [1, 1, 1]} : vector<8x2x32xf32> to vector<1x2x32xf32>
    %1051 = vector.shape_cast %1050 : vector<1x2x32xf32> to vector<2x32xf32>
    %1052 = vector.broadcast %1049 : vector<1x32xf32> to vector<2x32xf32>
    %1053 = arith.mulf %1052, %1051 : vector<2x32xf32>
    %1054 = arith.subf %1041, %1053 : vector<2x32xf32>
    %1055 = arith.addf %1041, %1047 : vector<2x32xf32>
    %1056 = arith.addf %1034, %1054 : vector<2x32xf32>
    %1057 = arith.addf %1035, %1055 : vector<2x32xf32>
    %1058 = vector.extract_strided_slice %3 {offsets = [7, 5, 0], sizes = [1, 1, 32], strides = [1, 1, 1]} : vector<8x8x32xf32> to vector<1x1x32xf32>
    %1059 = vector.shape_cast %1058 : vector<1x1x32xf32> to vector<1x32xf32>
    %1060 = vector.extract_strided_slice %2 {offsets = [7, 0, 0], sizes = [1, 2, 32], strides = [1, 1, 1]} : vector<8x2x32xf32> to vector<1x2x32xf32>
    %1061 = vector.shape_cast %1060 : vector<1x2x32xf32> to vector<2x32xf32>
    %1062 = vector.broadcast %1059 : vector<1x32xf32> to vector<2x32xf32>
    %1063 = arith.mulf %1062, %1061 : vector<2x32xf32>
    %1064 = vector.extract_strided_slice %4 {offsets = [7, 5, 0], sizes = [1, 1, 32], strides = [1, 1, 1]} : vector<8x8x32xf32> to vector<1x1x32xf32>
    %1065 = vector.shape_cast %1064 : vector<1x1x32xf32> to vector<1x32xf32>
    %1066 = vector.extract_strided_slice %0 {offsets = [7, 0, 0], sizes = [1, 2, 32], strides = [1, 1, 1]} : vector<8x2x32xf32> to vector<1x2x32xf32>
    %1067 = vector.shape_cast %1066 : vector<1x2x32xf32> to vector<2x32xf32>
    %1068 = vector.broadcast %1065 : vector<1x32xf32> to vector<2x32xf32>
    %1069 = arith.mulf %1068, %1067 : vector<2x32xf32>
    %1070 = vector.extract_strided_slice %5 {offsets = [7, 5, 0], sizes = [1, 1, 32], strides = [1, 1, 1]} : vector<8x8x32xf32> to vector<1x1x32xf32>
    %1071 = vector.shape_cast %1070 : vector<1x1x32xf32> to vector<1x32xf32>
    %1072 = vector.extract_strided_slice %1 {offsets = [7, 0, 0], sizes = [1, 2, 32], strides = [1, 1, 1]} : vector<8x2x32xf32> to vector<1x2x32xf32>
    %1073 = vector.shape_cast %1072 : vector<1x2x32xf32> to vector<2x32xf32>
    %1074 = vector.broadcast %1071 : vector<1x32xf32> to vector<2x32xf32>
    %1075 = arith.mulf %1074, %1073 : vector<2x32xf32>
    %1076 = arith.subf %1063, %1075 : vector<2x32xf32>
    %1077 = arith.addf %1063, %1069 : vector<2x32xf32>
    %1078 = arith.addf %1056, %1076 : vector<2x32xf32>
    %1079 = arith.addf %1057, %1077 : vector<2x32xf32>
    %c5 = arith.constant 5 : index
    %c0_40 = arith.constant 0 : index
    %c0_41 = arith.constant 0 : index
    %1080 = vector.load %arg6[%c5, %c0_40, %c0_41] : memref<8x2x32xf32, #tpu.memory_space<vmem>>, vector<1x2x32xf32>
    %1081 = vector.shape_cast %1080 : vector<1x2x32xf32> to vector<2x32xf32>
    %1082 = vector.shape_cast %1078 : vector<2x32xf32> to vector<1x2x32xf32>
    tpu.vector_store %arg6[%c5, %c0_40, %c0_41], %1082 {strides = array<i32>} : memref<8x2x32xf32, #tpu.memory_space<vmem>>, vector<1x2x32xf32>,
    %c5_42 = arith.constant 5 : index
    %c0_43 = arith.constant 0 : index
    %c0_44 = arith.constant 0 : index
    %1083 = vector.load %arg7[%c5_42, %c0_43, %c0_44] : memref<8x2x32xf32, #tpu.memory_space<vmem>>, vector<1x2x32xf32>
    %1084 = vector.shape_cast %1083 : vector<1x2x32xf32> to vector<2x32xf32>
    %1085 = vector.shape_cast %1079 : vector<2x32xf32> to vector<1x2x32xf32>
    tpu.vector_store %arg7[%c5_42, %c0_43, %c0_44], %1085 {strides = array<i32>} : memref<8x2x32xf32, #tpu.memory_space<vmem>>, vector<1x2x32xf32>,
    %1086 = vector.extract_strided_slice %3 {offsets = [0, 6, 0], sizes = [1, 1, 32], strides = [1, 1, 1]} : vector<8x8x32xf32> to vector<1x1x32xf32>
    %1087 = vector.shape_cast %1086 : vector<1x1x32xf32> to vector<1x32xf32>
    %1088 = vector.extract_strided_slice %2 {offsets = [0, 0, 0], sizes = [1, 2, 32], strides = [1, 1, 1]} : vector<8x2x32xf32> to vector<1x2x32xf32>
    %1089 = vector.shape_cast %1088 : vector<1x2x32xf32> to vector<2x32xf32>
    %1090 = vector.broadcast %1087 : vector<1x32xf32> to vector<2x32xf32>
    %1091 = arith.mulf %1090, %1089 : vector<2x32xf32>
    %1092 = vector.extract_strided_slice %4 {offsets = [0, 6, 0], sizes = [1, 1, 32], strides = [1, 1, 1]} : vector<8x8x32xf32> to vector<1x1x32xf32>
    %1093 = vector.shape_cast %1092 : vector<1x1x32xf32> to vector<1x32xf32>
    %1094 = vector.extract_strided_slice %0 {offsets = [0, 0, 0], sizes = [1, 2, 32], strides = [1, 1, 1]} : vector<8x2x32xf32> to vector<1x2x32xf32>
    %1095 = vector.shape_cast %1094 : vector<1x2x32xf32> to vector<2x32xf32>
    %1096 = vector.broadcast %1093 : vector<1x32xf32> to vector<2x32xf32>
    %1097 = arith.mulf %1096, %1095 : vector<2x32xf32>
    %1098 = vector.extract_strided_slice %5 {offsets = [0, 6, 0], sizes = [1, 1, 32], strides = [1, 1, 1]} : vector<8x8x32xf32> to vector<1x1x32xf32>
    %1099 = vector.shape_cast %1098 : vector<1x1x32xf32> to vector<1x32xf32>
    %1100 = vector.extract_strided_slice %1 {offsets = [0, 0, 0], sizes = [1, 2, 32], strides = [1, 1, 1]} : vector<8x2x32xf32> to vector<1x2x32xf32>
    %1101 = vector.shape_cast %1100 : vector<1x2x32xf32> to vector<2x32xf32>
    %1102 = vector.broadcast %1099 : vector<1x32xf32> to vector<2x32xf32>
    %1103 = arith.mulf %1102, %1101 : vector<2x32xf32>
    %1104 = arith.subf %1091, %1103 : vector<2x32xf32>
    %1105 = arith.addf %1091, %1097 : vector<2x32xf32>
    %1106 = vector.extract_strided_slice %3 {offsets = [1, 6, 0], sizes = [1, 1, 32], strides = [1, 1, 1]} : vector<8x8x32xf32> to vector<1x1x32xf32>
    %1107 = vector.shape_cast %1106 : vector<1x1x32xf32> to vector<1x32xf32>
    %1108 = vector.extract_strided_slice %2 {offsets = [1, 0, 0], sizes = [1, 2, 32], strides = [1, 1, 1]} : vector<8x2x32xf32> to vector<1x2x32xf32>
    %1109 = vector.shape_cast %1108 : vector<1x2x32xf32> to vector<2x32xf32>
    %1110 = vector.broadcast %1107 : vector<1x32xf32> to vector<2x32xf32>
    %1111 = arith.mulf %1110, %1109 : vector<2x32xf32>
    %1112 = vector.extract_strided_slice %4 {offsets = [1, 6, 0], sizes = [1, 1, 32], strides = [1, 1, 1]} : vector<8x8x32xf32> to vector<1x1x32xf32>
    %1113 = vector.shape_cast %1112 : vector<1x1x32xf32> to vector<1x32xf32>
    %1114 = vector.extract_strided_slice %0 {offsets = [1, 0, 0], sizes = [1, 2, 32], strides = [1, 1, 1]} : vector<8x2x32xf32> to vector<1x2x32xf32>
    %1115 = vector.shape_cast %1114 : vector<1x2x32xf32> to vector<2x32xf32>
    %1116 = vector.broadcast %1113 : vector<1x32xf32> to vector<2x32xf32>
    %1117 = arith.mulf %1116, %1115 : vector<2x32xf32>
    %1118 = vector.extract_strided_slice %5 {offsets = [1, 6, 0], sizes = [1, 1, 32], strides = [1, 1, 1]} : vector<8x8x32xf32> to vector<1x1x32xf32>
    %1119 = vector.shape_cast %1118 : vector<1x1x32xf32> to vector<1x32xf32>
    %1120 = vector.extract_strided_slice %1 {offsets = [1, 0, 0], sizes = [1, 2, 32], strides = [1, 1, 1]} : vector<8x2x32xf32> to vector<1x2x32xf32>
    %1121 = vector.shape_cast %1120 : vector<1x2x32xf32> to vector<2x32xf32>
    %1122 = vector.broadcast %1119 : vector<1x32xf32> to vector<2x32xf32>
    %1123 = arith.mulf %1122, %1121 : vector<2x32xf32>
    %1124 = arith.subf %1111, %1123 : vector<2x32xf32>
    %1125 = arith.addf %1111, %1117 : vector<2x32xf32>
    %1126 = arith.addf %1104, %1124 : vector<2x32xf32>
    %1127 = arith.addf %1105, %1125 : vector<2x32xf32>
    %1128 = vector.extract_strided_slice %3 {offsets = [2, 6, 0], sizes = [1, 1, 32], strides = [1, 1, 1]} : vector<8x8x32xf32> to vector<1x1x32xf32>
    %1129 = vector.shape_cast %1128 : vector<1x1x32xf32> to vector<1x32xf32>
    %1130 = vector.extract_strided_slice %2 {offsets = [2, 0, 0], sizes = [1, 2, 32], strides = [1, 1, 1]} : vector<8x2x32xf32> to vector<1x2x32xf32>
    %1131 = vector.shape_cast %1130 : vector<1x2x32xf32> to vector<2x32xf32>
    %1132 = vector.broadcast %1129 : vector<1x32xf32> to vector<2x32xf32>
    %1133 = arith.mulf %1132, %1131 : vector<2x32xf32>
    %1134 = vector.extract_strided_slice %4 {offsets = [2, 6, 0], sizes = [1, 1, 32], strides = [1, 1, 1]} : vector<8x8x32xf32> to vector<1x1x32xf32>
    %1135 = vector.shape_cast %1134 : vector<1x1x32xf32> to vector<1x32xf32>
    %1136 = vector.extract_strided_slice %0 {offsets = [2, 0, 0], sizes = [1, 2, 32], strides = [1, 1, 1]} : vector<8x2x32xf32> to vector<1x2x32xf32>
    %1137 = vector.shape_cast %1136 : vector<1x2x32xf32> to vector<2x32xf32>
    %1138 = vector.broadcast %1135 : vector<1x32xf32> to vector<2x32xf32>
    %1139 = arith.mulf %1138, %1137 : vector<2x32xf32>
    %1140 = vector.extract_strided_slice %5 {offsets = [2, 6, 0], sizes = [1, 1, 32], strides = [1, 1, 1]} : vector<8x8x32xf32> to vector<1x1x32xf32>
    %1141 = vector.shape_cast %1140 : vector<1x1x32xf32> to vector<1x32xf32>
    %1142 = vector.extract_strided_slice %1 {offsets = [2, 0, 0], sizes = [1, 2, 32], strides = [1, 1, 1]} : vector<8x2x32xf32> to vector<1x2x32xf32>
    %1143 = vector.shape_cast %1142 : vector<1x2x32xf32> to vector<2x32xf32>
    %1144 = vector.broadcast %1141 : vector<1x32xf32> to vector<2x32xf32>
    %1145 = arith.mulf %1144, %1143 : vector<2x32xf32>
    %1146 = arith.subf %1133, %1145 : vector<2x32xf32>
    %1147 = arith.addf %1133, %1139 : vector<2x32xf32>
    %1148 = arith.addf %1126, %1146 : vector<2x32xf32>
    %1149 = arith.addf %1127, %1147 : vector<2x32xf32>
    %1150 = vector.extract_strided_slice %3 {offsets = [3, 6, 0], sizes = [1, 1, 32], strides = [1, 1, 1]} : vector<8x8x32xf32> to vector<1x1x32xf32>
    %1151 = vector.shape_cast %1150 : vector<1x1x32xf32> to vector<1x32xf32>
    %1152 = vector.extract_strided_slice %2 {offsets = [3, 0, 0], sizes = [1, 2, 32], strides = [1, 1, 1]} : vector<8x2x32xf32> to vector<1x2x32xf32>
    %1153 = vector.shape_cast %1152 : vector<1x2x32xf32> to vector<2x32xf32>
    %1154 = vector.broadcast %1151 : vector<1x32xf32> to vector<2x32xf32>
    %1155 = arith.mulf %1154, %1153 : vector<2x32xf32>
    %1156 = vector.extract_strided_slice %4 {offsets = [3, 6, 0], sizes = [1, 1, 32], strides = [1, 1, 1]} : vector<8x8x32xf32> to vector<1x1x32xf32>
    %1157 = vector.shape_cast %1156 : vector<1x1x32xf32> to vector<1x32xf32>
    %1158 = vector.extract_strided_slice %0 {offsets = [3, 0, 0], sizes = [1, 2, 32], strides = [1, 1, 1]} : vector<8x2x32xf32> to vector<1x2x32xf32>
    %1159 = vector.shape_cast %1158 : vector<1x2x32xf32> to vector<2x32xf32>
    %1160 = vector.broadcast %1157 : vector<1x32xf32> to vector<2x32xf32>
    %1161 = arith.mulf %1160, %1159 : vector<2x32xf32>
    %1162 = vector.extract_strided_slice %5 {offsets = [3, 6, 0], sizes = [1, 1, 32], strides = [1, 1, 1]} : vector<8x8x32xf32> to vector<1x1x32xf32>
    %1163 = vector.shape_cast %1162 : vector<1x1x32xf32> to vector<1x32xf32>
    %1164 = vector.extract_strided_slice %1 {offsets = [3, 0, 0], sizes = [1, 2, 32], strides = [1, 1, 1]} : vector<8x2x32xf32> to vector<1x2x32xf32>
    %1165 = vector.shape_cast %1164 : vector<1x2x32xf32> to vector<2x32xf32>
    %1166 = vector.broadcast %1163 : vector<1x32xf32> to vector<2x32xf32>
    %1167 = arith.mulf %1166, %1165 : vector<2x32xf32>
    %1168 = arith.subf %1155, %1167 : vector<2x32xf32>
    %1169 = arith.addf %1155, %1161 : vector<2x32xf32>
    %1170 = arith.addf %1148, %1168 : vector<2x32xf32>
    %1171 = arith.addf %1149, %1169 : vector<2x32xf32>
    %1172 = vector.extract_strided_slice %3 {offsets = [4, 6, 0], sizes = [1, 1, 32], strides = [1, 1, 1]} : vector<8x8x32xf32> to vector<1x1x32xf32>
    %1173 = vector.shape_cast %1172 : vector<1x1x32xf32> to vector<1x32xf32>
    %1174 = vector.extract_strided_slice %2 {offsets = [4, 0, 0], sizes = [1, 2, 32], strides = [1, 1, 1]} : vector<8x2x32xf32> to vector<1x2x32xf32>
    %1175 = vector.shape_cast %1174 : vector<1x2x32xf32> to vector<2x32xf32>
    %1176 = vector.broadcast %1173 : vector<1x32xf32> to vector<2x32xf32>
    %1177 = arith.mulf %1176, %1175 : vector<2x32xf32>
    %1178 = vector.extract_strided_slice %4 {offsets = [4, 6, 0], sizes = [1, 1, 32], strides = [1, 1, 1]} : vector<8x8x32xf32> to vector<1x1x32xf32>
    %1179 = vector.shape_cast %1178 : vector<1x1x32xf32> to vector<1x32xf32>
    %1180 = vector.extract_strided_slice %0 {offsets = [4, 0, 0], sizes = [1, 2, 32], strides = [1, 1, 1]} : vector<8x2x32xf32> to vector<1x2x32xf32>
    %1181 = vector.shape_cast %1180 : vector<1x2x32xf32> to vector<2x32xf32>
    %1182 = vector.broadcast %1179 : vector<1x32xf32> to vector<2x32xf32>
    %1183 = arith.mulf %1182, %1181 : vector<2x32xf32>
    %1184 = vector.extract_strided_slice %5 {offsets = [4, 6, 0], sizes = [1, 1, 32], strides = [1, 1, 1]} : vector<8x8x32xf32> to vector<1x1x32xf32>
    %1185 = vector.shape_cast %1184 : vector<1x1x32xf32> to vector<1x32xf32>
    %1186 = vector.extract_strided_slice %1 {offsets = [4, 0, 0], sizes = [1, 2, 32], strides = [1, 1, 1]} : vector<8x2x32xf32> to vector<1x2x32xf32>
    %1187 = vector.shape_cast %1186 : vector<1x2x32xf32> to vector<2x32xf32>
    %1188 = vector.broadcast %1185 : vector<1x32xf32> to vector<2x32xf32>
    %1189 = arith.mulf %1188, %1187 : vector<2x32xf32>
    %1190 = arith.subf %1177, %1189 : vector<2x32xf32>
    %1191 = arith.addf %1177, %1183 : vector<2x32xf32>
    %1192 = arith.addf %1170, %1190 : vector<2x32xf32>
    %1193 = arith.addf %1171, %1191 : vector<2x32xf32>
    %1194 = vector.extract_strided_slice %3 {offsets = [5, 6, 0], sizes = [1, 1, 32], strides = [1, 1, 1]} : vector<8x8x32xf32> to vector<1x1x32xf32>
    %1195 = vector.shape_cast %1194 : vector<1x1x32xf32> to vector<1x32xf32>
    %1196 = vector.extract_strided_slice %2 {offsets = [5, 0, 0], sizes = [1, 2, 32], strides = [1, 1, 1]} : vector<8x2x32xf32> to vector<1x2x32xf32>
    %1197 = vector.shape_cast %1196 : vector<1x2x32xf32> to vector<2x32xf32>
    %1198 = vector.broadcast %1195 : vector<1x32xf32> to vector<2x32xf32>
    %1199 = arith.mulf %1198, %1197 : vector<2x32xf32>
    %1200 = vector.extract_strided_slice %4 {offsets = [5, 6, 0], sizes = [1, 1, 32], strides = [1, 1, 1]} : vector<8x8x32xf32> to vector<1x1x32xf32>
    %1201 = vector.shape_cast %1200 : vector<1x1x32xf32> to vector<1x32xf32>
    %1202 = vector.extract_strided_slice %0 {offsets = [5, 0, 0], sizes = [1, 2, 32], strides = [1, 1, 1]} : vector<8x2x32xf32> to vector<1x2x32xf32>
    %1203 = vector.shape_cast %1202 : vector<1x2x32xf32> to vector<2x32xf32>
    %1204 = vector.broadcast %1201 : vector<1x32xf32> to vector<2x32xf32>
    %1205 = arith.mulf %1204, %1203 : vector<2x32xf32>
    %1206 = vector.extract_strided_slice %5 {offsets = [5, 6, 0], sizes = [1, 1, 32], strides = [1, 1, 1]} : vector<8x8x32xf32> to vector<1x1x32xf32>
    %1207 = vector.shape_cast %1206 : vector<1x1x32xf32> to vector<1x32xf32>
    %1208 = vector.extract_strided_slice %1 {offsets = [5, 0, 0], sizes = [1, 2, 32], strides = [1, 1, 1]} : vector<8x2x32xf32> to vector<1x2x32xf32>
    %1209 = vector.shape_cast %1208 : vector<1x2x32xf32> to vector<2x32xf32>
    %1210 = vector.broadcast %1207 : vector<1x32xf32> to vector<2x32xf32>
    %1211 = arith.mulf %1210, %1209 : vector<2x32xf32>
    %1212 = arith.subf %1199, %1211 : vector<2x32xf32>
    %1213 = arith.addf %1199, %1205 : vector<2x32xf32>
    %1214 = arith.addf %1192, %1212 : vector<2x32xf32>
    %1215 = arith.addf %1193, %1213 : vector<2x32xf32>
    %1216 = vector.extract_strided_slice %3 {offsets = [6, 6, 0], sizes = [1, 1, 32], strides = [1, 1, 1]} : vector<8x8x32xf32> to vector<1x1x32xf32>
    %1217 = vector.shape_cast %1216 : vector<1x1x32xf32> to vector<1x32xf32>
    %1218 = vector.extract_strided_slice %2 {offsets = [6, 0, 0], sizes = [1, 2, 32], strides = [1, 1, 1]} : vector<8x2x32xf32> to vector<1x2x32xf32>
    %1219 = vector.shape_cast %1218 : vector<1x2x32xf32> to vector<2x32xf32>
    %1220 = vector.broadcast %1217 : vector<1x32xf32> to vector<2x32xf32>
    %1221 = arith.mulf %1220, %1219 : vector<2x32xf32>
    %1222 = vector.extract_strided_slice %4 {offsets = [6, 6, 0], sizes = [1, 1, 32], strides = [1, 1, 1]} : vector<8x8x32xf32> to vector<1x1x32xf32>
    %1223 = vector.shape_cast %1222 : vector<1x1x32xf32> to vector<1x32xf32>
    %1224 = vector.extract_strided_slice %0 {offsets = [6, 0, 0], sizes = [1, 2, 32], strides = [1, 1, 1]} : vector<8x2x32xf32> to vector<1x2x32xf32>
    %1225 = vector.shape_cast %1224 : vector<1x2x32xf32> to vector<2x32xf32>
    %1226 = vector.broadcast %1223 : vector<1x32xf32> to vector<2x32xf32>
    %1227 = arith.mulf %1226, %1225 : vector<2x32xf32>
    %1228 = vector.extract_strided_slice %5 {offsets = [6, 6, 0], sizes = [1, 1, 32], strides = [1, 1, 1]} : vector<8x8x32xf32> to vector<1x1x32xf32>
    %1229 = vector.shape_cast %1228 : vector<1x1x32xf32> to vector<1x32xf32>
    %1230 = vector.extract_strided_slice %1 {offsets = [6, 0, 0], sizes = [1, 2, 32], strides = [1, 1, 1]} : vector<8x2x32xf32> to vector<1x2x32xf32>
    %1231 = vector.shape_cast %1230 : vector<1x2x32xf32> to vector<2x32xf32>
    %1232 = vector.broadcast %1229 : vector<1x32xf32> to vector<2x32xf32>
    %1233 = arith.mulf %1232, %1231 : vector<2x32xf32>
    %1234 = arith.subf %1221, %1233 : vector<2x32xf32>
    %1235 = arith.addf %1221, %1227 : vector<2x32xf32>
    %1236 = arith.addf %1214, %1234 : vector<2x32xf32>
    %1237 = arith.addf %1215, %1235 : vector<2x32xf32>
    %1238 = vector.extract_strided_slice %3 {offsets = [7, 6, 0], sizes = [1, 1, 32], strides = [1, 1, 1]} : vector<8x8x32xf32> to vector<1x1x32xf32>
    %1239 = vector.shape_cast %1238 : vector<1x1x32xf32> to vector<1x32xf32>
    %1240 = vector.extract_strided_slice %2 {offsets = [7, 0, 0], sizes = [1, 2, 32], strides = [1, 1, 1]} : vector<8x2x32xf32> to vector<1x2x32xf32>
    %1241 = vector.shape_cast %1240 : vector<1x2x32xf32> to vector<2x32xf32>
    %1242 = vector.broadcast %1239 : vector<1x32xf32> to vector<2x32xf32>
    %1243 = arith.mulf %1242, %1241 : vector<2x32xf32>
    %1244 = vector.extract_strided_slice %4 {offsets = [7, 6, 0], sizes = [1, 1, 32], strides = [1, 1, 1]} : vector<8x8x32xf32> to vector<1x1x32xf32>
    %1245 = vector.shape_cast %1244 : vector<1x1x32xf32> to vector<1x32xf32>
    %1246 = vector.extract_strided_slice %0 {offsets = [7, 0, 0], sizes = [1, 2, 32], strides = [1, 1, 1]} : vector<8x2x32xf32> to vector<1x2x32xf32>
    %1247 = vector.shape_cast %1246 : vector<1x2x32xf32> to vector<2x32xf32>
    %1248 = vector.broadcast %1245 : vector<1x32xf32> to vector<2x32xf32>
    %1249 = arith.mulf %1248, %1247 : vector<2x32xf32>
    %1250 = vector.extract_strided_slice %5 {offsets = [7, 6, 0], sizes = [1, 1, 32], strides = [1, 1, 1]} : vector<8x8x32xf32> to vector<1x1x32xf32>
    %1251 = vector.shape_cast %1250 : vector<1x1x32xf32> to vector<1x32xf32>
    %1252 = vector.extract_strided_slice %1 {offsets = [7, 0, 0], sizes = [1, 2, 32], strides = [1, 1, 1]} : vector<8x2x32xf32> to vector<1x2x32xf32>
    %1253 = vector.shape_cast %1252 : vector<1x2x32xf32> to vector<2x32xf32>
    %1254 = vector.broadcast %1251 : vector<1x32xf32> to vector<2x32xf32>
    %1255 = arith.mulf %1254, %1253 : vector<2x32xf32>
    %1256 = arith.subf %1243, %1255 : vector<2x32xf32>
    %1257 = arith.addf %1243, %1249 : vector<2x32xf32>
    %1258 = arith.addf %1236, %1256 : vector<2x32xf32>
    %1259 = arith.addf %1237, %1257 : vector<2x32xf32>
    %c6 = arith.constant 6 : index
    %c0_45 = arith.constant 0 : index
    %c0_46 = arith.constant 0 : index
    %1260 = vector.load %arg6[%c6, %c0_45, %c0_46] : memref<8x2x32xf32, #tpu.memory_space<vmem>>, vector<1x2x32xf32>
    %1261 = vector.shape_cast %1260 : vector<1x2x32xf32> to vector<2x32xf32>
    %1262 = vector.shape_cast %1258 : vector<2x32xf32> to vector<1x2x32xf32>
    tpu.vector_store %arg6[%c6, %c0_45, %c0_46], %1262 {strides = array<i32>} : memref<8x2x32xf32, #tpu.memory_space<vmem>>, vector<1x2x32xf32>,
    %c6_47 = arith.constant 6 : index
    %c0_48 = arith.constant 0 : index
    %c0_49 = arith.constant 0 : index
    %1263 = vector.load %arg7[%c6_47, %c0_48, %c0_49] : memref<8x2x32xf32, #tpu.memory_space<vmem>>, vector<1x2x32xf32>
    %1264 = vector.shape_cast %1263 : vector<1x2x32xf32> to vector<2x32xf32>
    %1265 = vector.shape_cast %1259 : vector<2x32xf32> to vector<1x2x32xf32>
    tpu.vector_store %arg7[%c6_47, %c0_48, %c0_49], %1265 {strides = array<i32>} : memref<8x2x32xf32, #tpu.memory_space<vmem>>, vector<1x2x32xf32>,
    %1266 = vector.extract_strided_slice %3 {offsets = [0, 7, 0], sizes = [1, 1, 32], strides = [1, 1, 1]} : vector<8x8x32xf32> to vector<1x1x32xf32>
    %1267 = vector.shape_cast %1266 : vector<1x1x32xf32> to vector<1x32xf32>
    %1268 = vector.extract_strided_slice %2 {offsets = [0, 0, 0], sizes = [1, 2, 32], strides = [1, 1, 1]} : vector<8x2x32xf32> to vector<1x2x32xf32>
    %1269 = vector.shape_cast %1268 : vector<1x2x32xf32> to vector<2x32xf32>
    %1270 = vector.broadcast %1267 : vector<1x32xf32> to vector<2x32xf32>
    %1271 = arith.mulf %1270, %1269 : vector<2x32xf32>
    %1272 = vector.extract_strided_slice %4 {offsets = [0, 7, 0], sizes = [1, 1, 32], strides = [1, 1, 1]} : vector<8x8x32xf32> to vector<1x1x32xf32>
    %1273 = vector.shape_cast %1272 : vector<1x1x32xf32> to vector<1x32xf32>
    %1274 = vector.extract_strided_slice %0 {offsets = [0, 0, 0], sizes = [1, 2, 32], strides = [1, 1, 1]} : vector<8x2x32xf32> to vector<1x2x32xf32>
    %1275 = vector.shape_cast %1274 : vector<1x2x32xf32> to vector<2x32xf32>
    %1276 = vector.broadcast %1273 : vector<1x32xf32> to vector<2x32xf32>
    %1277 = arith.mulf %1276, %1275 : vector<2x32xf32>
    %1278 = vector.extract_strided_slice %5 {offsets = [0, 7, 0], sizes = [1, 1, 32], strides = [1, 1, 1]} : vector<8x8x32xf32> to vector<1x1x32xf32>
    %1279 = vector.shape_cast %1278 : vector<1x1x32xf32> to vector<1x32xf32>
    %1280 = vector.extract_strided_slice %1 {offsets = [0, 0, 0], sizes = [1, 2, 32], strides = [1, 1, 1]} : vector<8x2x32xf32> to vector<1x2x32xf32>
    %1281 = vector.shape_cast %1280 : vector<1x2x32xf32> to vector<2x32xf32>
    %1282 = vector.broadcast %1279 : vector<1x32xf32> to vector<2x32xf32>
    %1283 = arith.mulf %1282, %1281 : vector<2x32xf32>
    %1284 = arith.subf %1271, %1283 : vector<2x32xf32>
    %1285 = arith.addf %1271, %1277 : vector<2x32xf32>
    %1286 = vector.extract_strided_slice %3 {offsets = [1, 7, 0], sizes = [1, 1, 32], strides = [1, 1, 1]} : vector<8x8x32xf32> to vector<1x1x32xf32>
    %1287 = vector.shape_cast %1286 : vector<1x1x32xf32> to vector<1x32xf32>
    %1288 = vector.extract_strided_slice %2 {offsets = [1, 0, 0], sizes = [1, 2, 32], strides = [1, 1, 1]} : vector<8x2x32xf32> to vector<1x2x32xf32>
    %1289 = vector.shape_cast %1288 : vector<1x2x32xf32> to vector<2x32xf32>
    %1290 = vector.broadcast %1287 : vector<1x32xf32> to vector<2x32xf32>
    %1291 = arith.mulf %1290, %1289 : vector<2x32xf32>
    %1292 = vector.extract_strided_slice %4 {offsets = [1, 7, 0], sizes = [1, 1, 32], strides = [1, 1, 1]} : vector<8x8x32xf32> to vector<1x1x32xf32>
    %1293 = vector.shape_cast %1292 : vector<1x1x32xf32> to vector<1x32xf32>
    %1294 = vector.extract_strided_slice %0 {offsets = [1, 0, 0], sizes = [1, 2, 32], strides = [1, 1, 1]} : vector<8x2x32xf32> to vector<1x2x32xf32>
    %1295 = vector.shape_cast %1294 : vector<1x2x32xf32> to vector<2x32xf32>
    %1296 = vector.broadcast %1293 : vector<1x32xf32> to vector<2x32xf32>
    %1297 = arith.mulf %1296, %1295 : vector<2x32xf32>
    %1298 = vector.extract_strided_slice %5 {offsets = [1, 7, 0], sizes = [1, 1, 32], strides = [1, 1, 1]} : vector<8x8x32xf32> to vector<1x1x32xf32>
    %1299 = vector.shape_cast %1298 : vector<1x1x32xf32> to vector<1x32xf32>
    %1300 = vector.extract_strided_slice %1 {offsets = [1, 0, 0], sizes = [1, 2, 32], strides = [1, 1, 1]} : vector<8x2x32xf32> to vector<1x2x32xf32>
    %1301 = vector.shape_cast %1300 : vector<1x2x32xf32> to vector<2x32xf32>
    %1302 = vector.broadcast %1299 : vector<1x32xf32> to vector<2x32xf32>
    %1303 = arith.mulf %1302, %1301 : vector<2x32xf32>
    %1304 = arith.subf %1291, %1303 : vector<2x32xf32>
    %1305 = arith.addf %1291, %1297 : vector<2x32xf32>
    %1306 = arith.addf %1284, %1304 : vector<2x32xf32>
    %1307 = arith.addf %1285, %1305 : vector<2x32xf32>
    %1308 = vector.extract_strided_slice %3 {offsets = [2, 7, 0], sizes = [1, 1, 32], strides = [1, 1, 1]} : vector<8x8x32xf32> to vector<1x1x32xf32>
    %1309 = vector.shape_cast %1308 : vector<1x1x32xf32> to vector<1x32xf32>
    %1310 = vector.extract_strided_slice %2 {offsets = [2, 0, 0], sizes = [1, 2, 32], strides = [1, 1, 1]} : vector<8x2x32xf32> to vector<1x2x32xf32>
    %1311 = vector.shape_cast %1310 : vector<1x2x32xf32> to vector<2x32xf32>
    %1312 = vector.broadcast %1309 : vector<1x32xf32> to vector<2x32xf32>
    %1313 = arith.mulf %1312, %1311 : vector<2x32xf32>
    %1314 = vector.extract_strided_slice %4 {offsets = [2, 7, 0], sizes = [1, 1, 32], strides = [1, 1, 1]} : vector<8x8x32xf32> to vector<1x1x32xf32>
    %1315 = vector.shape_cast %1314 : vector<1x1x32xf32> to vector<1x32xf32>
    %1316 = vector.extract_strided_slice %0 {offsets = [2, 0, 0], sizes = [1, 2, 32], strides = [1, 1, 1]} : vector<8x2x32xf32> to vector<1x2x32xf32>
    %1317 = vector.shape_cast %1316 : vector<1x2x32xf32> to vector<2x32xf32>
    %1318 = vector.broadcast %1315 : vector<1x32xf32> to vector<2x32xf32>
    %1319 = arith.mulf %1318, %1317 : vector<2x32xf32>
    %1320 = vector.extract_strided_slice %5 {offsets = [2, 7, 0], sizes = [1, 1, 32], strides = [1, 1, 1]} : vector<8x8x32xf32> to vector<1x1x32xf32>
    %1321 = vector.shape_cast %1320 : vector<1x1x32xf32> to vector<1x32xf32>
    %1322 = vector.extract_strided_slice %1 {offsets = [2, 0, 0], sizes = [1, 2, 32], strides = [1, 1, 1]} : vector<8x2x32xf32> to vector<1x2x32xf32>
    %1323 = vector.shape_cast %1322 : vector<1x2x32xf32> to vector<2x32xf32>
    %1324 = vector.broadcast %1321 : vector<1x32xf32> to vector<2x32xf32>
    %1325 = arith.mulf %1324, %1323 : vector<2x32xf32>
    %1326 = arith.subf %1313, %1325 : vector<2x32xf32>
    %1327 = arith.addf %1313, %1319 : vector<2x32xf32>
    %1328 = arith.addf %1306, %1326 : vector<2x32xf32>
    %1329 = arith.addf %1307, %1327 : vector<2x32xf32>
    %1330 = vector.extract_strided_slice %3 {offsets = [3, 7, 0], sizes = [1, 1, 32], strides = [1, 1, 1]} : vector<8x8x32xf32> to vector<1x1x32xf32>
    %1331 = vector.shape_cast %1330 : vector<1x1x32xf32> to vector<1x32xf32>
    %1332 = vector.extract_strided_slice %2 {offsets = [3, 0, 0], sizes = [1, 2, 32], strides = [1, 1, 1]} : vector<8x2x32xf32> to vector<1x2x32xf32>
    %1333 = vector.shape_cast %1332 : vector<1x2x32xf32> to vector<2x32xf32>
    %1334 = vector.broadcast %1331 : vector<1x32xf32> to vector<2x32xf32>
    %1335 = arith.mulf %1334, %1333 : vector<2x32xf32>
    %1336 = vector.extract_strided_slice %4 {offsets = [3, 7, 0], sizes = [1, 1, 32], strides = [1, 1, 1]} : vector<8x8x32xf32> to vector<1x1x32xf32>
    %1337 = vector.shape_cast %1336 : vector<1x1x32xf32> to vector<1x32xf32>
    %1338 = vector.extract_strided_slice %0 {offsets = [3, 0, 0], sizes = [1, 2, 32], strides = [1, 1, 1]} : vector<8x2x32xf32> to vector<1x2x32xf32>
    %1339 = vector.shape_cast %1338 : vector<1x2x32xf32> to vector<2x32xf32>
    %1340 = vector.broadcast %1337 : vector<1x32xf32> to vector<2x32xf32>
    %1341 = arith.mulf %1340, %1339 : vector<2x32xf32>
    %1342 = vector.extract_strided_slice %5 {offsets = [3, 7, 0], sizes = [1, 1, 32], strides = [1, 1, 1]} : vector<8x8x32xf32> to vector<1x1x32xf32>
    %1343 = vector.shape_cast %1342 : vector<1x1x32xf32> to vector<1x32xf32>
    %1344 = vector.extract_strided_slice %1 {offsets = [3, 0, 0], sizes = [1, 2, 32], strides = [1, 1, 1]} : vector<8x2x32xf32> to vector<1x2x32xf32>
    %1345 = vector.shape_cast %1344 : vector<1x2x32xf32> to vector<2x32xf32>
    %1346 = vector.broadcast %1343 : vector<1x32xf32> to vector<2x32xf32>
    %1347 = arith.mulf %1346, %1345 : vector<2x32xf32>
    %1348 = arith.subf %1335, %1347 : vector<2x32xf32>
    %1349 = arith.addf %1335, %1341 : vector<2x32xf32>
    %1350 = arith.addf %1328, %1348 : vector<2x32xf32>
    %1351 = arith.addf %1329, %1349 : vector<2x32xf32>
    %1352 = vector.extract_strided_slice %3 {offsets = [4, 7, 0], sizes = [1, 1, 32], strides = [1, 1, 1]} : vector<8x8x32xf32> to vector<1x1x32xf32>
    %1353 = vector.shape_cast %1352 : vector<1x1x32xf32> to vector<1x32xf32>
    %1354 = vector.extract_strided_slice %2 {offsets = [4, 0, 0], sizes = [1, 2, 32], strides = [1, 1, 1]} : vector<8x2x32xf32> to vector<1x2x32xf32>
    %1355 = vector.shape_cast %1354 : vector<1x2x32xf32> to vector<2x32xf32>
    %1356 = vector.broadcast %1353 : vector<1x32xf32> to vector<2x32xf32>
    %1357 = arith.mulf %1356, %1355 : vector<2x32xf32>
    %1358 = vector.extract_strided_slice %4 {offsets = [4, 7, 0], sizes = [1, 1, 32], strides = [1, 1, 1]} : vector<8x8x32xf32> to vector<1x1x32xf32>
    %1359 = vector.shape_cast %1358 : vector<1x1x32xf32> to vector<1x32xf32>
    %1360 = vector.extract_strided_slice %0 {offsets = [4, 0, 0], sizes = [1, 2, 32], strides = [1, 1, 1]} : vector<8x2x32xf32> to vector<1x2x32xf32>
    %1361 = vector.shape_cast %1360 : vector<1x2x32xf32> to vector<2x32xf32>
    %1362 = vector.broadcast %1359 : vector<1x32xf32> to vector<2x32xf32>
    %1363 = arith.mulf %1362, %1361 : vector<2x32xf32>
    %1364 = vector.extract_strided_slice %5 {offsets = [4, 7, 0], sizes = [1, 1, 32], strides = [1, 1, 1]} : vector<8x8x32xf32> to vector<1x1x32xf32>
    %1365 = vector.shape_cast %1364 : vector<1x1x32xf32> to vector<1x32xf32>
    %1366 = vector.extract_strided_slice %1 {offsets = [4, 0, 0], sizes = [1, 2, 32], strides = [1, 1, 1]} : vector<8x2x32xf32> to vector<1x2x32xf32>
    %1367 = vector.shape_cast %1366 : vector<1x2x32xf32> to vector<2x32xf32>
    %1368 = vector.broadcast %1365 : vector<1x32xf32> to vector<2x32xf32>
    %1369 = arith.mulf %1368, %1367 : vector<2x32xf32>
    %1370 = arith.subf %1357, %1369 : vector<2x32xf32>
    %1371 = arith.addf %1357, %1363 : vector<2x32xf32>
    %1372 = arith.addf %1350, %1370 : vector<2x32xf32>
    %1373 = arith.addf %1351, %1371 : vector<2x32xf32>
    %1374 = vector.extract_strided_slice %3 {offsets = [5, 7, 0], sizes = [1, 1, 32], strides = [1, 1, 1]} : vector<8x8x32xf32> to vector<1x1x32xf32>
    %1375 = vector.shape_cast %1374 : vector<1x1x32xf32> to vector<1x32xf32>
    %1376 = vector.extract_strided_slice %2 {offsets = [5, 0, 0], sizes = [1, 2, 32], strides = [1, 1, 1]} : vector<8x2x32xf32> to vector<1x2x32xf32>
    %1377 = vector.shape_cast %1376 : vector<1x2x32xf32> to vector<2x32xf32>
    %1378 = vector.broadcast %1375 : vector<1x32xf32> to vector<2x32xf32>
    %1379 = arith.mulf %1378, %1377 : vector<2x32xf32>
    %1380 = vector.extract_strided_slice %4 {offsets = [5, 7, 0], sizes = [1, 1, 32], strides = [1, 1, 1]} : vector<8x8x32xf32> to vector<1x1x32xf32>
    %1381 = vector.shape_cast %1380 : vector<1x1x32xf32> to vector<1x32xf32>
    %1382 = vector.extract_strided_slice %0 {offsets = [5, 0, 0], sizes = [1, 2, 32], strides = [1, 1, 1]} : vector<8x2x32xf32> to vector<1x2x32xf32>
    %1383 = vector.shape_cast %1382 : vector<1x2x32xf32> to vector<2x32xf32>
    %1384 = vector.broadcast %1381 : vector<1x32xf32> to vector<2x32xf32>
    %1385 = arith.mulf %1384, %1383 : vector<2x32xf32>
    %1386 = vector.extract_strided_slice %5 {offsets = [5, 7, 0], sizes = [1, 1, 32], strides = [1, 1, 1]} : vector<8x8x32xf32> to vector<1x1x32xf32>
    %1387 = vector.shape_cast %1386 : vector<1x1x32xf32> to vector<1x32xf32>
    %1388 = vector.extract_strided_slice %1 {offsets = [5, 0, 0], sizes = [1, 2, 32], strides = [1, 1, 1]} : vector<8x2x32xf32> to vector<1x2x32xf32>
    %1389 = vector.shape_cast %1388 : vector<1x2x32xf32> to vector<2x32xf32>
    %1390 = vector.broadcast %1387 : vector<1x32xf32> to vector<2x32xf32>
    %1391 = arith.mulf %1390, %1389 : vector<2x32xf32>
    %1392 = arith.subf %1379, %1391 : vector<2x32xf32>
    %1393 = arith.addf %1379, %1385 : vector<2x32xf32>
    %1394 = arith.addf %1372, %1392 : vector<2x32xf32>
    %1395 = arith.addf %1373, %1393 : vector<2x32xf32>
    %1396 = vector.extract_strided_slice %3 {offsets = [6, 7, 0], sizes = [1, 1, 32], strides = [1, 1, 1]} : vector<8x8x32xf32> to vector<1x1x32xf32>
    %1397 = vector.shape_cast %1396 : vector<1x1x32xf32> to vector<1x32xf32>
    %1398 = vector.extract_strided_slice %2 {offsets = [6, 0, 0], sizes = [1, 2, 32], strides = [1, 1, 1]} : vector<8x2x32xf32> to vector<1x2x32xf32>
    %1399 = vector.shape_cast %1398 : vector<1x2x32xf32> to vector<2x32xf32>
    %1400 = vector.broadcast %1397 : vector<1x32xf32> to vector<2x32xf32>
    %1401 = arith.mulf %1400, %1399 : vector<2x32xf32>
    %1402 = vector.extract_strided_slice %4 {offsets = [6, 7, 0], sizes = [1, 1, 32], strides = [1, 1, 1]} : vector<8x8x32xf32> to vector<1x1x32xf32>
    %1403 = vector.shape_cast %1402 : vector<1x1x32xf32> to vector<1x32xf32>
    %1404 = vector.extract_strided_slice %0 {offsets = [6, 0, 0], sizes = [1, 2, 32], strides = [1, 1, 1]} : vector<8x2x32xf32> to vector<1x2x32xf32>
    %1405 = vector.shape_cast %1404 : vector<1x2x32xf32> to vector<2x32xf32>
    %1406 = vector.broadcast %1403 : vector<1x32xf32> to vector<2x32xf32>
    %1407 = arith.mulf %1406, %1405 : vector<2x32xf32>
    %1408 = vector.extract_strided_slice %5 {offsets = [6, 7, 0], sizes = [1, 1, 32], strides = [1, 1, 1]} : vector<8x8x32xf32> to vector<1x1x32xf32>
    %1409 = vector.shape_cast %1408 : vector<1x1x32xf32> to vector<1x32xf32>
    %1410 = vector.extract_strided_slice %1 {offsets = [6, 0, 0], sizes = [1, 2, 32], strides = [1, 1, 1]} : vector<8x2x32xf32> to vector<1x2x32xf32>
    %1411 = vector.shape_cast %1410 : vector<1x2x32xf32> to vector<2x32xf32>
    %1412 = vector.broadcast %1409 : vector<1x32xf32> to vector<2x32xf32>
    %1413 = arith.mulf %1412, %1411 : vector<2x32xf32>
    %1414 = arith.subf %1401, %1413 : vector<2x32xf32>
    %1415 = arith.addf %1401, %1407 : vector<2x32xf32>
    %1416 = arith.addf %1394, %1414 : vector<2x32xf32>
    %1417 = arith.addf %1395, %1415 : vector<2x32xf32>
    %1418 = vector.extract_strided_slice %3 {offsets = [7, 7, 0], sizes = [1, 1, 32], strides = [1, 1, 1]} : vector<8x8x32xf32> to vector<1x1x32xf32>
    %1419 = vector.shape_cast %1418 : vector<1x1x32xf32> to vector<1x32xf32>
    %1420 = vector.extract_strided_slice %2 {offsets = [7, 0, 0], sizes = [1, 2, 32], strides = [1, 1, 1]} : vector<8x2x32xf32> to vector<1x2x32xf32>
    %1421 = vector.shape_cast %1420 : vector<1x2x32xf32> to vector<2x32xf32>
    %1422 = vector.broadcast %1419 : vector<1x32xf32> to vector<2x32xf32>
    %1423 = arith.mulf %1422, %1421 : vector<2x32xf32>
    %1424 = vector.extract_strided_slice %4 {offsets = [7, 7, 0], sizes = [1, 1, 32], strides = [1, 1, 1]} : vector<8x8x32xf32> to vector<1x1x32xf32>
    %1425 = vector.shape_cast %1424 : vector<1x1x32xf32> to vector<1x32xf32>
    %1426 = vector.extract_strided_slice %0 {offsets = [7, 0, 0], sizes = [1, 2, 32], strides = [1, 1, 1]} : vector<8x2x32xf32> to vector<1x2x32xf32>
    %1427 = vector.shape_cast %1426 : vector<1x2x32xf32> to vector<2x32xf32>
    %1428 = vector.broadcast %1425 : vector<1x32xf32> to vector<2x32xf32>
    %1429 = arith.mulf %1428, %1427 : vector<2x32xf32>
    %1430 = vector.extract_strided_slice %5 {offsets = [7, 7, 0], sizes = [1, 1, 32], strides = [1, 1, 1]} : vector<8x8x32xf32> to vector<1x1x32xf32>
    %1431 = vector.shape_cast %1430 : vector<1x1x32xf32> to vector<1x32xf32>
    %1432 = vector.extract_strided_slice %1 {offsets = [7, 0, 0], sizes = [1, 2, 32], strides = [1, 1, 1]} : vector<8x2x32xf32> to vector<1x2x32xf32>
    %1433 = vector.shape_cast %1432 : vector<1x2x32xf32> to vector<2x32xf32>
    %1434 = vector.broadcast %1431 : vector<1x32xf32> to vector<2x32xf32>
    %1435 = arith.mulf %1434, %1433 : vector<2x32xf32>
    %1436 = arith.subf %1423, %1435 : vector<2x32xf32>
    %1437 = arith.addf %1423, %1429 : vector<2x32xf32>
    %1438 = arith.addf %1416, %1436 : vector<2x32xf32>
    %1439 = arith.addf %1417, %1437 : vector<2x32xf32>
    %c7 = arith.constant 7 : index
    %c0_50 = arith.constant 0 : index
    %c0_51 = arith.constant 0 : index
    %1440 = vector.load %arg6[%c7, %c0_50, %c0_51] : memref<8x2x32xf32, #tpu.memory_space<vmem>>, vector<1x2x32xf32>
    %1441 = vector.shape_cast %1440 : vector<1x2x32xf32> to vector<2x32xf32>
    %1442 = vector.shape_cast %1438 : vector<2x32xf32> to vector<1x2x32xf32>
    tpu.vector_store %arg6[%c7, %c0_50, %c0_51], %1442 {strides = array<i32>} : memref<8x2x32xf32, #tpu.memory_space<vmem>>, vector<1x2x32xf32>,
    %c7_52 = arith.constant 7 : index
    %c0_53 = arith.constant 0 : index
    %c0_54 = arith.constant 0 : index
    %1443 = vector.load %arg7[%c7_52, %c0_53, %c0_54] : memref<8x2x32xf32, #tpu.memory_space<vmem>>, vector<1x2x32xf32>
    %1444 = vector.shape_cast %1443 : vector<1x2x32xf32> to vector<2x32xf32>
    %1445 = vector.shape_cast %1439 : vector<2x32xf32> to vector<1x2x32xf32>
    tpu.vector_store %arg7[%c7_52, %c0_53, %c0_54], %1445 {strides = array<i32>} : memref<8x2x32xf32, #tpu.memory_space<vmem>>, vector<1x2x32xf32>,
    return
  }
  func.func @transform_0(%arg0: i32) -> (i32, i32, i32) {
    %c0_i32 = arith.constant 0 : i32
    %c0_i32_0 = arith.constant 0 : i32
    %c0_i32_1 = arith.constant 0 : i32
    return %c0_i32, %c0_i32_0, %arg0 : i32, i32, i32
  }
  func.func @transform_1(%arg0: i32) -> (i32, i32, i32) {
    %c0_i32 = arith.constant 0 : i32
    %c0_i32_0 = arith.constant 0 : i32
    %c0_i32_1 = arith.constant 0 : i32
    return %c0_i32, %c0_i32_0, %arg0 : i32, i32, i32
  }
  func.func @transform_2(%arg0: i32) -> (i32, i32, i32) {
    %c0_i32 = arith.constant 0 : i32
    %c0_i32_0 = arith.constant 0 : i32
    %c0_i32_1 = arith.constant 0 : i32
    return %c0_i32, %c0_i32_0, %arg0 : i32, i32, i32
  }
  func.func @transform_3(%arg0: i32) -> (i32, i32, i32) {
    %c0_i32 = arith.constant 0 : i32
    %c0_i32_0 = arith.constant 0 : i32
    %c0_i32_1 = arith.constant 0 : i32
    return %c0_i32, %c0_i32_0, %arg0 : i32, i32, i32
  }
  func.func @transform_4(%arg0: i32) -> (i32, i32, i32) {
    %c0_i32 = arith.constant 0 : i32
    %c0_i32_0 = arith.constant 0 : i32
    %c0_i32_1 = arith.constant 0 : i32
    return %c0_i32, %c0_i32_0, %arg0 : i32, i32, i32
  }
  func.func @transform_5(%arg0: i32) -> (i32, i32, i32) {
    %c0_i32 = arith.constant 0 : i32
    %c0_i32_0 = arith.constant 0 : i32
    %c0_i32_1 = arith.constant 0 : i32
    return %c0_i32, %c0_i32_0, %arg0 : i32, i32, i32
  }
  func.func @transform_6(%arg0: i32) -> (i32, i32, i32) {
    %c0_i32 = arith.constant 0 : i32
    %c0_i32_0 = arith.constant 0 : i32
    %c0_i32_1 = arith.constant 0 : i32
    return %c0_i32, %c0_i32_0, %arg0 : i32, i32, i32
  }
}

module attributes {stable_mosaic.version = 11 : i64} {
  func.func @_pw_conv_res_tanh_kernel(%arg0: i32, %arg1: memref<8x256xf32, #tpu.memory_space<vmem>>, %arg2: memref<8x8xf32, #tpu.memory_space<vmem>>, %arg3: memref<8x1xf32, #tpu.memory_space<vmem>>, %arg4: memref<8x256xf32, #tpu.memory_space<vmem>>, %arg5: memref<8x256xf32, #tpu.memory_space<vmem>>) attributes {dimension_semantics = [#tpu.dimension_semantics<parallel>], iteration_bounds = array<i64: 2>, scalar_prefetch = 0 : i64, scratch_operands = 0 : i64, tpu.core_type = #tpu.core_type<tc>, window_params = [{transform_indices = @transform_0, window_bounds = array<i64: 8, 256>}, {pipeline_mode = #tpu.pipeline_mode<synchronous>, transform_indices = @transform_1, window_bounds = array<i64: 8, 8>}, {pipeline_mode = #tpu.pipeline_mode<synchronous>, transform_indices = @transform_2, window_bounds = array<i64: 8, 1>}, {transform_indices = @transform_3, window_bounds = array<i64: 8, 256>}, {transform_indices = @transform_4, window_bounds = array<i64: 8, 256>}]} {
    %c0 = arith.constant 0 : index
    %c0_0 = arith.constant 0 : index
    %0 = vector.load %arg1[%c0, %c0_0] : memref<8x256xf32, #tpu.memory_space<vmem>>, vector<8x256xf32>
    %c0_1 = arith.constant 0 : index
    %c0_2 = arith.constant 0 : index
    %1 = vector.load %arg2[%c0_1, %c0_2] : memref<8x8xf32, #tpu.memory_space<vmem>>, vector<8x8xf32>
    %2 = vector.extract_strided_slice %1 {offsets = [0, 0], sizes = [8, 1], strides = [1, 1]} : vector<8x8xf32> to vector<8x1xf32>
    %3 = vector.extract_strided_slice %0 {offsets = [0, 0], sizes = [1, 256], strides = [1, 1]} : vector<8x256xf32> to vector<1x256xf32>
    %4 = vector.broadcast %2 : vector<8x1xf32> to vector<8x256xf32>
    %5 = vector.broadcast %3 : vector<1x256xf32> to vector<8x256xf32>
    %6 = arith.mulf %4, %5 : vector<8x256xf32>
    %7 = vector.extract_strided_slice %1 {offsets = [0, 1], sizes = [8, 1], strides = [1, 1]} : vector<8x8xf32> to vector<8x1xf32>
    %8 = vector.extract_strided_slice %0 {offsets = [1, 0], sizes = [1, 256], strides = [1, 1]} : vector<8x256xf32> to vector<1x256xf32>
    %9 = vector.broadcast %7 : vector<8x1xf32> to vector<8x256xf32>
    %10 = vector.broadcast %8 : vector<1x256xf32> to vector<8x256xf32>
    %11 = arith.mulf %9, %10 : vector<8x256xf32>
    %12 = arith.addf %6, %11 : vector<8x256xf32>
    %13 = vector.extract_strided_slice %1 {offsets = [0, 2], sizes = [8, 1], strides = [1, 1]} : vector<8x8xf32> to vector<8x1xf32>
    %14 = vector.extract_strided_slice %0 {offsets = [2, 0], sizes = [1, 256], strides = [1, 1]} : vector<8x256xf32> to vector<1x256xf32>
    %15 = vector.broadcast %13 : vector<8x1xf32> to vector<8x256xf32>
    %16 = vector.broadcast %14 : vector<1x256xf32> to vector<8x256xf32>
    %17 = arith.mulf %15, %16 : vector<8x256xf32>
    %18 = arith.addf %12, %17 : vector<8x256xf32>
    %19 = vector.extract_strided_slice %1 {offsets = [0, 3], sizes = [8, 1], strides = [1, 1]} : vector<8x8xf32> to vector<8x1xf32>
    %20 = vector.extract_strided_slice %0 {offsets = [3, 0], sizes = [1, 256], strides = [1, 1]} : vector<8x256xf32> to vector<1x256xf32>
    %21 = vector.broadcast %19 : vector<8x1xf32> to vector<8x256xf32>
    %22 = vector.broadcast %20 : vector<1x256xf32> to vector<8x256xf32>
    %23 = arith.mulf %21, %22 : vector<8x256xf32>
    %24 = arith.addf %18, %23 : vector<8x256xf32>
    %25 = vector.extract_strided_slice %1 {offsets = [0, 4], sizes = [8, 1], strides = [1, 1]} : vector<8x8xf32> to vector<8x1xf32>
    %26 = vector.extract_strided_slice %0 {offsets = [4, 0], sizes = [1, 256], strides = [1, 1]} : vector<8x256xf32> to vector<1x256xf32>
    %27 = vector.broadcast %25 : vector<8x1xf32> to vector<8x256xf32>
    %28 = vector.broadcast %26 : vector<1x256xf32> to vector<8x256xf32>
    %29 = arith.mulf %27, %28 : vector<8x256xf32>
    %30 = arith.addf %24, %29 : vector<8x256xf32>
    %31 = vector.extract_strided_slice %1 {offsets = [0, 5], sizes = [8, 1], strides = [1, 1]} : vector<8x8xf32> to vector<8x1xf32>
    %32 = vector.extract_strided_slice %0 {offsets = [5, 0], sizes = [1, 256], strides = [1, 1]} : vector<8x256xf32> to vector<1x256xf32>
    %33 = vector.broadcast %31 : vector<8x1xf32> to vector<8x256xf32>
    %34 = vector.broadcast %32 : vector<1x256xf32> to vector<8x256xf32>
    %35 = arith.mulf %33, %34 : vector<8x256xf32>
    %36 = arith.addf %30, %35 : vector<8x256xf32>
    %37 = vector.extract_strided_slice %1 {offsets = [0, 6], sizes = [8, 1], strides = [1, 1]} : vector<8x8xf32> to vector<8x1xf32>
    %38 = vector.extract_strided_slice %0 {offsets = [6, 0], sizes = [1, 256], strides = [1, 1]} : vector<8x256xf32> to vector<1x256xf32>
    %39 = vector.broadcast %37 : vector<8x1xf32> to vector<8x256xf32>
    %40 = vector.broadcast %38 : vector<1x256xf32> to vector<8x256xf32>
    %41 = arith.mulf %39, %40 : vector<8x256xf32>
    %42 = arith.addf %36, %41 : vector<8x256xf32>
    %43 = vector.extract_strided_slice %1 {offsets = [0, 7], sizes = [8, 1], strides = [1, 1]} : vector<8x8xf32> to vector<8x1xf32>
    %44 = vector.extract_strided_slice %0 {offsets = [7, 0], sizes = [1, 256], strides = [1, 1]} : vector<8x256xf32> to vector<1x256xf32>
    %45 = vector.broadcast %43 : vector<8x1xf32> to vector<8x256xf32>
    %46 = vector.broadcast %44 : vector<1x256xf32> to vector<8x256xf32>
    %47 = arith.mulf %45, %46 : vector<8x256xf32>
    %48 = arith.addf %42, %47 : vector<8x256xf32>
    %c0_3 = arith.constant 0 : index
    %c0_4 = arith.constant 0 : index
    %49 = vector.load %arg3[%c0_3, %c0_4] : memref<8x1xf32, #tpu.memory_space<vmem>>, vector<8x1xf32>
    %50 = vector.broadcast %49 : vector<8x1xf32> to vector<8x256xf32>
    %51 = arith.addf %48, %50 : vector<8x256xf32>
    %c0_5 = arith.constant 0 : index
    %c0_6 = arith.constant 0 : index
    %52 = vector.load %arg4[%c0_5, %c0_6] : memref<8x256xf32, #tpu.memory_space<vmem>>, vector<8x256xf32>
    %53 = arith.addf %51, %52 : vector<8x256xf32>
    %54 = math.tanh %53 : vector<8x256xf32>
    %c0_7 = arith.constant 0 : index
    %c0_8 = arith.constant 0 : index
    %55 = vector.load %arg5[%c0_7, %c0_8] : memref<8x256xf32, #tpu.memory_space<vmem>>, vector<8x256xf32>
    tpu.vector_store %arg5[%c0_7, %c0_8], %54 {strides = array<i32>} : memref<8x256xf32, #tpu.memory_space<vmem>>, vector<8x256xf32>,
    return
  }
  func.func @transform_0(%arg0: i32) -> (i32, i32) {
    %c0_i32 = arith.constant 0 : i32
    %c0_i32_0 = arith.constant 0 : i32
    return %c0_i32, %arg0 : i32, i32
  }
  func.func @transform_1(%arg0: i32) -> (i32, i32) {
    %c0_i32 = arith.constant 0 : i32
    %c0_i32_0 = arith.constant 0 : i32
    %c0_i32_1 = arith.constant 0 : i32
    return %c0_i32, %c0_i32_0 : i32, i32
  }
  func.func @transform_2(%arg0: i32) -> (i32, i32) {
    %c0_i32 = arith.constant 0 : i32
    %c0_i32_0 = arith.constant 0 : i32
    %c0_i32_1 = arith.constant 0 : i32
    return %c0_i32, %c0_i32_0 : i32, i32
  }
  func.func @transform_3(%arg0: i32) -> (i32, i32) {
    %c0_i32 = arith.constant 0 : i32
    %c0_i32_0 = arith.constant 0 : i32
    return %c0_i32, %arg0 : i32, i32
  }
  func.func @transform_4(%arg0: i32) -> (i32, i32) {
    %c0_i32 = arith.constant 0 : i32
    %c0_i32_0 = arith.constant 0 : i32
    return %c0_i32, %arg0 : i32, i32
  }
}

module attributes {stable_mosaic.version = 11 : i64} {
  func.func @_pw_conv_kernel(%arg0: i32, %arg1: memref<8x256xf32, #tpu.memory_space<vmem>>, %arg2: memref<4x8xf32, #tpu.memory_space<vmem>>, %arg3: memref<4x1xf32, #tpu.memory_space<vmem>>, %arg4: memref<4x256xf32, #tpu.memory_space<vmem>>) attributes {dimension_semantics = [#tpu.dimension_semantics<parallel>], iteration_bounds = array<i64: 2>, scalar_prefetch = 0 : i64, scratch_operands = 0 : i64, tpu.core_type = #tpu.core_type<tc>, window_params = [{transform_indices = @transform_0, window_bounds = array<i64: 8, 256>}, {pipeline_mode = #tpu.pipeline_mode<synchronous>, transform_indices = @transform_1, window_bounds = array<i64: 4, 8>}, {pipeline_mode = #tpu.pipeline_mode<synchronous>, transform_indices = @transform_2, window_bounds = array<i64: 4, 1>}, {transform_indices = @transform_3, window_bounds = array<i64: 4, 256>}]} {
    %c0 = arith.constant 0 : index
    %c0_0 = arith.constant 0 : index
    %0 = vector.load %arg1[%c0, %c0_0] : memref<8x256xf32, #tpu.memory_space<vmem>>, vector<8x256xf32>
    %c0_1 = arith.constant 0 : index
    %c0_2 = arith.constant 0 : index
    %1 = vector.load %arg2[%c0_1, %c0_2] : memref<4x8xf32, #tpu.memory_space<vmem>>, vector<4x8xf32>
    %2 = vector.extract_strided_slice %1 {offsets = [0, 0], sizes = [4, 1], strides = [1, 1]} : vector<4x8xf32> to vector<4x1xf32>
    %3 = vector.extract_strided_slice %0 {offsets = [0, 0], sizes = [1, 256], strides = [1, 1]} : vector<8x256xf32> to vector<1x256xf32>
    %4 = vector.broadcast %2 : vector<4x1xf32> to vector<4x256xf32>
    %5 = vector.broadcast %3 : vector<1x256xf32> to vector<4x256xf32>
    %6 = arith.mulf %4, %5 : vector<4x256xf32>
    %7 = vector.extract_strided_slice %1 {offsets = [0, 1], sizes = [4, 1], strides = [1, 1]} : vector<4x8xf32> to vector<4x1xf32>
    %8 = vector.extract_strided_slice %0 {offsets = [1, 0], sizes = [1, 256], strides = [1, 1]} : vector<8x256xf32> to vector<1x256xf32>
    %9 = vector.broadcast %7 : vector<4x1xf32> to vector<4x256xf32>
    %10 = vector.broadcast %8 : vector<1x256xf32> to vector<4x256xf32>
    %11 = arith.mulf %9, %10 : vector<4x256xf32>
    %12 = arith.addf %6, %11 : vector<4x256xf32>
    %13 = vector.extract_strided_slice %1 {offsets = [0, 2], sizes = [4, 1], strides = [1, 1]} : vector<4x8xf32> to vector<4x1xf32>
    %14 = vector.extract_strided_slice %0 {offsets = [2, 0], sizes = [1, 256], strides = [1, 1]} : vector<8x256xf32> to vector<1x256xf32>
    %15 = vector.broadcast %13 : vector<4x1xf32> to vector<4x256xf32>
    %16 = vector.broadcast %14 : vector<1x256xf32> to vector<4x256xf32>
    %17 = arith.mulf %15, %16 : vector<4x256xf32>
    %18 = arith.addf %12, %17 : vector<4x256xf32>
    %19 = vector.extract_strided_slice %1 {offsets = [0, 3], sizes = [4, 1], strides = [1, 1]} : vector<4x8xf32> to vector<4x1xf32>
    %20 = vector.extract_strided_slice %0 {offsets = [3, 0], sizes = [1, 256], strides = [1, 1]} : vector<8x256xf32> to vector<1x256xf32>
    %21 = vector.broadcast %19 : vector<4x1xf32> to vector<4x256xf32>
    %22 = vector.broadcast %20 : vector<1x256xf32> to vector<4x256xf32>
    %23 = arith.mulf %21, %22 : vector<4x256xf32>
    %24 = arith.addf %18, %23 : vector<4x256xf32>
    %25 = vector.extract_strided_slice %1 {offsets = [0, 4], sizes = [4, 1], strides = [1, 1]} : vector<4x8xf32> to vector<4x1xf32>
    %26 = vector.extract_strided_slice %0 {offsets = [4, 0], sizes = [1, 256], strides = [1, 1]} : vector<8x256xf32> to vector<1x256xf32>
    %27 = vector.broadcast %25 : vector<4x1xf32> to vector<4x256xf32>
    %28 = vector.broadcast %26 : vector<1x256xf32> to vector<4x256xf32>
    %29 = arith.mulf %27, %28 : vector<4x256xf32>
    %30 = arith.addf %24, %29 : vector<4x256xf32>
    %31 = vector.extract_strided_slice %1 {offsets = [0, 5], sizes = [4, 1], strides = [1, 1]} : vector<4x8xf32> to vector<4x1xf32>
    %32 = vector.extract_strided_slice %0 {offsets = [5, 0], sizes = [1, 256], strides = [1, 1]} : vector<8x256xf32> to vector<1x256xf32>
    %33 = vector.broadcast %31 : vector<4x1xf32> to vector<4x256xf32>
    %34 = vector.broadcast %32 : vector<1x256xf32> to vector<4x256xf32>
    %35 = arith.mulf %33, %34 : vector<4x256xf32>
    %36 = arith.addf %30, %35 : vector<4x256xf32>
    %37 = vector.extract_strided_slice %1 {offsets = [0, 6], sizes = [4, 1], strides = [1, 1]} : vector<4x8xf32> to vector<4x1xf32>
    %38 = vector.extract_strided_slice %0 {offsets = [6, 0], sizes = [1, 256], strides = [1, 1]} : vector<8x256xf32> to vector<1x256xf32>
    %39 = vector.broadcast %37 : vector<4x1xf32> to vector<4x256xf32>
    %40 = vector.broadcast %38 : vector<1x256xf32> to vector<4x256xf32>
    %41 = arith.mulf %39, %40 : vector<4x256xf32>
    %42 = arith.addf %36, %41 : vector<4x256xf32>
    %43 = vector.extract_strided_slice %1 {offsets = [0, 7], sizes = [4, 1], strides = [1, 1]} : vector<4x8xf32> to vector<4x1xf32>
    %44 = vector.extract_strided_slice %0 {offsets = [7, 0], sizes = [1, 256], strides = [1, 1]} : vector<8x256xf32> to vector<1x256xf32>
    %45 = vector.broadcast %43 : vector<4x1xf32> to vector<4x256xf32>
    %46 = vector.broadcast %44 : vector<1x256xf32> to vector<4x256xf32>
    %47 = arith.mulf %45, %46 : vector<4x256xf32>
    %48 = arith.addf %42, %47 : vector<4x256xf32>
    %c0_3 = arith.constant 0 : index
    %c0_4 = arith.constant 0 : index
    %49 = vector.load %arg3[%c0_3, %c0_4] : memref<4x1xf32, #tpu.memory_space<vmem>>, vector<4x1xf32>
    %50 = vector.broadcast %49 : vector<4x1xf32> to vector<4x256xf32>
    %51 = arith.addf %48, %50 : vector<4x256xf32>
    %c0_5 = arith.constant 0 : index
    %c0_6 = arith.constant 0 : index
    %52 = vector.load %arg4[%c0_5, %c0_6] : memref<4x256xf32, #tpu.memory_space<vmem>>, vector<4x256xf32>
    tpu.vector_store %arg4[%c0_5, %c0_6], %51 {strides = array<i32>} : memref<4x256xf32, #tpu.memory_space<vmem>>, vector<4x256xf32>,
    return
  }
  func.func @transform_0(%arg0: i32) -> (i32, i32) {
    %c0_i32 = arith.constant 0 : i32
    %c0_i32_0 = arith.constant 0 : i32
    return %c0_i32, %arg0 : i32, i32
  }
  func.func @transform_1(%arg0: i32) -> (i32, i32) {
    %c0_i32 = arith.constant 0 : i32
    %c0_i32_0 = arith.constant 0 : i32
    %c0_i32_1 = arith.constant 0 : i32
    return %c0_i32, %c0_i32_0 : i32, i32
  }
  func.func @transform_2(%arg0: i32) -> (i32, i32) {
    %c0_i32 = arith.constant 0 : i32
    %c0_i32_0 = arith.constant 0 : i32
    %c0_i32_1 = arith.constant 0 : i32
    return %c0_i32, %c0_i32_0 : i32, i32
  }
  func.func @transform_3(%arg0: i32) -> (i32, i32) {
    %c0_i32 = arith.constant 0 : i32
    %c0_i32_0 = arith.constant 0 : i32
    return %c0_i32, %arg0 : i32, i32
  }
}

</mosaic_0001>

<bundles_post_ra>
// kernel: kno2d_forward.10
= control target key start
LH: loop header
LB: loop body
LE: loop exit
PB: predicated region body
PF: predicated region fallthrough
CT: control target
= control target key end

     0   :  { %s365_s12 = smov 0   ;;  %s392_s0 = inlined_call_operand.vmem [shape: f32[4,512], index: 0, kind: input, shape index: {}]   ;;  %s393_s1 = inlined_call_operand.vmem [shape: f32[8,4], index: 1, kind: input, shape index: {}]   ;;  %s394_s2 = inlined_call_operand.vmem [shape: f32[8,1], index: 2, kind: input, shape index: {}]   ;;  %s395_s3 = inlined_call_operand.vmem [shape: f32[8,512], index: 3, kind: output, shape index: {}]  }
   0x1 LB: > { %s300_s13 = sadd.s32 4294967295, %s339_s12   ;;  %p304_p0 = scmp.ge.s32.totalorder %s339_s12, 1  ;;  %s339_s12 = sphi %s365_s12, %s13_s12  }
   0x2   : > { %p138_p1 = scmp.lt.s32.totalorder %s339_s12, 3 }
   0x4   : > { %p139_p2 = pnand %p304_p0, %p138_p1 }
   0x5   : > { %s305_s18 = sshll.u32 (!%p139_p2), %s300_s13, 1 }
   0x6   : > { %142 = sbr.rel (%p139_p2) target bundleno = 156 (0x9c), region = 32  ;;  %p163_p3 = scmp.lt.s32.totalorder (!%p139_p2), %s305_s18, 3 }
   0xb   : > { %v175_v0 = vld [vmem:[%s393_s1] sm:$0xff]  ;;  %v341_v1 = vmov 0   ;;  %v342_v2 = vmov 2   ;;  %v343_v4 = vmov 1   ;;  %v344_v5 = vmov 3   ;;  %s397_s18 = smov (!%p163_p3, %s305_s18), 3 }
   0xc   : > { %323 = vset.pattern.permute.xlu0 %v341_v1  ;;  %325 = vset.pattern.permute.xlu1 %v342_v2  ;;  %v232_v3 = vld [vmem:[%s394_s2] sm:$0xff]  ;;  %s306_s19 = sshll.u32 %s397_s18, 2  ;;  %s308_s23 = sshll.u32 %s397_s18, 3 }
   0xd   : > { %178 = vperm.xlu0 %323, %v175_v0   ;;  %205 = vperm.xlu1 %325, %v175_v0   ;;  %s166_s22 = scalar_lea.vmem %s392_s0, %s306_s19  ;;  %s172_s26 = scalar_lea.vmem %s395_s3, %s308_s23 }
   0xe   : > { %327 = vset.pattern.permute.xlu2 %v341_v1  ;;  %v174_v6 = vld [vmem:[%s166_s22] sm:$0xff] }
   0xf   : > { %235 = vperm.xlu2 %327, %v232_v3   ;;  %v182_v9 = vperm.slane %v174_v6, 0  ;;  %v183_v10 = vperm.slane %v174_v6, 4  ;;  %v194_v11 = vperm.slane %v174_v6, 1  ;;  %v195_v12 = vperm.slane %v174_v6, 5 }
  0x10   : > { %v208_v13 = vperm.slane %v174_v6, 2  ;;  %v209_v14 = vperm.slane %v174_v6, 6  ;;  %v222_v15 = vperm.slane %v174_v6, 3  ;;  %v223_v16 = vperm.slane %v174_v6, 7 }
  0x11   : > { %v186_v17 = vperm.slane %v182_v9, 0  ;;  %v187_v18 = vperm.slane %v183_v10, 0  ;;  %v198_v19 = vperm.slane %v194_v11, 1  ;;  %v199_v20 = vperm.slane %v195_v12, 1 }
  0x12   : > { %v212_v21 = vperm.slane %v208_v13, 2  ;;  %v213_v22 = vperm.slane %v209_v14, 2  ;;  %v226_v23 = vperm.slane %v222_v15, 3  ;;  %v227_v24 = vperm.slane %v223_v16, 3 }
  0x15   : > { %324 = vset.pattern.permute.xlu0 %v343_v4  ;;  %326 = vset.pattern.permute.xlu1 %v344_v5 }
  0x16   : > { %191 = vperm.xlu0 %324, %v175_v0   ;;  %219 = vperm.xlu1 %326, %v175_v0  }
  0x1e   : > { %328 = vset.pattern.permute.xlu0 %v341_v1 }
  0x69   : > { %v236_v39 = vpop.permute.xlu2 %235 }
  0x7f   : > { %v179_v7 = vpop.permute.xlu0 %178  ;;  %v206_v8 = vpop.permute.xlu1 %205 }
  0x80   : > { %v188_v27 = vmul.f32 %v186_v17, %v179_v7  ;;  %v189_v28 = vmul.f32 %v187_v18, %v179_v7  ;;  %v214_v31 = vmul.f32 %v212_v21, %v206_v8  ;;  %v215_v32 = vmul.f32 %v213_v22, %v206_v8 }
  0x88   : > { %v192_v25 = vpop.permute.xlu0 %191  ;;  %v220_v26 = vpop.permute.xlu1 %219 }
  0x89   : > { %v200_v29 = vmul.f32 %v198_v19, %v192_v25  ;;  %v201_v30 = vmul.f32 %v199_v20, %v192_v25  ;;  %v228_v35 = vmul.f32 %v226_v23, %v220_v26  ;;  %v229_v36 = vmul.f32 %v227_v24, %v220_v26 }
  0x8b   : > { %v202_v33 = vadd.f32 %v200_v29, %v188_v27  ;;  %v203_v34 = vadd.f32 %v201_v30, %v189_v28 }
  0x8d   : > { %v216_v37 = vadd.f32 %v214_v31, %v202_v33  ;;  %v217_v38 = vadd.f32 %v215_v32, %v203_v34 }
  0x8f   : > { %v230_v40 = vadd.f32 %v228_v35, %v216_v37  ;;  %v231_v41 = vadd.f32 %v229_v36, %v217_v38 }
  0x91   : > { %v238_v42 = vadd.f32 %v236_v39, %v230_v40  ;;  %v239_v43 = vadd.f32 %v236_v39, %v231_v41 }
  0x93   : > { %329 = vtanh.f32 %v238_v42 }
  0x94   : > { %331 = vtanh.f32 %v239_v43 }
  0x99   : > { %v330_v44 = vpop.eup %329 }
  0x9a   : > { %v332_v45 = vpop.eup %331  ;;  %242 = vst [vmem:[%s172_s26] sm:$0xff] %v330_v44 }
  0x9b   : > { %243 = vst [vmem:[%s172_s26 + $0x8] sm:$0xff] %v332_v45 }
  0x9c PF: > { %s13_s12 = sadd.s32 1, %s339_s12  }
  0x9d   : > { %p10_p4 = scmp.ge.s32.totalorder %s13_s12, 4  }
  0x9f   :  { %12 = sbr.rel (!%p10_p4) target bundleno = 1 (0x1), region = 62 }

// kernel: tile.11
= control target key start
LH: loop header
LB: loop body
LE: loop exit
PB: predicated region body
PF: predicated region fallthrough
CT: control target
= control target key end

     0   :  { %vm260_vm0 = vcmask 1047556   ;;  %s492_s15 = smov 16   ;;  %vm262_vm1 = vcmask 130048   ;;  %vm335_vm2 = vcmask 261248   ;;  %s783_s0 = inlined_call_operand.vmem [shape: f32[8,8,2,16], index: 0, kind: input, shape index: {}]   ;;  %s784_s1 = inlined_call_operand.vmem [shape: f32[8,8,32], index: 1, kind: output, shape index: {}]  }
   0x1   :  { %v470_v0 = vld [vmem:[%s783_s0 + $0xe] sm:$0x3]  ;;  %v471_v1 = vld [vmem:[%s783_s0 + $0xc] sm:$0x3]  ;;  %v472_v2 = vld [vmem:[%s783_s0 + $0xa] sm:$0x3] }
   0x2   :  { %231 = vst [vmem:[#allocation0 + $0x38] sm:$0x3] %v470_v0  ;;  %v473_v3 = vld [vmem:[%s783_s0 + $0x8] sm:$0x3]  ;;  %v474_v4 = vld [vmem:[%s783_s0 + $0x6] sm:$0x3] }
   0x3   :  { %235 = vst [vmem:[#allocation0 + $0x30] sm:$0x3] %v471_v1  ;;  %v475_v5 = vld [vmem:[%s783_s0 + $0x4] sm:$0x3]  ;;  %v476_v6 = vld [vmem:[%s783_s0 + $0x2] sm:$0x3] }
   0x4   :  { %239 = vst [vmem:[#allocation0 + $0x28] sm:$0x3] %v472_v2  ;;  %v256_v7 = vld [vmem:[%s783_s0] sm:$0x3]  ;;  %v462_v8 = vld [vmem:[%s783_s0 + $0x1e] sm:$0x3] }
   0x5   :  { %243 = vst [vmem:[#allocation0 + $0x20] sm:$0x3] %v473_v3  ;;  %v463_v9 = vld [vmem:[%s783_s0 + $0x1c] sm:$0x3]  ;;  %v464_v10 = vld [vmem:[%s783_s0 + $0x1a] sm:$0x3] }
   0x6   :  { %247 = vst [vmem:[#allocation0 + $0x18] sm:$0x3] %v474_v4  ;;  %v465_v11 = vld [vmem:[%s783_s0 + $0x18] sm:$0x3]  ;;  %v466_v12 = vld [vmem:[%s783_s0 + $0x16] sm:$0x3] }
   0x7   :  { %251 = vst [vmem:[#allocation0 + $0x10] sm:$0x3] %v475_v5  ;;  %v467_v13 = vld [vmem:[%s783_s0 + $0x14] sm:$0x3]  ;;  %v468_v14 = vld [vmem:[%s783_s0 + $0x12] sm:$0x3] }
   0x8   :  { %255 = vst [vmem:[#allocation0 + $0x8] sm:$0x3] %v476_v6  ;;  %v469_v15 = vld [vmem:[%s783_s0 + $0x10] sm:$0x3]  ;;  %v438_v17 = vld [vmem:[%s783_s0 + $0x4e] sm:$0x3] }
   0x9   :  { %257 = vst [vmem:[#allocation0] sm:$0x3] %v256_v7  ;;  %v439_v18 = vld [vmem:[%s783_s0 + $0x4c] sm:$0x3]  ;;  %v440_v21 = vld [vmem:[%s783_s0 + $0x4a] sm:$0x3] }
   0xa   :  { %199 = vst [vmem:[#allocation0 + $0x78] sm:$0x3] %v462_v8  ;;  %v441_v22 = vld [vmem:[%s783_s0 + $0x48] sm:$0x3]  ;;  %v442_v23 = vld [vmem:[%s783_s0 + $0x46] sm:$0x3] }
   0xb   :  { %203 = vst [vmem:[#allocation0 + $0x70] sm:$0x3] %v463_v9  ;;  %v443_v24 = vld [vmem:[%s783_s0 + $0x44] sm:$0x3]  ;;  %v444_v25 = vld [vmem:[%s783_s0 + $0x42] sm:$0x3] }
   0xc   :  { %207 = vst [vmem:[#allocation0 + $0x68] sm:$0x3] %v464_v10  ;;  %v330_v16 = vld [vmem:[#allocation0 + $0x1] ss:$8 sm:$0xf0]  }
   0xd   :  { %211 = vst [vmem:[#allocation0 + $0x60] sm:$0x3] %v465_v11  ;;  %v445_v26 = vld [vmem:[%s783_s0 + $0x40] sm:$0x3]  ;;  %v430_v28 = vld [vmem:[%s783_s0 + $0x5e] sm:$0x3] }
   0xe   :  { %215 = vst [vmem:[#allocation0 + $0x58] sm:$0x3] %v466_v12  ;;  %v431_v29 = vld [vmem:[%s783_s0 + $0x5c] sm:$0x3]  ;;  %v432_v32 = vld [vmem:[%s783_s0 + $0x5a] sm:$0x3] }
   0xf   :  { %219 = vst [vmem:[#allocation0 + $0x50] sm:$0x3] %v467_v13  ;;  %v433_v33 = vld [vmem:[%s783_s0 + $0x58] sm:$0x3]  ;;  %v434_v34 = vld [vmem:[%s783_s0 + $0x56] sm:$0x3] }
  0x10   :  { %v328_v19 = vld [vmem:[#allocation0 + $0x1] ss:$8 sm:$0xf]   ;;  %223 = vst [vmem:[#allocation0 + $0x48] sm:$0x3] %v468_v14 }
  0x11   :  { %v332_v20 = vsel %vm260_vm0, %v330_v16, %v328_v19  ;;  %227 = vst [vmem:[#allocation0 + $0x40] sm:$0x3] %v469_v15  ;;  %v435_v35 = vld [vmem:[%s783_s0 + $0x54] sm:$0x3]  ;;  %v436_v36 = vld [vmem:[%s783_s0 + $0x52] sm:$0x3] }
  0x12   :  { %333 = vrot.lane.b32.xlu0 %v332_v20, %s492_s15  ;;  %103 = vst [vmem:[#allocation0 + $0x138] sm:$0x3] %v438_v17  ;;  %v437_v37 = vld [vmem:[%s783_s0 + $0x50] sm:$0x3]  ;;  %v446_v39 = vld [vmem:[%s783_s0 + $0x3e] sm:$0x3] }
  0x13   :  { %107 = vst [vmem:[#allocation0 + $0x130] sm:$0x3] %v439_v18  ;;  %v447_v40 = vld [vmem:[%s783_s0 + $0x3c] sm:$0x3]  ;;  %v448_v43 = vld [vmem:[%s783_s0 + $0x3a] sm:$0x3] }
  0x14   :  { %111 = vst [vmem:[#allocation0 + $0x128] sm:$0x3] %v440_v21  ;;  %v351_v27 = vld [vmem:[#allocation0 + $0x41] ss:$8 sm:$0xf0]  }
  0x15   :  { %115 = vst [vmem:[#allocation0 + $0x120] sm:$0x3] %v441_v22  ;;  %v449_v44 = vld [vmem:[%s783_s0 + $0x38] sm:$0x3]  ;;  %v450_v45 = vld [vmem:[%s783_s0 + $0x36] sm:$0x3] }
  0x16   :  { %119 = vst [vmem:[#allocation0 + $0x118] sm:$0x3] %v442_v23  ;;  %v451_v46 = vld [vmem:[%s783_s0 + $0x34] sm:$0x3]  ;;  %v452_v47 = vld [vmem:[%s783_s0 + $0x32] sm:$0x3] }
  0x17   :  { %123 = vst [vmem:[#allocation0 + $0x110] sm:$0x3] %v443_v24  ;;  %v453_v48 = vld [vmem:[%s783_s0 + $0x30] sm:$0x3]  ;;  %v414_v50 = vld [vmem:[%s783_s0 + $0x7e] sm:$0x3] }
  0x18   :  { %v349_v30 = vld [vmem:[#allocation0 + $0x41] ss:$8 sm:$0xf]   ;;  %127 = vst [vmem:[#allocation0 + $0x108] sm:$0x3] %v444_v25 }
  0x19   :  { %v353_v31 = vsel %vm260_vm0, %v351_v27, %v349_v30  ;;  %131 = vst [vmem:[#allocation0 + $0x100] sm:$0x3] %v445_v26  ;;  %v415_v51 = vld [vmem:[%s783_s0 + $0x7c] sm:$0x3]  ;;  %v416_v54 = vld [vmem:[%s783_s0 + $0x7a] sm:$0x3] }
  0x1a   :  { %354 = vrot.lane.b32.xlu1 %v353_v31, %s492_s15  ;;  %71 = vst [vmem:[#allocation0 + $0x178] sm:$0x3] %v430_v28  ;;  %v417_v55 = vld [vmem:[%s783_s0 + $0x78] sm:$0x3]  ;;  %v418_v56 = vld [vmem:[%s783_s0 + $0x76] sm:$0x3] }
  0x1b   :  { %75 = vst [vmem:[#allocation0 + $0x170] sm:$0x3] %v431_v29  ;;  %v419_v57 = vld [vmem:[%s783_s0 + $0x74] sm:$0x3]  ;;  %v420_v58 = vld [vmem:[%s783_s0 + $0x72] sm:$0x3] }
  0x1c   :  { %79 = vst [vmem:[#allocation0 + $0x168] sm:$0x3] %v432_v32  ;;  %v340_v38 = vld [vmem:[#allocation0 + $0x101] ss:$8 sm:$0xf0]  }
  0x1d   :  { %83 = vst [vmem:[#allocation0 + $0x160] sm:$0x3] %v433_v33  ;;  %v421_v59 = vld [vmem:[%s783_s0 + $0x70] sm:$0x3]  ;;  %v454_v61 = vld [vmem:[%s783_s0 + $0x2e] sm:$0x3] }
  0x1e   :  { %87 = vst [vmem:[#allocation0 + $0x158] sm:$0x3] %v434_v34  ;;  %v455_v62 = vld [vmem:[%s783_s0 + $0x2c] sm:$0x3]  ;;  %v456_v1 = vld [vmem:[%s783_s0 + $0x2a] sm:$0x3] }
  0x1f   :  { %91 = vst [vmem:[#allocation0 + $0x150] sm:$0x3] %v435_v35  ;;  %v457_v2 = vld [vmem:[%s783_s0 + $0x28] sm:$0x3]  ;;  %v458_v3 = vld [vmem:[%s783_s0 + $0x26] sm:$0x3] }
  0x20   :  { %v338_v41 = vld [vmem:[#allocation0 + $0x101] ss:$8 sm:$0xf]   ;;  %95 = vst [vmem:[#allocation0 + $0x148] sm:$0x3] %v436_v36 }
  0x21   :  { %v342_v42 = vsel %vm260_vm0, %v340_v38, %v338_v41  ;;  %99 = vst [vmem:[#allocation0 + $0x140] sm:$0x3] %v437_v37  ;;  %v459_v4 = vld [vmem:[%s783_s0 + $0x24] sm:$0x3]  ;;  %v460_v5 = vld [vmem:[%s783_s0 + $0x22] sm:$0x3] }
  0x22   :  { %343 = vrot.lane.b32.xlu0 %v342_v42, %s492_s15  ;;  %135 = vst [vmem:[#allocation0 + $0xf8] sm:$0x3] %v446_v39  ;;  %v461_v6 = vld [vmem:[%s783_s0 + $0x20] sm:$0x3]  ;;  %v422_v8 = vld [vmem:[%s783_s0 + $0x6e] sm:$0x3] }
  0x23   :  { %139 = vst [vmem:[#allocation0 + $0xf0] sm:$0x3] %v447_v40  ;;  %v423_v9 = vld [vmem:[%s783_s0 + $0x6c] sm:$0x3]  ;;  %v424_v12 = vld [vmem:[%s783_s0 + $0x6a] sm:$0x3] }
  0x24   :  { %143 = vst [vmem:[#allocation0 + $0xe8] sm:$0x3] %v448_v43  ;;  %v362_v49 = vld [vmem:[#allocation0 + $0x141] ss:$8 sm:$0xf0]  }
  0x25   :  { %147 = vst [vmem:[#allocation0 + $0xe0] sm:$0x3] %v449_v44  ;;  %v425_v13 = vld [vmem:[%s783_s0 + $0x68] sm:$0x3]  ;;  %v426_v14 = vld [vmem:[%s783_s0 + $0x66] sm:$0x3] }
  0x26   :  { %151 = vst [vmem:[#allocation0 + $0xd8] sm:$0x3] %v450_v45  ;;  %v427_v15 = vld [vmem:[%s783_s0 + $0x64] sm:$0x3]  ;;  %v428_v16 = vld [vmem:[%s783_s0 + $0x62] sm:$0x3] }
  0x27   :  { %155 = vst [vmem:[#allocation0 + $0xd0] sm:$0x3] %v451_v46  ;;  %v429_v17 = vld [vmem:[%s783_s0 + $0x60] sm:$0x3] }
  0x28   :  { %v360_v52 = vld [vmem:[#allocation0 + $0x141] ss:$8 sm:$0xf]   ;;  %159 = vst [vmem:[#allocation0 + $0xc8] sm:$0x3] %v452_v47 }
  0x29   :  { %v364_v53 = vsel %vm260_vm0, %v362_v49, %v360_v52  ;;  %163 = vst [vmem:[#allocation0 + $0xc0] sm:$0x3] %v453_v48  ;;  %v258_v24 = vld [vmem:[#allocation0] ss:$8 sm:$0xf]  }
  0x2a   :  { %365 = vrot.lane.b32.xlu1 %v364_v53, %s492_s15  ;;  %7 = vst [vmem:[#allocation0 + $0x1f8] sm:$0x3] %v414_v50  ;;  %v259_v25 = vld [vmem:[#allocation0] ss:$8 sm:$0xf0]  }
  0x2b   :  { %11 = vst [vmem:[#allocation0 + $0x1f0] sm:$0x3] %v415_v51  ;;  %v261_v26 = vsel %vm260_vm0, %v259_v25, %v258_v24  ;;  %v265_v27 = vld [vmem:[#allocation0 + $0x40] ss:$8 sm:$0xf]  }
  0x2c   :  { %15 = vst [vmem:[#allocation0 + $0x1e8] sm:$0x3] %v416_v54  ;;  %v395_v60 = vld [vmem:[#allocation0 + $0xc1] ss:$8 sm:$0xf0]  }
  0x2d   :  { %19 = vst [vmem:[#allocation0 + $0x1e0] sm:$0x3] %v417_v55  ;;  %v267_v28 = vld [vmem:[#allocation0 + $0x40] ss:$8 sm:$0xf0]  }
  0x2e   :  { %23 = vst [vmem:[#allocation0 + $0x1d8] sm:$0x3] %v418_v56  ;;  %v269_v29 = vsel %vm260_vm0, %v267_v28, %v265_v27  ;;  %v292_v33 = vld [vmem:[#allocation0 + $0x100] ss:$8 sm:$0xf]  }
  0x2f   :  { %27 = vst [vmem:[#allocation0 + $0x1d0] sm:$0x3] %v419_v57  ;;  %v294_v34 = vld [vmem:[#allocation0 + $0x100] ss:$8 sm:$0xf0]  }
  0x30   :  { %v393_v63 = vld [vmem:[#allocation0 + $0xc1] ss:$8 sm:$0xf]   ;;  %31 = vst [vmem:[#allocation0 + $0x1c8] sm:$0x3] %v420_v58  ;;  %v296_v35 = vsel %vm260_vm0, %v294_v34, %v292_v33 }
  0x31   :  { %v397_v0 = vsel %vm260_vm0, %v395_v60, %v393_v63  ;;  %35 = vst [vmem:[#allocation0 + $0x1c0] sm:$0x3] %v421_v59  ;;  %v301_v36 = vld [vmem:[#allocation0 + $0x140] ss:$8 sm:$0xf]  }
  0x32   :  { %398 = vrot.lane.b32.xlu0 %v397_v0, %s492_s15  ;;  %167 = vst [vmem:[#allocation0 + $0xb8] sm:$0x3] %v454_v61  ;;  %v303_v37 = vld [vmem:[#allocation0 + $0x140] ss:$8 sm:$0xf0]  }
  0x33   :  { %171 = vst [vmem:[#allocation0 + $0xb0] sm:$0x3] %v455_v62  ;;  %v305_v38 = vsel %vm260_vm0, %v303_v37, %v301_v36  ;;  %v283_v39 = vld [vmem:[#allocation0 + $0xc0] ss:$8 sm:$0xf]  }
  0x34   :  { %175 = vst [vmem:[#allocation0 + $0xa8] sm:$0x3] %v456_v1  ;;  %v406_v7 = vld [vmem:[#allocation0 + $0x1c1] ss:$8 sm:$0xf0]  }
  0x35   :  { %179 = vst [vmem:[#allocation0 + $0xa0] sm:$0x3] %v457_v2  ;;  %v285_v40 = vld [vmem:[#allocation0 + $0xc0] ss:$8 sm:$0xf0]  }
  0x36   :  { %183 = vst [vmem:[#allocation0 + $0x98] sm:$0x3] %v458_v3  ;;  %v287_v41 = vsel %vm260_vm0, %v285_v40, %v283_v39  ;;  %v321_v47 = vld [vmem:[#allocation0 + $0x1c0] ss:$8 sm:$0xf0]  }
  0x37   :  { %187 = vst [vmem:[#allocation0 + $0x90] sm:$0x3] %v459_v4 }
  0x38   :  { %v404_v10 = vld [vmem:[#allocation0 + $0x1c1] ss:$8 sm:$0xf]   ;;  %191 = vst [vmem:[#allocation0 + $0x88] sm:$0x3] %v460_v5 }
  0x39   :  { %v408_v11 = vsel %vm260_vm0, %v406_v7, %v404_v10  ;;  %195 = vst [vmem:[#allocation0 + $0x80] sm:$0x3] %v461_v6  ;;  %v319_v46 = vld [vmem:[#allocation0 + $0x1c0] ss:$8 sm:$0xf]  }
  0x3a   :  { %409 = vrot.lane.b32.xlu1 %v408_v11, %s492_s15  ;;  %39 = vst [vmem:[#allocation0 + $0x1b8] sm:$0x3] %v422_v8  ;;  %v323_v48 = vsel %vm260_vm0, %v321_v47, %v319_v46 }
  0x3b   :  { %43 = vst [vmem:[#allocation0 + $0x1b0] sm:$0x3] %v423_v9 }
  0x3c   :  { %47 = vst [vmem:[#allocation0 + $0x1a8] sm:$0x3] %v424_v12  ;;  %v373_v18 = vld [vmem:[#allocation0 + $0x81] ss:$8 sm:$0xf0]  }
  0x3d   :  { %51 = vst [vmem:[#allocation0 + $0x1a0] sm:$0x3] %v425_v13  ;;  %v276_v31 = vld [vmem:[#allocation0 + $0x80] ss:$8 sm:$0xf0]  }
  0x3e   :  { %55 = vst [vmem:[#allocation0 + $0x198] sm:$0x3] %v426_v14 }
  0x3f   :  { %59 = vst [vmem:[#allocation0 + $0x190] sm:$0x3] %v427_v15 }
  0x40   :  { %v371_v19 = vld [vmem:[#allocation0 + $0x81] ss:$8 sm:$0xf]   ;;  %63 = vst [vmem:[#allocation0 + $0x188] sm:$0x3] %v428_v16 }
  0x41   :  { %v375_v20 = vsel %vm260_vm0, %v373_v18, %v371_v19  ;;  %67 = vst [vmem:[#allocation0 + $0x180] sm:$0x3] %v429_v17  ;;  %v274_v30 = vld [vmem:[#allocation0 + $0x80] ss:$8 sm:$0xf]  }
  0x42   :  { %376 = vrot.lane.b32.xlu2 %v375_v20, %s492_s15  ;;  %263 = vst.msk [vmem:[%s784_s1] sm:$0xff] %vm262_vm1, %v261_v26   ;;  %v278_v32 = vsel %vm260_vm0, %v276_v31, %v274_v30 }
  0x43   :  { %477 = vst.msk [vmem:[%s784_s1 + $0x8] sm:$0xff] %vm262_vm1, %v269_v29  }
  0x44   :  { %v384_v21 = vld [vmem:[#allocation0 + $0x181] ss:$8 sm:$0xf0]   ;;  %478 = vst.msk [vmem:[%s784_s1 + $0x10] sm:$0xff] %vm262_vm1, %v278_v32  }
  0x45   :  { %480 = vst.msk [vmem:[%s784_s1 + $0x20] sm:$0xff] %vm262_vm1, %v296_v35   ;;  %v312_v44 = vld [vmem:[#allocation0 + $0x180] ss:$8 sm:$0xf0]  }
  0x46   :  { %481 = vst.msk [vmem:[%s784_s1 + $0x28] sm:$0xff] %vm262_vm1, %v305_v38  }
  0x47   :  { %479 = vst.msk [vmem:[%s784_s1 + $0x18] sm:$0xff] %vm262_vm1, %v287_v41  }
  0x48   :  { %v382_v22 = vld [vmem:[#allocation0 + $0x181] ss:$8 sm:$0xf]   ;;  %v310_v43 = vld [vmem:[#allocation0 + $0x180] ss:$8 sm:$0xf]  }
  0x49   :  { %v386_v23 = vsel %vm260_vm0, %v384_v21, %v382_v22  ;;  %v314_v45 = vsel %vm260_vm0, %v312_v44, %v310_v43  ;;  %483 = vst.msk [vmem:[%s784_s1 + $0x38] sm:$0xff] %vm262_vm1, %v323_v48  }
  0x4a   :  { %387 = vrot.lane.b32.xlu2 %v386_v23, %s492_s15  ;;  %482 = vst.msk [vmem:[%s784_s1 + $0x30] sm:$0xff] %vm262_vm1, %v314_v45  }
  0x84   :  { %v334_v42 = vpop.permute.xlu0 %333  }
  0x85   :  { %336 = vst.msk [vmem:[%s784_s1] sm:$0xff] %vm335_vm2, %v334_v42  }
  0x8c   :  { %v355_v49 = vpop.permute.xlu1 %354  }
  0x8d   :  { %485 = vst.msk [vmem:[%s784_s1 + $0x8] sm:$0xff] %vm335_vm2, %v355_v49  }
  0x94   :  { %v344_v50 = vpop.permute.xlu0 %343  }
  0x95   :  { %484 = vst.msk [vmem:[%s784_s1 + $0x20] sm:$0xff] %vm335_vm2, %v344_v50  }
  0x9c   :  { %v377_v51 = vpop.permute.xlu2 %376   ;;  %v366_v52 = vpop.permute.xlu1 %365  }
  0x9d   :  { %487 = vst.msk [vmem:[%s784_s1 + $0x10] sm:$0xff] %vm335_vm2, %v377_v51  }
  0x9e   :  { %486 = vst.msk [vmem:[%s784_s1 + $0x28] sm:$0xff] %vm335_vm2, %v366_v52  }
  0xa4   :  { %v399_v53 = vpop.permute.xlu0 %398   ;;  %v388_v54 = vpop.permute.xlu2 %387  }
  0xa5   :  { %489 = vst.msk [vmem:[%s784_s1 + $0x18] sm:$0xff] %vm335_vm2, %v399_v53  }
  0xa6   :  { %488 = vst.msk [vmem:[%s784_s1 + $0x30] sm:$0xff] %vm335_vm2, %v388_v54  }
  0xac   :  { %v410_v55 = vpop.permute.xlu1 %409  }
  0xad   :  { %490 = vst.msk [vmem:[%s784_s1 + $0x38] sm:$0xff] %vm335_vm2, %v410_v55  }

// kernel: kno2d_forward.11
= control target key start
LH: loop header
LB: loop body
LE: loop exit
PB: predicated region body
PF: predicated region fallthrough
CT: control target
= control target key end

     0   :  { %vm148_vm0 = vcmask 254976   ;;  %s1676_s0 = inlined_call_operand.vmem [shape: f32[8,2,32], index: 0, kind: input, shape index: {}]   ;;  %s1677_s1 = inlined_call_operand.vmem [shape: f32[8,2,32], index: 1, kind: input, shape index: {}]   ;;  %s1678_s2 = inlined_call_operand.vmem [shape: f32[8,8,32], index: 2, kind: input, shape index: {}]   ;;  %s1679_s4 = inlined_call_operand.vmem [shape: f32[8,8,32], index: 4, kind: input, shape index: {}]   ;;  %s1680_s3 = inlined_call_operand.vmem [shape: f32[8,8,32], index: 3, kind: input, shape index: {}]   ;;  %s1681_s5 = inlined_call_operand.vmem [shape: f32[8,2,32], index: 5, kind: output, shape index: {0}]   ;;  %s1682_s6 = inlined_call_operand.vmem [shape: f32[8,2,32], index: 6, kind: output, shape index: {1}]  }
   0x1   :  { %v825_v0 = vld [vmem:[%s1676_s0] sm:$0x3]  ;;  %v830_v1 = vld [vmem:[%s1676_s0 + $0x2] sm:$0x3]  ;;  %v835_v2 = vld [vmem:[%s1676_s0 + $0x4] sm:$0x3] }
   0x2   :  { %1749 = vst [vmem:[#allocation2_spill] sm:$0xff] %v825_v0  ;;  %v840_v3 = vld [vmem:[%s1676_s0 + $0x6] sm:$0x3]  ;;  %v845_v4 = vld [vmem:[%s1676_s0 + $0x8] sm:$0x3]  ;;  %v947_v26 = vld [vmem:[%s1678_s2 + $0x10] sm:$0xff] }
   0x3   :  { %1750 = vst [vmem:[#allocation3_spill] sm:$0xff] %v830_v1  ;;  %v850_v5 = vld [vmem:[%s1676_s0 + $0xa] sm:$0x3]  ;;  %v855_v6 = vld [vmem:[%s1676_s0 + $0xc] sm:$0x3]  ;;  %v929_v22 = vld [vmem:[%s1678_s2] sm:$0xff] }
   0x4   :  { %1751 = vst [vmem:[#allocation4_spill] sm:$0xff] %v835_v2  ;;  %v860_v7 = vld [vmem:[%s1676_s0 + $0xe] sm:$0x3]  ;;  %v865_v8 = vld [vmem:[%s1677_s1] sm:$0x3]  ;;  %v952_v27 = vld [vmem:[%s1678_s2 + $0x18] sm:$0xff] }
   0x5   :  { %1752 = vst [vmem:[#allocation5_spill] sm:$0xff] %v840_v3  ;;  %v870_v9 = vld [vmem:[%s1677_s1 + $0x2] sm:$0x3]  ;;  %v875_v10 = vld [vmem:[%s1677_s1 + $0x4] sm:$0x3]  ;;  %v899_v15 = vadd.f32 %v865_v8, %v825_v0  ;;  %v934_v23 = vld [vmem:[%s1678_s2 + $0x8] sm:$0xff] }
   0x6   :  { %v880_v11 = vld [vmem:[%s1677_s1 + $0x6] sm:$0x3]  ;;  %v885_v12 = vld [vmem:[%s1677_s1 + $0x8] sm:$0x3]  ;;  %v890_v13 = vld [vmem:[%s1677_s1 + $0xa] sm:$0x3]  ;;  %v903_v16 = vadd.f32 %v870_v9, %v830_v1  ;;  %v912_v18 = vadd.f32 %v875_v10, %v835_v2 }
   0x7   :  { %1753 = vst [vmem:[#allocation6_spill] sm:$0xff] %v880_v11  ;;  %v895_v14 = vld [vmem:[%s1677_s1 + $0xc] sm:$0x3]  ;;  %v908_v17 = vld [vmem:[%s1677_s1 + $0xe] sm:$0x3]  ;;  %v916_v19 = vadd.f32 %v880_v11, %v840_v3  ;;  %v920_v20 = vadd.f32 %v885_v12, %v845_v4  ;;  %v924_v21 = vadd.f32 %v890_v13, %v850_v5  ;;  %v957_v28 = vld [vmem:[%s1678_s2 + $0x20] sm:$0xff] }
   0x8   :  { %1754 = vst [vmem:[#allocation7_spill] sm:$0xff] %v885_v12  ;;  %v938_v24 = vadd.f32 %v895_v14, %v855_v6  ;;  %v942_v25 = vadd.f32 %v908_v17, %v860_v7  ;;  %v70_v29 = vperm.slane %v929_v22, 0  ;;  %v78_v30 = vperm.slane %v934_v23, 0  ;;  %v964_v31 = vld [vmem:[%s1678_s2 + $0x28] sm:$0xff]  ;;  %v969_v32 = vld [vmem:[%s1678_s2 + $0x30] sm:$0xff]  ;;  %v978_v37 = vld [vmem:[%s1679_s4] sm:$0xff] }
   0x9   :  { %1755 = vst [vmem:[#allocation8_spill] sm:$0xff] %v890_v13  ;;  %v88_v33 = vperm.slane %v947_v26, 0  ;;  %v98_v34 = vperm.slane %v952_v27, 0  ;;  %v108_v35 = vperm.slane %v957_v28, 0  ;;  %v983_v38 = vld [vmem:[%s1679_s4 + $0x8] sm:$0xff]  ;;  %v988_v39 = vld [vmem:[%s1679_s4 + $0x10] sm:$0xff] }
   0xa   :  { %1756 = vst [vmem:[#allocation9_spill] sm:$0xff] %v895_v14  ;;  %v71_v40 = vmul.f32 %v70_v29, %v899_v15  ;;  %v992_v41 = vmul.f32 %v78_v30, %v903_v16  ;;  %v118_v42 = vperm.slane %v964_v31, 0  ;;  %v128_v43 = vperm.slane %v969_v32, 0  ;;  %v999_v44 = vld [vmem:[%s1679_s4 + $0x18] sm:$0xff]  ;;  %v1004_v45 = vld [vmem:[%s1679_s4 + $0x20] sm:$0xff]  ;;  %v1009_v46 = vld [vmem:[%s1679_s4 + $0x28] sm:$0xff] }
   0xb   :  { %1757 = vst [vmem:[#allocation10_spill] sm:$0xff] %v908_v17  ;;  %v74_v47 = vperm.slane %v978_v37, 0  ;;  %v82_v48 = vperm.slane %v983_v38, 0  ;;  %v89_v49 = vmul.f32 %v88_v33, %v912_v18  ;;  %v92_v50 = vperm.slane %v988_v39, 0  ;;  %v1018_v51 = vld [vmem:[%s1679_s4 + $0x30] sm:$0xff]  ;;  %v1027_v56 = vld [vmem:[%s1678_s2 + $0x38] sm:$0xff] }
   0xc   :  { %1758 = vst [vmem:[#allocation11_spill] sm:$0xff] %v920_v20  ;;  %v99_v52 = vmul.f32 %v98_v34, %v916_v19  ;;  %v102_v53 = vperm.slane %v999_v44, 0  ;;  %v109_v54 = vmul.f32 %v108_v35, %v920_v20  ;;  %v112_v55 = vperm.slane %v1004_v45, 0  ;;  %v1036_v61 = vld [vmem:[%s1679_s4 + $0x38] sm:$0xff]  ;;  %v1045_v33 = vld [vmem:[%s1680_s3] sm:$0xff] }
   0xd   :  { %1759 = vst [vmem:[#allocation12_spill] sm:$0xff] %v924_v21  ;;  %v75_v57 = vmul.f32 %v74_v47, %v865_v8  ;;  %v83_v58 = vmul.f32 %v82_v48, %v870_v9  ;;  %v93_v59 = vmul.f32 %v92_v50, %v875_v10  ;;  %v119_v60 = vmul.f32 %v118_v42, %v924_v21  ;;  %v1052_v48 = vld [vmem:[%s1680_s3 + $0x8] sm:$0xff] }
   0xe   :  { %1760 = vst [vmem:[#allocation13_spill] sm:$0xff] %v938_v24  ;;  %v103_v62 = vmul.f32 %v102_v53, %v880_v11  ;;  %v113_v63 = vmul.f32 %v112_v55, %v885_v12  ;;  %v122_v29 = vperm.slane %v1009_v46, 0  ;;  %v129_v30 = vmul.f32 %v128_v43, %v938_v24  ;;  %v1057_v43 = vld [vmem:[%s1680_s3 + $0x10] sm:$0xff]  ;;  %v1066_v24 = vld [vmem:[%s1680_s3 + $0x18] sm:$0xff] }
   0xf   :  { %1761 = vst [vmem:[#allocation14_spill] sm:$0xff] %v942_v25  ;;  %v76_v34 = vsub.f32 %v71_v40, %v75_v57  ;;  %v84_v35 = vsub.f32 %v992_v41, %v83_v58  ;;  %v94_v42 = vsub.f32 %v89_v49, %v93_v59  ;;  %v132_v47 = vperm.slane %v1018_v51, 0 }
  0x10   :  { %1762 = vst [vmem:[#allocation15_spill] sm:$0xff] %v957_v28  ;;  %v104_v50 = vsub.f32 %v99_v52, %v103_v62  ;;  %v114_v53 = vsub.f32 %v109_v54, %v113_v63  ;;  %v123_v55 = vmul.f32 %v122_v29, %v890_v13  ;;  %v138_v57 = vperm.slane %v1027_v56, 0 }
  0x11   :  { %1763 = vst [vmem:[#allocation16_spill] sm:$0xff] %v964_v31  ;;  %v86_v58 = vadd.f32 %v84_v35, %v76_v34  ;;  %v133_v59 = vmul.f32 %v132_v47, %v895_v14  ;;  %v142_v36 = vperm.slane %v1036_v61, 0  ;;  %v72_v62 = vperm.slane %v1045_v33, 0  ;;  %v1078_v34 = vld [vmem:[%s1680_s3 + $0x28] sm:$0xff] }
  0x12   :  { %1764 = vst [vmem:[#allocation17_spill] sm:$0xff] %v969_v32  ;;  %v124_v63 = vsub.f32 %v119_v60, %v123_v55  ;;  %v139_v29 = vmul.f32 %v138_v57, %v942_v25  ;;  %v80_v35 = vperm.slane %v1052_v48, 0  ;;  %v90_v47 = vperm.slane %v1057_v43, 0  ;;  %v1087_v55 = vld [vmem:[%s1680_s3 + $0x30] sm:$0xff]  ;;  %v1092_v57 = vld [vmem:[%s1680_s3 + $0x38] sm:$0xff] }
  0x13   :  { %1765 = vst [vmem:[#allocation18_spill] sm:$0xff] %v1004_v45  ;;  %v96_v14 = vadd.f32 %v94_v42, %v86_v58  ;;  %v73_v13 = vmul.f32 %v72_v62, %v825_v0  ;;  %v100_v58 = vperm.slane %v1066_v24, 0 }
  0x14   :  { %1766 = vst [vmem:[#allocation19_spill] sm:$0xff] %v1009_v46  ;;  %v91_v42 = vmul.f32 %v90_v47, %v835_v2  ;;  %v130_v47 = vperm.slane %v1087_v55, 0  ;;  %v140_v2 = vperm.slane %v1092_v57, 0 }
  0x15   :  { %1767 = vst [vmem:[#allocation20_spill] sm:$0xff] %v1018_v51  ;;  %v1071_v51 = vld [vmem:[%s1680_s3 + $0x20] sm:$0xff]  ;;  %v77_v0 = vadd.f32 %v73_v13, %v71_v40  ;;  %v1776_v13 = vperm.slane %v929_v22, 1 }
  0x16   :  { %1768 = vst [vmem:[#allocation21_spill] sm:$0xff] %v1027_v56  ;;  %v143_v56 = vmul.f32 %v142_v36, %v908_v17  ;;  %v110_v36 = vperm.slane %v1071_v51, 0  ;;  %v95_v25 = vadd.f32 %v91_v42, %v89_v49  ;;  %v159_v42 = vperm.slane %v934_v23, 1 }
  0x17   :  { %1769 = vst [vmem:[#allocation22_spill] sm:$0xff] %v1036_v61  ;;  %v134_v61 = vsub.f32 %v129_v30, %v133_v59  ;;  %v106_v59 = vadd.f32 %v104_v50, %v96_v14  ;;  %v1108_v40 = vmul.f32 %v1776_v13, %v899_v15  ;;  %v141_v50 = vmul.f32 %v140_v2, %v860_v7 }
  0x18   :  { %1770 = vst [vmem:[#allocation23_spill] sm:$0xff] %v1045_v33  ;;  %v144_v62 = vsub.f32 %v139_v29, %v143_v56  ;;  %v101_v33 = vmul.f32 %v100_v58, %v840_v3  ;;  %v111_v32 = vmul.f32 %v110_v36, %v845_v4  ;;  %v179_v58 = vperm.slane %v952_v27, 1 }
  0x19   :  { %1771 = vst [vmem:[#allocation24_spill] sm:$0xff] %v1052_v48  ;;  %v81_v48 = vmul.f32 %v80_v35, %v830_v1  ;;  %v116_v21 = vadd.f32 %v114_v53, %v106_v59 }
  0x1a   :  { %1772 = vst [vmem:[#allocation25_spill] sm:$0xff] %v1057_v43  ;;  %v120_v43 = vperm.slane %v1078_v34, 0  ;;  %v105_v14 = vadd.f32 %v101_v33, %v99_v52  ;;  %v115_v56 = vadd.f32 %v111_v32, %v109_v54  ;;  %v145_v52 = vadd.f32 %v141_v50, %v139_v29 }
  0x1b   :  { %1773 = vst [vmem:[#allocation26_spill] sm:$0xff] %v1066_v24  ;;  %v85_v17 = vadd.f32 %v81_v48, %v992_v41  ;;  %v126_v41 = vadd.f32 %v124_v63, %v116_v21  ;;  %v131_v48 = vmul.f32 %v130_v47, %v855_v6  ;;  %v169_v54 = vperm.slane %v947_v26, 1 }
  0x1c   :  { %1774 = vst [vmem:[#allocation27_spill] sm:$0xff] %v1071_v51  ;;  %v121_v35 = vmul.f32 %v120_v43, %v850_v5  ;;  %v155_v43 = vperm.slane %v978_v37, 1  ;;  %v183_v29 = vperm.slane %v999_v44, 1  ;;  %v193_v47 = vperm.slane %v1004_v45, 1 }
  0x1d   :  { %1775 = vst [vmem:[#allocation28_spill] sm:$0xff] %v1078_v34  ;;  %v87_v51 = vadd.f32 %v85_v17, %v77_v0  ;;  %v163_v0 = vperm.slane %v983_v38, 1  ;;  %v136_v17 = vadd.f32 %v134_v61, %v126_v41  ;;  %v135_v32 = vadd.f32 %v131_v48, %v129_v30 }
  0x1e   :  { %v125_v49 = vadd.f32 %v121_v35, %v119_v60  ;;  %v156_v21 = vmul.f32 %v155_v43, %v865_v8  ;;  %v160_v60 = vmul.f32 %v159_v42, %v903_v16  ;;  %v189_v35 = vperm.slane %v957_v28, 1 }
  0x1f   :  { %v97_v53 = vadd.f32 %v95_v25, %v87_v51  ;;  %v164_v63 = vmul.f32 %v163_v0, %v870_v9  ;;  %v146_v2 = vadd.f32 %v144_v62, %v136_v17  ;;  %v170_v25 = vmul.f32 %v169_v54, %v912_v18  ;;  %v1777_v17 = vld [vmem:[#allocation12_spill] sm:$0xff] }
  0x20   :  { %v173_v51 = vperm.slane %v988_v39, 1  ;;  %v157_v61 = vsub.f32 %v1108_v40, %v156_v21  ;;  %v180_v62 = vmul.f32 %v179_v58, %v916_v19  ;;  %v184_v13 = vmul.f32 %v183_v29, %v880_v11  ;;  %v1780_v58 = vld [vmem:[#allocation20_spill] sm:$0xff] }
  0x21   :  { %v107_v33 = vadd.f32 %v105_v14, %v97_v53  ;;  %v165_v30 = vsub.f32 %v160_v60, %v164_v63  ;;  %149 = vst.msk [vmem:[%s1681_s5] sm:$0x3] %vm148_vm0, %v146_v2  ;;  %v199_v41 = vperm.slane %v964_v31, 1  ;;  %v190_v50 = vmul.f32 %v189_v35, %v920_v20  ;;  %v1779_v2 = vld [vmem:[#allocation8_spill] sm:$0xff] }
  0x22   :  { %v174_v59 = vmul.f32 %v173_v51, %v875_v10  ;;  %v194_v53 = vmul.f32 %v193_v47, %v885_v12  ;;  %v203_v43 = vperm.slane %v1009_v46, 1  ;;  %v185_v0 = vsub.f32 %v180_v62, %v184_v13  ;;  %v1783_v47 = vld [vmem:[#allocation22_spill] sm:$0xff] }
  0x23   :  { %v117_v36 = vadd.f32 %v115_v56, %v107_v33  ;;  %v167_v56 = vadd.f32 %v165_v30, %v157_v61  ;;  %v200_v54 = vmul.f32 %v199_v41, %v1777_v17  ;;  %v1778_v33 = vld [vmem:[#allocation17_spill] sm:$0xff]  ;;  %v223_v12 = vperm.slane %v1783_v47, 1  ;;  %v1785_v41 = vld [vmem:[#allocation23_spill] sm:$0xff] }
  0x24   :  { %v175_v48 = vsub.f32 %v170_v25, %v174_v59  ;;  %v209_v21 = vperm.slane %v1778_v33, 1  ;;  %v204_v51 = vmul.f32 %v203_v43, %v1779_v2  ;;  %v1781_v30 = vld [vmem:[#allocation13_spill] sm:$0xff]  ;;  %v153_v17 = vperm.slane %v1785_v41, 1  ;;  %v1788_v43 = vld [vmem:[#allocation24_spill] sm:$0xff] }
  0x25   :  { %v127_v14 = vadd.f32 %v125_v49, %v117_v36  ;;  %v195_v49 = vsub.f32 %v190_v50, %v194_v53  ;;  %v213_v36 = vperm.slane %v1780_v58, 1  ;;  %v1782_v59 = vld [vmem:[#allocation21_spill] sm:$0xff] }
  0x26   :  { %v177_v63 = vadd.f32 %v175_v48, %v167_v56  ;;  %v210_v29 = vmul.f32 %v209_v21, %v1781_v30  ;;  %v219_v35 = vperm.slane %v1782_v59, 1  ;;  %v1786_v56 = vld [vmem:[#allocation14_spill] sm:$0xff]  ;;  %v1789_v21 = vld [vmem:[#allocation25_spill] sm:$0xff]  ;;  %v1791_v59 = vld [vmem:[#allocation4_spill] sm:$0xff] }
  0x27   :  { %v137_v42 = vadd.f32 %v135_v32, %v127_v14  ;;  %v205_v32 = vsub.f32 %v200_v54, %v204_v51  ;;  %v1784_v14 = vld [vmem:[#allocation9_spill] sm:$0xff]  ;;  %v171_v30 = vperm.slane %v1789_v21, 1  ;;  %v201_v21 = vperm.slane %v1078_v34, 1 }
  0x28   :  { %v187_v46 = vadd.f32 %v185_v0, %v177_v63  ;;  %v214_v13 = vmul.f32 %v213_v36, %v1784_v14  ;;  %v220_v48 = vmul.f32 %v219_v35, %v1786_v56  ;;  %v1790_v63 = vld [vmem:[#allocation2_spill] sm:$0xff]  ;;  %v181_v36 = vperm.slane %v1066_v24, 1 }
  0x29   :  { %v147_v61 = vadd.f32 %v145_v52, %v137_v42  ;;  %v1787_v52 = vld [vmem:[#allocation10_spill] sm:$0xff]  ;;  %v161_v42 = vperm.slane %v1788_v43, 1  ;;  %v154_v51 = vmul.f32 %v153_v17, %v1790_v63  ;;  %v172_v58 = vmul.f32 %v171_v30, %v1791_v59 }
  0x2a   :  { %v224_v53 = vmul.f32 %v223_v12, %v1787_v52  ;;  %v197_v47 = vadd.f32 %v195_v49, %v187_v46  ;;  %v215_v0 = vsub.f32 %v210_v29, %v214_v13  ;;  %v182_v43 = vmul.f32 %v181_v36, %v840_v3 }
  0x2b   :  { %150 = vst.msk [vmem:[%s1682_s6] sm:$0x3] %vm148_vm0, %v147_v61  ;;  %v162_v14 = vmul.f32 %v161_v42, %v830_v1  ;;  %v1792_v61 = vld [vmem:[#allocation27_spill] sm:$0xff]  ;;  %v158_v12 = vadd.f32 %v154_v51, %v1108_v40  ;;  %v176_v49 = vadd.f32 %v172_v58, %v170_v25  ;;  %v211_v13 = vperm.slane %v1087_v55, 1 }
  0x2c   :  { %v225_v41 = vsub.f32 %v220_v48, %v224_v53  ;;  %v191_v33 = vperm.slane %v1792_v61, 1  ;;  %v207_v35 = vadd.f32 %v205_v32, %v197_v47  ;;  %v186_v63 = vadd.f32 %v182_v43, %v180_v62 }
  0x2d   :  { %v166_v46 = vadd.f32 %v162_v14, %v160_v60  ;;  %v202_v42 = vmul.f32 %v201_v21, %v850_v5  ;;  %v221_v30 = vperm.slane %v1092_v57, 1  ;;  %v212_v40 = vmul.f32 %v211_v13, %v855_v6 }
  0x2e   :  { %v192_v17 = vmul.f32 %v191_v33, %v845_v4  ;;  %v217_v53 = vadd.f32 %v215_v0, %v207_v35  ;;  %v233_v32 = vperm.slane %v929_v22, 2  ;;  %v237_v25 = vperm.slane %v978_v37, 2 }
  0x2f   :  { %v168_v59 = vadd.f32 %v166_v46, %v158_v12  ;;  %v206_v36 = vadd.f32 %v202_v42, %v200_v54  ;;  %v222_v60 = vmul.f32 %v221_v30, %v860_v7  ;;  %v216_v58 = vadd.f32 %v212_v40, %v210_v29 }
  0x30   :  { %v196_v47 = vadd.f32 %v192_v17, %v190_v50  ;;  %v227_v51 = vadd.f32 %v225_v41, %v217_v53  ;;  %v234_v62 = vmul.f32 %v233_v32, %v899_v15  ;;  %v241_v14 = vperm.slane %v934_v23, 2 }
  0x31   :  { %v178_v33 = vadd.f32 %v176_v49, %v168_v59  ;;  %v226_v50 = vadd.f32 %v222_v60, %v220_v48  ;;  %v238_v43 = vmul.f32 %v237_v25, %v865_v8  ;;  %v245_v54 = vperm.slane %v983_v38, 2  ;;  %v1793_v25 = vld [vmem:[#allocation19_spill] sm:$0xff] }
  0x32   :  { %733 = vst.msk [vmem:[%s1681_s5 + $0x2] sm:$0x3] %vm148_vm0, %v227_v51  ;;  %v251_v41 = vperm.slane %v947_v26, 2  ;;  %v242_v59 = vmul.f32 %v241_v14, %v903_v16  ;;  %v255_v29 = vperm.slane %v988_v39, 2  ;;  %v261_v0 = vperm.slane %v952_v27, 2 }
  0x33   :  { %v188_v21 = vadd.f32 %v186_v63, %v178_v33  ;;  %v239_v35 = vsub.f32 %v234_v62, %v238_v43  ;;  %v246_v12 = vmul.f32 %v245_v54, %v870_v9  ;;  %v265_v48 = vperm.slane %v999_v44, 2  ;;  %v1794_v43 = vld [vmem:[#allocation7_spill] sm:$0xff] }
  0x34   :  { %v252_v46 = vmul.f32 %v251_v41, %v912_v18  ;;  %v256_v17 = vmul.f32 %v255_v29, %v875_v10  ;;  %v262_v13 = vmul.f32 %v261_v0, %v916_v19  ;;  %v271_v63 = vperm.slane %v957_v28, 2  ;;  %v1795_v41 = vld [vmem:[#allocation12_spill] sm:$0xff] }
  0x35   :  { %v198_v49 = vadd.f32 %v196_v47, %v188_v21  ;;  %v247_v53 = vsub.f32 %v242_v59, %v246_v12  ;;  %v266_v42 = vmul.f32 %v265_v48, %v880_v11  ;;  %v275_v30 = vperm.slane %v1004_v45, 2  ;;  %v1796_v12 = vld [vmem:[#allocation17_spill] sm:$0xff]  ;;  %v1797_v11 = vld [vmem:[#allocation20_spill] sm:$0xff] }
  0x36   :  { %v281_v40 = vperm.slane %v964_v31, 2  ;;  %v257_v51 = vsub.f32 %v252_v46, %v256_v17  ;;  %v272_v60 = vmul.f32 %v271_v63, %v920_v20  ;;  %v285_v33 = vperm.slane %v1793_v25, 2  ;;  %v1799_v63 = vld [vmem:[#allocation22_spill] sm:$0xff] }
  0x37   :  { %v208_v32 = vadd.f32 %v206_v36, %v198_v49  ;;  %v249_v47 = vadd.f32 %v247_v53, %v239_v35  ;;  %v267_v14 = vsub.f32 %v262_v13, %v266_v42  ;;  %v276_v54 = vmul.f32 %v275_v30, %v1794_v43  ;;  %v1798_v49 = vld [vmem:[#allocation21_spill] sm:$0xff] }
  0x38   :  { %v282_v21 = vmul.f32 %v281_v40, %v1795_v41  ;;  %v286_v0 = vmul.f32 %v285_v33, %v1779_v2  ;;  %v291_v48 = vperm.slane %v1796_v12, 2  ;;  %v295_v45 = vperm.slane %v1797_v11, 2  ;;  %v1800_v53 = vld [vmem:[#allocation13_spill] sm:$0xff]  ;;  %v1802_v33 = vld [vmem:[#allocation23_spill] sm:$0xff] }
  0x39   :  { %v218_v29 = vadd.f32 %v216_v58, %v208_v32  ;;  %v259_v31 = vadd.f32 %v257_v51, %v249_v47  ;;  %v277_v36 = vsub.f32 %v272_v60, %v276_v54  ;;  %v301_v17 = vperm.slane %v1798_v49, 2  ;;  %v1801_v30 = vld [vmem:[#allocation9_spill] sm:$0xff]  ;;  %v1803_v47 = vld [vmem:[#allocation24_spill] sm:$0xff] }
  0x3a   :  { %v305_v20 = vperm.slane %v1799_v63, 2  ;;  %v287_v35 = vsub.f32 %v282_v21, %v286_v0  ;;  %v292_v42 = vmul.f32 %v291_v48, %v1800_v53  ;;  %v296_v43 = vmul.f32 %v295_v45, %v1801_v30  ;;  %v1804_v54 = vld [vmem:[#allocation25_spill] sm:$0xff] }
  0x3b   :  { %v228_v25 = vadd.f32 %v226_v50, %v218_v29  ;;  %v269_v40 = vadd.f32 %v267_v14, %v259_v31  ;;  %v302_v58 = vmul.f32 %v301_v17, %v1786_v56  ;;  %v235_v2 = vperm.slane %v1802_v33, 2  ;;  %v1805_v14 = vld [vmem:[#allocation2_spill] sm:$0xff] }
  0x3c   :  { %v306_v32 = vmul.f32 %v305_v20, %v1787_v52  ;;  %v297_v51 = vsub.f32 %v292_v42, %v296_v43  ;;  %v243_v50 = vperm.slane %v1803_v47, 2  ;;  %v253_v29 = vperm.slane %v1804_v54, 2  ;;  %v1806_v52 = vld [vmem:[#allocation4_spill] sm:$0xff] }
  0x3d   :  { %734 = vst.msk [vmem:[%s1682_s6 + $0x2] sm:$0x3] %vm148_vm0, %v228_v25  ;;  %v263_v0 = vperm.slane %v1066_v24, 2  ;;  %v279_v45 = vadd.f32 %v277_v36, %v269_v40  ;;  %v236_v48 = vmul.f32 %v235_v2, %v1805_v14  ;;  %v273_v20 = vperm.slane %v1792_v61, 2 }
  0x3e   :  { %v307_v31 = vsub.f32 %v302_v58, %v306_v32  ;;  %v244_v17 = vmul.f32 %v243_v50, %v830_v1  ;;  %v254_v56 = vmul.f32 %v253_v29, %v1806_v52  ;;  %v283_v25 = vperm.slane %v1078_v34, 2 }
  0x3f   :  { %v264_v33 = vmul.f32 %v263_v0, %v840_v3  ;;  %v289_v43 = vadd.f32 %v287_v35, %v279_v45  ;;  %v240_v47 = vadd.f32 %v236_v48, %v234_v62  ;;  %v274_v54 = vmul.f32 %v273_v20, %v845_v4 }
  0x40   :  { %v293_v24 = vperm.slane %v1087_v55, 2  ;;  %v248_v36 = vadd.f32 %v244_v17, %v242_v59  ;;  %v258_v40 = vadd.f32 %v254_v56, %v252_v46  ;;  %v284_v2 = vmul.f32 %v283_v25, %v850_v5 }
  0x41   :  { %v268_v32 = vadd.f32 %v264_v33, %v262_v13  ;;  %v299_v61 = vadd.f32 %v297_v51, %v289_v43  ;;  %v278_v14 = vadd.f32 %v274_v54, %v272_v60  ;;  %v303_v29 = vperm.slane %v1092_v57, 2 }
  0x42   :  { %v294_v50 = vmul.f32 %v293_v24, %v855_v6  ;;  %v250_v0 = vadd.f32 %v248_v36, %v240_v47  ;;  %v288_v3 = vadd.f32 %v284_v2, %v282_v21  ;;  %v315_v35 = vperm.slane %v929_v22, 3  ;;  %v1807_v2 = vld [vmem:[#allocation18_spill] sm:$0xff] }
  0x43   :  { %v319_v62 = vperm.slane %v978_v37, 3  ;;  %v309_v45 = vadd.f32 %v307_v31, %v299_v61  ;;  %v304_v59 = vmul.f32 %v303_v29, %v860_v7  ;;  %v323_v56 = vperm.slane %v934_v23, 3  ;;  %v1808_v29 = vld [vmem:[#allocation6_spill] sm:$0xff] }
  0x44   :  { %v298_v48 = vadd.f32 %v294_v50, %v292_v42  ;;  %v260_v46 = vadd.f32 %v258_v40, %v250_v0  ;;  %v316_v13 = vmul.f32 %v315_v35, %v899_v15  ;;  %v327_v24 = vperm.slane %v983_v38, 3  ;;  %v1809_v35 = vld [vmem:[#allocation11_spill] sm:$0xff] }
  0x45   :  { %v320_v60 = vmul.f32 %v319_v62, %v865_v8  ;;  %735 = vst.msk [vmem:[%s1681_s5 + $0x4] sm:$0x3] %vm148_vm0, %v309_v45  ;;  %v308_v21 = vadd.f32 %v304_v59, %v302_v58  ;;  %v324_v61 = vmul.f32 %v323_v56, %v903_v16  ;;  %v333_v42 = vperm.slane %v947_v26, 3  ;;  %v1810_v45 = vld [vmem:[#allocation16_spill] sm:$0xff] }
  0x46   :  { %v337_v33 = vperm.slane %v988_v39, 3  ;;  %v270_v51 = vadd.f32 %v268_v32, %v260_v46  ;;  %v328_v54 = vmul.f32 %v327_v24, %v870_v9  ;;  %v343_v31 = vperm.slane %v952_v27, 3 }
  0x47   :  { %v321_v47 = vsub.f32 %v316_v13, %v320_v60  ;;  %v334_v20 = vmul.f32 %v333_v42, %v912_v18  ;;  %v347_v25 = vperm.slane %v999_v44, 3  ;;  %v353_v58 = vperm.slane %v957_v28, 3  ;;  %v1811_v60 = vld [vmem:[#allocation7_spill] sm:$0xff] }
  0x48   :  { %v338_v17 = vmul.f32 %v337_v33, %v875_v10  ;;  %v280_v43 = vadd.f32 %v278_v14, %v270_v51  ;;  %v329_v36 = vsub.f32 %v324_v61, %v328_v54  ;;  %v344_v40 = vmul.f32 %v343_v31, %v916_v19  ;;  %v1812_v42 = vld [vmem:[#allocation19_spill] sm:$0xff] }
  0x49   :  { %v357_v50 = vperm.slane %v1807_v2, 3  ;;  %v348_v0 = vmul.f32 %v347_v25, %v1808_v29  ;;  %v354_v62 = vmul.f32 %v353_v58, %v1809_v35  ;;  %v363_v59 = vperm.slane %v1810_v45, 3  ;;  %v1813_v2 = vld [vmem:[#allocation8_spill] sm:$0xff] }
  0x4a   :  { %v339_v32 = vsub.f32 %v334_v20, %v338_v17  ;;  %v290_v56 = vadd.f32 %v288_v3, %v280_v43  ;;  %v331_v46 = vadd.f32 %v329_v36, %v321_v47  ;;  %v367_v33 = vperm.slane %v1812_v42, 3 }
  0x4b   :  { %v358_v24 = vmul.f32 %v357_v50, %v1811_v60  ;;  %v349_v28 = vsub.f32 %v344_v40, %v348_v0  ;;  %v364_v14 = vmul.f32 %v363_v59, %v1795_v41  ;;  %v373_v51 = vperm.slane %v1796_v12, 3  ;;  %v1814_v59 = vld [vmem:[#allocation23_spill] sm:$0xff] }
  0x4c   :  { %v377_v54 = vperm.slane %v1797_v11, 3  ;;  %v300_v31 = vadd.f32 %v298_v48, %v290_v56  ;;  %v341_v17 = vadd.f32 %v339_v32, %v331_v46  ;;  %v368_v58 = vmul.f32 %v367_v33, %v1813_v2  ;;  %v1815_v11 = vld [vmem:[#allocation14_spill] sm:$0xff]  ;;  %v1817_v46 = vld [vmem:[#allocation24_spill] sm:$0xff] }
  0x4d   :  { %v359_v25 = vsub.f32 %v354_v62, %v358_v24  ;;  %v374_v35 = vmul.f32 %v373_v51, %v1800_v53  ;;  %v383_v47 = vperm.slane %v1798_v49, 3  ;;  %v387_v43 = vperm.slane %v1799_v63, 3  ;;  %v1816_v32 = vld [vmem:[#allocation10_spill] sm:$0xff] }
  0x4e   :  { %v378_v3 = vmul.f32 %v377_v54, %v1801_v30  ;;  %v310_v36 = vadd.f32 %v308_v21, %v300_v31  ;;  %v351_v50 = vadd.f32 %v349_v28, %v341_v17  ;;  %v369_v0 = vsub.f32 %v364_v14, %v368_v58  ;;  %v1818_v51 = vld [vmem:[#allocation2_spill] sm:$0xff]  ;;  %v1819_v21 = vld [vmem:[#allocation25_spill] sm:$0xff] }
  0x4f   :  { %v317_v12 = vperm.slane %v1814_v59, 3  ;;  %v384_v48 = vmul.f32 %v383_v47, %v1815_v11  ;;  %v388_v56 = vmul.f32 %v387_v43, %v1816_v32  ;;  %v325_v24 = vperm.slane %v1817_v46, 3  ;;  %v1820_v31 = vld [vmem:[#allocation26_spill] sm:$0xff]  ;;  %v1821_v47 = vld [vmem:[#allocation27_spill] sm:$0xff]  ;;  %v1822_v30 = vld [vmem:[#allocation5_spill] sm:$0xff] }
  0x50   :  { %v379_v42 = vsub.f32 %v374_v35, %v378_v3  ;;  %736 = vst.msk [vmem:[%s1682_s6 + $0x4] sm:$0x3] %vm148_vm0, %v310_v36  ;;  %v361_v33 = vadd.f32 %v359_v25, %v351_v50  ;;  %v335_v28 = vperm.slane %v1819_v21, 3  ;;  %v345_v17 = vperm.slane %v1820_v31, 3 }
  0x51   :  { %v318_v54 = vmul.f32 %v317_v12, %v1818_v51  ;;  %v389_v58 = vsub.f32 %v384_v48, %v388_v56  ;;  %v326_v3 = vmul.f32 %v325_v24, %v830_v1  ;;  %v355_v59 = vperm.slane %v1821_v47, 3 }
  0x52   :  { %v365_v43 = vperm.slane %v1078_v34, 3  ;;  %v371_v46 = vadd.f32 %v369_v0, %v361_v33  ;;  %v336_v11 = vmul.f32 %v335_v28, %v1806_v52  ;;  %v346_v36 = vmul.f32 %v345_v17, %v1822_v30 }
  0x53   :  { %v322_v32 = vadd.f32 %v318_v54, %v316_v13  ;;  %v330_v25 = vadd.f32 %v326_v3, %v324_v61  ;;  %v356_v12 = vmul.f32 %v355_v59, %v845_v4  ;;  %v375_v31 = vperm.slane %v1087_v55, 3 }
  0x54   :  { %v366_v50 = vmul.f32 %v365_v43, %v850_v5  ;;  %v381_v56 = vadd.f32 %v379_v42, %v371_v46  ;;  %v340_v51 = vadd.f32 %v336_v11, %v334_v20  ;;  %v350_v24 = vadd.f32 %v346_v36, %v344_v40  ;;  %v1823_v36 = vld [vmem:[#allocation15_spill] sm:$0xff] }
  0x55   :  { %v385_v1 = vperm.slane %v1092_v57, 3  ;;  %v332_v47 = vadd.f32 %v330_v25, %v322_v32  ;;  %v360_v34 = vadd.f32 %v356_v12, %v354_v62  ;;  %v376_v13 = vmul.f32 %v375_v31, %v855_v6 }
  0x56   :  { %v370_v0 = vadd.f32 %v366_v50, %v364_v14  ;;  %v391_v33 = vadd.f32 %v389_v58, %v381_v56  ;;  %v397_v61 = vperm.slane %v929_v22, 4  ;;  %v401_v59 = vperm.slane %v978_v37, 4  ;;  %v1824_v56 = vld [vmem:[#allocation18_spill] sm:$0xff] }
  0x57   :  { %v386_v54 = vmul.f32 %v385_v1, %v860_v7  ;;  %v342_v28 = vadd.f32 %v340_v51, %v332_v47  ;;  %v380_v17 = vadd.f32 %v376_v13, %v374_v35  ;;  %v405_v42 = vperm.slane %v934_v23, 4 }
  0x58   :  { %v409_v11 = vperm.slane %v983_v38, 4  ;;  %737 = vst.msk [vmem:[%s1681_s5 + $0x6] sm:$0x3] %vm148_vm0, %v391_v33  ;;  %v398_v40 = vmul.f32 %v397_v61, %v899_v15  ;;  %v402_v1 = vmul.f32 %v401_v59, %v865_v8  ;;  %v415_v62 = vperm.slane %v947_v26, 4  ;;  %v1825_v59 = vld [vmem:[#allocation11_spill] sm:$0xff] }
  0x59   :  { %v390_v20 = vadd.f32 %v386_v54, %v384_v48  ;;  %v352_v14 = vadd.f32 %v350_v24, %v342_v28  ;;  %v406_v32 = vmul.f32 %v405_v42, %v903_v16  ;;  %v419_v46 = vperm.slane %v988_v39, 4 }
  0x5a   :  { %v410_v35 = vmul.f32 %v409_v11, %v870_v9  ;;  %v403_v51 = vsub.f32 %v398_v40, %v402_v1  ;;  %v416_v31 = vmul.f32 %v415_v62, %v912_v18  ;;  %v425_v58 = vperm.slane %v952_v27, 4  ;;  %v1826_v1 = vld [vmem:[#allocation19_spill] sm:$0xff] }
  0x5b   :  { %v429_v48 = vperm.slane %v999_v44, 4  ;;  %v362_v3 = vadd.f32 %v360_v34, %v352_v14  ;;  %v420_v43 = vmul.f32 %v419_v46, %v875_v10  ;;  %v435_v25 = vperm.slane %v1823_v36, 4  ;;  %v1827_v46 = vld [vmem:[#allocation17_spill] sm:$0xff] }
  0x5c   :  { %v411_v47 = vsub.f32 %v406_v32, %v410_v35  ;;  %v426_v12 = vmul.f32 %v425_v58, %v916_v19  ;;  %v439_v24 = vperm.slane %v1824_v56, 4  ;;  %v445_v13 = vperm.slane %v1810_v45, 4 }
  0x5d   :  { %v430_v50 = vmul.f32 %v429_v48, %v1808_v29  ;;  %v372_v33 = vadd.f32 %v370_v0, %v362_v3  ;;  %v421_v61 = vsub.f32 %v416_v31, %v420_v43  ;;  %v436_v28 = vmul.f32 %v435_v25, %v1825_v59  ;;  %v1828_v48 = vld [vmem:[#allocation20_spill] sm:$0xff] }
  0x5e   :  { %v413_v54 = vadd.f32 %v411_v47, %v403_v51  ;;  %v440_v34 = vmul.f32 %v439_v24, %v1811_v60  ;;  %v446_v11 = vmul.f32 %v445_v13, %v1795_v41  ;;  %v449_v62 = vperm.slane %v1826_v1, 4 }
  0x5f   :  { %v431_v42 = vsub.f32 %v426_v12, %v430_v50  ;;  %v382_v14 = vadd.f32 %v380_v17, %v372_v33  ;;  %v455_v58 = vperm.slane %v1827_v46, 4  ;;  %v459_v29 = vperm.slane %v1828_v48, 4  ;;  %v1829_v50 = vld [vmem:[#allocation9_spill] sm:$0xff]  ;;  %v1830_v17 = vld [vmem:[#allocation14_spill] sm:$0xff]  ;;  %v1832_v46 = vld [vmem:[#allocation23_spill] sm:$0xff] }
  0x60   :  { %v423_v35 = vadd.f32 %v421_v61, %v413_v54  ;;  %v441_v56 = vsub.f32 %v436_v28, %v440_v34  ;;  %v450_v0 = vmul.f32 %v449_v62, %v1813_v2  ;;  %v465_v51 = vperm.slane %v1798_v49, 4  ;;  %v1831_v54 = vld [vmem:[#allocation10_spill] sm:$0xff] }
  0x61   :  { %v469_v3 = vperm.slane %v1799_v63, 4  ;;  %v392_v47 = vadd.f32 %v390_v20, %v382_v14  ;;  %v456_v25 = vmul.f32 %v455_v58, %v1800_v53  ;;  %v460_v24 = vmul.f32 %v459_v29, %v1829_v50  ;;  %v1833_v20 = vld [vmem:[#allocation24_spill] sm:$0xff]  ;;  %v1834_v29 = vld [vmem:[#allocation2_spill] sm:$0xff] }
  0x62   :  { %v433_v43 = vadd.f32 %v431_v42, %v423_v35  ;;  %v451_v13 = vsub.f32 %v446_v11, %v450_v0  ;;  %v466_v33 = vmul.f32 %v465_v51, %v1830_v17  ;;  %v399_v48 = vperm.slane %v1832_v46, 4  ;;  %v1835_v0 = vld [vmem:[#allocation26_spill] sm:$0xff]  ;;  %v1836_v17 = vld [vmem:[#allocation27_spill] sm:$0xff]  ;;  %v1838_v50 = vld [vmem:[#allocation28_spill] sm:$0xff] }
  0x63   :  { %v470_v61 = vmul.f32 %v469_v3, %v1831_v54  ;;  %738 = vst.msk [vmem:[%s1682_s6 + $0x6] sm:$0x3] %vm148_vm0, %v392_v47  ;;  %v461_v62 = vsub.f32 %v456_v25, %v460_v24  ;;  %v407_v42 = vperm.slane %v1833_v20, 4  ;;  %v417_v14 = vperm.slane %v1819_v21, 4  ;;  %v1837_v46 = vld [vmem:[#allocation3_spill] sm:$0xff] }
  0x64   :  { %v443_v34 = vadd.f32 %v441_v56, %v433_v43  ;;  %v400_v58 = vmul.f32 %v399_v48, %v1834_v29  ;;  %v427_v51 = vperm.slane %v1835_v0, 4  ;;  %v437_v3 = vperm.slane %v1836_v17, 4 }
  0x65   :  { %v471_v35 = vsub.f32 %v466_v33, %v470_v61  ;;  %v408_v63 = vmul.f32 %v407_v42, %v1837_v46  ;;  %v418_v49 = vmul.f32 %v417_v14, %v1806_v52  ;;  %v447_v47 = vperm.slane %v1838_v50, 4 }
  0x66   :  { %v453_v54 = vadd.f32 %v451_v13, %v443_v34  ;;  %v404_v56 = vadd.f32 %v400_v58, %v398_v40  ;;  %v428_v43 = vmul.f32 %v427_v51, %v1822_v30  ;;  %v438_v24 = vmul.f32 %v437_v3, %v845_v4 }
  0x67   :  { %v457_v61 = vperm.slane %v1087_v55, 4  ;;  %v412_v48 = vadd.f32 %v408_v63, %v406_v32  ;;  %v422_v29 = vadd.f32 %v418_v49, %v416_v31  ;;  %v448_v0 = vmul.f32 %v447_v47, %v850_v5 }
  0x68   :  { %v463_v21 = vadd.f32 %v461_v62, %v453_v54  ;;  %v432_v17 = vadd.f32 %v428_v43, %v426_v12  ;;  %v442_v13 = vadd.f32 %v438_v24, %v436_v28  ;;  %v467_v42 = vperm.slane %v1092_v57, 4  ;;  %v1839_v43 = vld [vmem:[#allocation18_spill] sm:$0xff] }
  0x69   :  { %v458_v34 = vmul.f32 %v457_v61, %v855_v6  ;;  %v414_v52 = vadd.f32 %v412_v48, %v404_v56  ;;  %v452_v40 = vadd.f32 %v448_v0, %v446_v11  ;;  %v479_v58 = vperm.slane %v929_v22, 5  ;;  %v1840_v61 = vld [vmem:[#allocation6_spill] sm:$0xff] }
  0x6a   :  { %v473_v14 = vadd.f32 %v471_v35, %v463_v21  ;;  %v468_v3 = vmul.f32 %v467_v42, %v860_v7  ;;  %v483_v54 = vperm.slane %v978_v37, 5  ;;  %v487_v49 = vperm.slane %v934_v23, 5 }
  0x6b   :  { %v462_v51 = vadd.f32 %v458_v34, %v456_v25  ;;  %v424_v6 = vadd.f32 %v422_v29, %v414_v52  ;;  %v480_v63 = vmul.f32 %v479_v58, %v899_v15  ;;  %v491_v21 = vperm.slane %v983_v38, 5  ;;  %v1841_v58 = vld [vmem:[#allocation17_spill] sm:$0xff] }
  0x6c   :  { %739 = vst.msk [vmem:[%s1681_s5 + $0x8] sm:$0x3] %vm148_vm0, %v473_v14  ;;  %v497_v32 = vperm.slane %v947_v26, 5  ;;  %v472_v31 = vadd.f32 %v468_v3, %v466_v33  ;;  %v484_v12 = vmul.f32 %v483_v54, %v865_v8  ;;  %v488_v7 = vmul.f32 %v487_v49, %v903_v16  ;;  %v1842_v54 = vld [vmem:[#allocation20_spill] sm:$0xff] }
  0x6d   :  { %v501_v28 = vperm.slane %v988_v39, 5  ;;  %v434_v11 = vadd.f32 %v432_v17, %v424_v6  ;;  %v492_v25 = vmul.f32 %v491_v21, %v870_v9  ;;  %v507_v52 = vperm.slane %v952_v27, 5 }
  0x6e   :  { %v498_v62 = vmul.f32 %v497_v32, %v912_v18  ;;  %v485_v35 = vsub.f32 %v480_v63, %v484_v12  ;;  %v511_v0 = vperm.slane %v999_v44, 5  ;;  %v517_v33 = vperm.slane %v1823_v36, 5 }
  0x6f   :  { %v502_v29 = vmul.f32 %v501_v28, %v875_v10  ;;  %v444_v47 = vadd.f32 %v442_v13, %v434_v11  ;;  %v493_v8 = vsub.f32 %v488_v7, %v492_v25  ;;  %v508_v56 = vmul.f32 %v507_v52, %v916_v19  ;;  %v1844_v11 = vld [vmem:[#allocation21_spill] sm:$0xff]  ;;  %v1845_v25 = vld [vmem:[#allocation22_spill] sm:$0xff] }
  0x70   :  { %v521_v24 = vperm.slane %v1839_v43, 5  ;;  %v512_v9 = vmul.f32 %v511_v0, %v1840_v61  ;;  %v518_v48 = vmul.f32 %v517_v33, %v1825_v59  ;;  %v527_v27 = vperm.slane %v1810_v45, 5  ;;  %v1846_v33 = vld [vmem:[#allocation23_spill] sm:$0xff] }
  0x71   :  { %v503_v17 = vsub.f32 %v498_v62, %v502_v29  ;;  %v454_v34 = vadd.f32 %v452_v40, %v444_v47  ;;  %v495_v42 = vadd.f32 %v493_v8, %v485_v35  ;;  %v531_v14 = vperm.slane %v1826_v1, 5  ;;  %v1843_v40 = vld [vmem:[#allocation9_spill] sm:$0xff] }
  0x72   :  { %v522_v10 = vmul.f32 %v521_v24, %v1811_v60  ;;  %v513_v36 = vsub.f32 %v508_v56, %v512_v9  ;;  %v528_v13 = vmul.f32 %v527_v27, %v1795_v41  ;;  %v537_v3 = vperm.slane %v1841_v58, 5  ;;  %v1847_v24 = vld [vmem:[#allocation14_spill] sm:$0xff] }
  0x73   :  { %v541_v49 = vperm.slane %v1842_v54, 5  ;;  %v464_v6 = vadd.f32 %v462_v51, %v454_v34  ;;  %v505_v21 = vadd.f32 %v503_v17, %v495_v42  ;;  %v532_v12 = vmul.f32 %v531_v14, %v1813_v2  ;;  %v1848_v17 = vld [vmem:[#allocation10_spill] sm:$0xff] }
  0x74   :  { %v523_v32 = vsub.f32 %v518_v48, %v522_v10  ;;  %v538_v45 = vmul.f32 %v537_v3, %v1800_v53  ;;  %v547_v60 = vperm.slane %v1844_v11, 5  ;;  %v551_v52 = vperm.slane %v1845_v25, 5  ;;  %v1849_v27 = vld [vmem:[#allocation2_spill] sm:$0xff]  ;;  %v1852_v3 = vld [vmem:[#allocation27_spill] sm:$0xff] }
  0x75   :  { %v542_v28 = vmul.f32 %v541_v49, %v1843_v40  ;;  %v474_v35 = vadd.f32 %v472_v31, %v464_v6  ;;  %v515_v29 = vadd.f32 %v513_v36, %v505_v21  ;;  %v533_v0 = vsub.f32 %v528_v13, %v532_v12  ;;  %v1850_v31 = vld [vmem:[#allocation25_spill] sm:$0xff]  ;;  %v1851_v10 = vld [vmem:[#allocation26_spill] sm:$0xff]  ;;  %v1853_v40 = vld [vmem:[#allocation4_spill] sm:$0xff] }
  0x76   :  { %v481_v47 = vperm.slane %v1846_v33, 5  ;;  %v548_v51 = vmul.f32 %v547_v60, %v1847_v24  ;;  %v552_v61 = vmul.f32 %v551_v52, %v1848_v17  ;;  %v489_v2 = vperm.slane %v1833_v20, 5 }
  0x77   :  { %v543_v8 = vsub.f32 %v538_v45, %v542_v28  ;;  %740 = vst.msk [vmem:[%s1682_s6 + $0x8] sm:$0x3] %vm148_vm0, %v474_v35  ;;  %v525_v9 = vadd.f32 %v523_v32, %v515_v29  ;;  %v499_v42 = vperm.slane %v1850_v31, 5  ;;  %v509_v14 = vperm.slane %v1851_v10, 5 }
  0x78   :  { %v482_v34 = vmul.f32 %v481_v47, %v1849_v27  ;;  %v553_v36 = vsub.f32 %v548_v51, %v552_v61  ;;  %v490_v58 = vmul.f32 %v489_v2, %v1837_v46  ;;  %v519_v49 = vperm.slane %v1852_v3, 5 }
  0x79   :  { %v529_v6 = vperm.slane %v1838_v50, 5  ;;  %v535_v21 = vadd.f32 %v533_v0, %v525_v9  ;;  %v500_v28 = vmul.f32 %v499_v42, %v1853_v40  ;;  %v510_v60 = vmul.f32 %v509_v14, %v1822_v30 }
  0x7a   :  { %v486_v12 = vadd.f32 %v482_v34, %v480_v63  ;;  %v494_v32 = vadd.f32 %v490_v58, %v488_v7  ;;  %v520_v52 = vmul.f32 %v519_v49, %v845_v4  ;;  %v539_v29 = vperm.slane %v1087_v55, 5  ;;  %v1393_v63 = vld [vmem:[%s1676_s0 + $0xc] sm:$0x3] }
  0x7b   :  { %v530_v35 = vmul.f32 %v529_v6, %v850_v5  ;;  %v545_v47 = vadd.f32 %v543_v8, %v535_v21  ;;  %v504_v17 = vadd.f32 %v500_v28, %v498_v62  ;;  %v514_v46 = vadd.f32 %v510_v60, %v508_v56  ;;  %v1399_v5 = vld [vmem:[%s1676_s0 + $0xe] sm:$0x3]  ;;  %v1451_v60 = vld [vmem:[%s1678_s2 + $0x20] sm:$0xff] }
  0x7c   :  { %v549_v61 = vperm.slane %v1092_v57, 5  ;;  %v496_v2 = vadd.f32 %v494_v32, %v486_v12  ;;  %v524_v27 = vadd.f32 %v520_v52, %v518_v48  ;;  %v540_v30 = vmul.f32 %v1393_v63, %v539_v29 }
  0x7d   :  { %v534_v0 = vadd.f32 %v530_v35, %v528_v13  ;;  %v555_v4 = vadd.f32 %v553_v36, %v545_v47  ;;  %v561_v62 = vperm.slane %v929_v22, 6  ;;  %v565_v56 = vperm.slane %v978_v37, 6  ;;  %v1416_v22 = vld [vmem:[%s1677_s1] sm:$0x3]  ;;  %v1465_v47 = vld [vmem:[%s1678_s2 + $0x28] sm:$0xff] }
  0x7e   :  { %v550_v7 = vmul.f32 %v1399_v5, %v549_v61  ;;  %v506_v48 = vadd.f32 %v504_v17, %v496_v2  ;;  %v544_v13 = vadd.f32 %v540_v30, %v538_v45  ;;  %v569_v8 = vperm.slane %v934_v23, 6 }
  0x7f   :  { %v573_v9 = vperm.slane %v983_v38, 6  ;;  %741 = vst.msk [vmem:[%s1681_s5 + $0xa] sm:$0x3] %vm148_vm0, %v555_v4  ;;  %v1411_v42 = vmul.f32 %v561_v62, %v899_v15  ;;  %v566_v37 = vmul.f32 %v1416_v22, %v565_v56  ;;  %v579_v23 = vperm.slane %v947_v26, 6  ;;  %v1437_v26 = vld [vmem:[%s1678_s2 + $0x18] sm:$0xff] }
  0x80   :  { %v554_v34 = vadd.f32 %v550_v7, %v548_v51  ;;  %v516_v45 = vadd.f32 %v514_v46, %v506_v48  ;;  %v1421_v38 = vmul.f32 %v569_v8, %v903_v16  ;;  %v1426_v51 = vld [vmem:[%s1677_s1 + $0x2] sm:$0x3]  ;;  %v583_v36 = vperm.slane %v988_v39, 6  ;;  %v1445_v39 = vld [vmem:[%s1677_s1 + $0x4] sm:$0x3] }
  0x81   :  { %v574_v14 = vmul.f32 %v1426_v51, %v573_v9  ;;  %v567_v58 = vsub.f32 %v1411_v42, %v566_v37  ;;  %v1432_v49 = vmul.f32 %v579_v23, %v912_v18  ;;  %v589_v6 = vperm.slane %v1437_v26, 6  ;;  %v1473_v4 = vld [vmem:[%s1677_s1 + $0x8] sm:$0x3]  ;;  %v1488_v23 = vld [vmem:[%s1677_s1 + $0xa] sm:$0x3] }
  0x82   :  { %v593_v21 = vperm.slane %v999_v44, 6  ;;  %v526_v12 = vadd.f32 %v524_v27, %v516_v45  ;;  %v584_v28 = vmul.f32 %v1445_v39, %v583_v36  ;;  %v599_v32 = vperm.slane %v1451_v60, 6  ;;  %v1458_v44 = vld [vmem:[%s1677_s1 + $0x6] sm:$0x3] }
  0x83   :  { %v575_v40 = vsub.f32 %v1421_v38, %v574_v14  ;;  %v590_v52 = vmul.f32 %v589_v6, %v916_v19  ;;  %v603_v29 = vperm.slane %v1839_v43, 6  ;;  %v609_v17 = vperm.slane %v1465_v47, 6 }
  0x84   :  { %v594_v35 = vmul.f32 %v1458_v44, %v593_v21  ;;  %v536_v46 = vadd.f32 %v534_v0, %v526_v12  ;;  %v585_v2 = vsub.f32 %v1432_v49, %v584_v28  ;;  %v600_v27 = vmul.f32 %v599_v32, %v1825_v59  ;;  %v1481_v0 = vld [vmem:[%s1678_s2 + $0x30] sm:$0xff] }
  0x85   :  { %v577_v61 = vadd.f32 %v575_v40, %v567_v58  ;;  %v604_v43 = vmul.f32 %v1473_v4, %v603_v29  ;;  %v610_v7 = vmul.f32 %v609_v17, %v1795_v41  ;;  %v613_v62 = vperm.slane %v1826_v1, 6  ;;  %v1517_v17 = vld [vmem:[%s1676_s0] sm:$0x3] }
  0x86   :  { %v595_v30 = vsub.f32 %v590_v52, %v594_v35  ;;  %v546_v56 = vadd.f32 %v544_v13, %v536_v46  ;;  %v619_v8 = vperm.slane %v1481_v0, 6  ;;  %v623_v9 = vperm.slane %v1842_v54, 6  ;;  %v1497_v54 = vld [vmem:[%s1677_s1 + $0xc] sm:$0x3] }
  0x87   :  { %v587_v48 = vadd.f32 %v585_v2, %v577_v61  ;;  %v605_v37 = vsub.f32 %v600_v27, %v604_v43  ;;  %v614_v45 = vmul.f32 %v1488_v23, %v613_v62  ;;  %v629_v1 = vperm.slane %v1844_v11, 6  ;;  %v1504_v11 = vld [vmem:[%s1677_s1 + $0xe] sm:$0x3] }
  0x88   :  { %v633_v13 = vperm.slane %v1845_v25, 6  ;;  %v556_v14 = vadd.f32 %v554_v34, %v546_v56  ;;  %v620_v58 = vmul.f32 %v619_v8, %v1800_v53  ;;  %v624_v6 = vmul.f32 %v1497_v54, %v623_v9 }
  0x89   :  { %v597_v36 = vadd.f32 %v595_v30, %v587_v48  ;;  %v615_v21 = vsub.f32 %v610_v7, %v614_v45  ;;  %v630_v12 = vmul.f32 %v629_v1, %v1847_v24  ;;  %v563_v34 = vperm.slane %v1846_v33, 6  ;;  %v1525_v30 = vld [vmem:[%s1676_s0 + $0x2] sm:$0x3]  ;;  %v1545_v48 = vld [vmem:[%s1676_s0 + $0x8] sm:$0x3] }
  0x8a   :  { %v634_v25 = vmul.f32 %v1504_v11, %v633_v13  ;;  %742 = vst.msk [vmem:[%s1682_s6 + $0xa] sm:$0x3] %vm148_vm0, %v556_v14  ;;  %v625_v28 = vsub.f32 %v620_v58, %v624_v6  ;;  %v571_v32 = vperm.slane %v1833_v20, 6  ;;  %v581_v35 = vperm.slane %v1850_v31, 6  ;;  %v1531_v31 = vld [vmem:[%s1676_s0 + $0x4] sm:$0x3] }
  0x8b   :  { %v607_v40 = vadd.f32 %v605_v37, %v597_v36  ;;  %v564_v46 = vmul.f32 %v1517_v17, %v563_v34  ;;  %v591_v33 = vperm.slane %v1851_v10, 6  ;;  %v601_v61 = vperm.slane %v1852_v3, 6  ;;  %v1539_v3 = vld [vmem:[%s1676_s0 + $0x6] sm:$0x3]  ;;  %v1554_v45 = vld [vmem:[%s1676_s0 + $0xa] sm:$0x3] }
  0x8c   :  { %v635_v29 = vsub.f32 %v630_v12, %v634_v25  ;;  %v572_v20 = vmul.f32 %v1525_v30, %v571_v32  ;;  %v582_v43 = vmul.f32 %v1531_v31, %v581_v35  ;;  %v611_v62 = vperm.slane %v1838_v50, 6  ;;  %v770_v32 = vld [vmem:[%s1679_s4 + $0x8] sm:$0xff] }
  0x8d   :  { %v617_v2 = vadd.f32 %v615_v21, %v607_v40  ;;  %v568_v10 = vadd.f32 %v564_v46, %v1411_v42  ;;  %v592_v56 = vmul.f32 %v1539_v3, %v591_v33  ;;  %v602_v8 = vmul.f32 %v1545_v48, %v601_v61 }
  0x8e   :  { %v621_v9 = vperm.slane %v1087_v55, 6  ;;  %v576_v50 = vadd.f32 %v572_v20, %v1421_v38  ;;  %v586_v42 = vadd.f32 %v582_v43, %v1432_v49  ;;  %v612_v1 = vmul.f32 %v1554_v45, %v611_v62  ;;  %v767_v38 = vld [vmem:[%s1678_s2] sm:$0xff] }
  0x8f   :  { %v627_v37 = vadd.f32 %v625_v28, %v617_v2  ;;  %v596_v13 = vadd.f32 %v592_v56, %v590_v52  ;;  %v606_v14 = vadd.f32 %v602_v8, %v600_v27  ;;  %v631_v6 = vperm.slane %v1092_v57, 6  ;;  %v768_v52 = vld [vmem:[%s1679_s4] sm:$0xff]  ;;  %v769_v57 = vld [vmem:[%s1678_s2 + $0x8] sm:$0xff] }
  0x90   :  { %v622_v36 = vmul.f32 %v1393_v63, %v621_v9  ;;  %v578_v55 = vadd.f32 %v576_v50, %v568_v10  ;;  %v616_v25 = vadd.f32 %v612_v1, %v610_v7  ;;  %v643_v49 = vperm.slane %v767_v38, 7 }
  0x91   :  { %v637_v21 = vadd.f32 %v635_v29, %v627_v37  ;;  %v632_v40 = vmul.f32 %v1399_v5, %v631_v6  ;;  %v647_v27 = vperm.slane %v768_v52, 7  ;;  %v651_v28 = vperm.slane %v769_v57, 7  ;;  %v771_v29 = vld [vmem:[%s1678_s2 + $0x10] sm:$0xff] }
  0x92   :  { %v626_v34 = vadd.f32 %v622_v36, %v620_v58  ;;  %v588_v7 = vadd.f32 %v586_v42, %v578_v55  ;;  %v1574_v58 = vmul.f32 %v643_v49, %v899_v15  ;;  %v655_v35 = vperm.slane %v770_v32, 7  ;;  %v772_v15 = vld [vmem:[%s1679_s4 + $0x10] sm:$0xff] }
  0x93   :  { %743 = vst.msk [vmem:[%s1681_s5 + $0xc] sm:$0x3] %vm148_vm0, %v637_v21  ;;  %v661_v46 = vperm.slane %v771_v29, 7  ;;  %v636_v33 = vadd.f32 %v632_v40, %v630_v12  ;;  %v648_v61 = vmul.f32 %v1416_v22, %v647_v27  ;;  %v1584_v2 = vmul.f32 %v651_v28, %v903_v16  ;;  %v773_v16 = vld [vmem:[%s1679_s4 + $0x18] sm:$0xff]  ;;  %v780_v29 = vld [vmem:[%s1680_s3 + $0x8] sm:$0xff] }
  0x94   :  { %v665_v20 = vperm.slane %v772_v15, 7  ;;  %v598_v43 = vadd.f32 %v596_v13, %v588_v7  ;;  %v656_v62 = vmul.f32 %v1426_v51, %v655_v35  ;;  %v671_v56 = vperm.slane %v1437_v26, 7  ;;  %v781_v15 = vld [vmem:[%s1680_s3 + $0x10] sm:$0xff] }
  0x95   :  { %v1591_v10 = vmul.f32 %v661_v46, %v912_v18  ;;  %v649_v12 = vsub.f32 %v1574_v58, %v648_v61  ;;  %v675_v8 = vperm.slane %v773_v16, 7  ;;  %v681_v9 = vperm.slane %v1451_v60, 7  ;;  %v774_v18 = vld [vmem:[%s1679_s4 + $0x20] sm:$0xff] }
  0x96   :  { %v666_v22 = vmul.f32 %v1445_v39, %v665_v20  ;;  %v608_v37 = vadd.f32 %v606_v14, %v598_v43  ;;  %v657_v50 = vsub.f32 %v1584_v2, %v656_v62  ;;  %v672_v51 = vmul.f32 %v671_v56, %v916_v19  ;;  %v775_v19 = vld [vmem:[%s1679_s4 + $0x28] sm:$0xff]  ;;  %v783_v56 = vld [vmem:[%s1680_s3 + $0x20] sm:$0xff] }
  0x97   :  { %v685_v26 = vperm.slane %v774_v18, 7  ;;  %v676_v39 = vmul.f32 %v1458_v44, %v675_v8  ;;  %v682_v1 = vmul.f32 %v681_v9, %v1825_v59  ;;  %v691_v13 = vperm.slane %v1465_v47, 7  ;;  %v776_v59 = vld [vmem:[%s1679_s4 + $0x30] sm:$0xff] }
  0x98   :  { %v667_v42 = vsub.f32 %v1591_v10, %v666_v22  ;;  %v618_v36 = vadd.f32 %v616_v25, %v608_v37  ;;  %v659_v60 = vadd.f32 %v657_v50, %v649_v12  ;;  %v695_v6 = vperm.slane %v775_v19, 7  ;;  %v785_v18 = vld [vmem:[%s1680_s3 + $0x30] sm:$0xff] }
  0x99   :  { %v686_v14 = vmul.f32 %v1473_v4, %v685_v26  ;;  %v677_v21 = vsub.f32 %v672_v51, %v676_v39  ;;  %v692_v55 = vmul.f32 %v691_v13, %v1795_v41  ;;  %v701_v38 = vperm.slane %v1481_v0, 7  ;;  %v777_v41 = vld [vmem:[%s1678_s2 + $0x38] sm:$0xff] }
  0x9a   :  { %v705_v44 = vperm.slane %v776_v59, 7  ;;  %v628_v47 = vadd.f32 %v626_v34, %v618_v36  ;;  %v669_v25 = vadd.f32 %v667_v42, %v659_v60  ;;  %v696_v4 = vmul.f32 %v1488_v23, %v695_v6  ;;  %v778_v0 = vld [vmem:[%s1679_s4 + $0x38] sm:$0xff]  ;;  %v779_v23 = vld [vmem:[%s1680_s3] sm:$0xff] }
  0x9b   :  { %v687_v49 = vsub.f32 %v682_v1, %v686_v14  ;;  %v702_v40 = vmul.f32 %v701_v38, %v1800_v53  ;;  %v711_v27 = vperm.slane %v777_v41, 7  ;;  %v715_v57 = vperm.slane %v778_v0, 7 }
  0x9c   :  { %v706_v52 = vmul.f32 %v1497_v54, %v705_v44  ;;  %v638_v28 = vadd.f32 %v636_v33, %v628_v47  ;;  %v679_v34 = vadd.f32 %v677_v21, %v669_v25  ;;  %v697_v7 = vsub.f32 %v692_v55, %v696_v4 }
  0x9d   :  { %v645_v53 = vperm.slane %v779_v23, 7  ;;  %v712_v54 = vmul.f32 %v711_v27, %v1847_v24  ;;  %v716_v35 = vmul.f32 %v1504_v11, %v715_v57  ;;  %v653_v46 = vperm.slane %v780_v29, 7  ;;  %v782_v11 = vld [vmem:[%s1680_s3 + $0x18] sm:$0xff] }
  0x9e   :  { %v707_v32 = vsub.f32 %v702_v40, %v706_v52  ;;  %744 = vst.msk [vmem:[%s1682_s6 + $0xc] sm:$0x3] %vm148_vm0, %v638_v28  ;;  %v689_v33 = vadd.f32 %v687_v49, %v679_v34  ;;  %v663_v24 = vperm.slane %v781_v15, 7  ;;  %v673_v20 = vperm.slane %v782_v11, 7 }
  0x9f   :  { %v646_v61 = vmul.f32 %v1517_v17, %v645_v53  ;;  %v717_v43 = vsub.f32 %v712_v54, %v716_v35  ;;  %v654_v62 = vmul.f32 %v1525_v30, %v653_v46  ;;  %v683_v12 = vperm.slane %v783_v56, 7  ;;  %v784_v17 = vld [vmem:[%s1680_s3 + $0x28] sm:$0xff] }
  0xa0   :  { %v693_v22 = vperm.slane %v784_v17, 7  ;;  %v699_v16 = vadd.f32 %v697_v7, %v689_v33  ;;  %v664_v9 = vmul.f32 %v1531_v31, %v663_v24  ;;  %v674_v37 = vmul.f32 %v1539_v3, %v673_v20  ;;  %v786_v31 = vld [vmem:[%s1680_s3 + $0x38] sm:$0xff] }
  0xa1   :  { %v650_v8 = vadd.f32 %v646_v61, %v1574_v58  ;;  %v658_v50 = vadd.f32 %v654_v62, %v1584_v2  ;;  %v684_v30 = vmul.f32 %v1545_v48, %v683_v12  ;;  %v703_v26 = vperm.slane %v785_v18, 7 }
  0xa2   :  { %v709_v42 = vadd.f32 %v707_v32, %v699_v16  ;;  %v668_v39 = vadd.f32 %v664_v9, %v1591_v10  ;;  %v678_v36 = vadd.f32 %v674_v37, %v672_v51  ;;  %v694_v58 = vmul.f32 %v1554_v45, %v693_v22 }
  0xa3   :  { %v660_v13 = vadd.f32 %v658_v50, %v650_v8  ;;  %v713_v3 = vperm.slane %v786_v31, 7  ;;  %v688_v48 = vadd.f32 %v684_v30, %v682_v1  ;;  %v704_v14 = vmul.f32 %v1393_v63, %v703_v26 }
  0xa4   :  { %v719_v2 = vadd.f32 %v717_v43, %v709_v42  ;;  %v698_v19 = vadd.f32 %v694_v58, %v692_v55 }
  0xa5   :  { %v670_v60 = vadd.f32 %v668_v39, %v660_v13  ;;  %v714_v51 = vmul.f32 %v1399_v5, %v713_v3  ;;  %v708_v6 = vadd.f32 %v704_v14, %v702_v40 }
  0xa6   :  { %745 = vst.msk [vmem:[%s1681_s5 + $0xe] sm:$0x3] %vm148_vm0, %v719_v2 }
  0xa7   :  { %v680_v10 = vadd.f32 %v678_v36, %v670_v60  ;;  %v718_v38 = vadd.f32 %v714_v51, %v712_v54 }
  0xa9   :  { %v690_v45 = vadd.f32 %v688_v48, %v680_v10 }
  0xab   :  { %v700_v21 = vadd.f32 %v698_v19, %v690_v45 }
  0xad   :  { %v710_v59 = vadd.f32 %v708_v6, %v700_v21 }
  0xaf   :  { %v720_v44 = vadd.f32 %v718_v38, %v710_v59 }
  0xb1   :  { %746 = vst.msk [vmem:[%s1682_s6 + $0xe] sm:$0x3] %vm148_vm0, %v720_v44 }

// kernel: reverse.0
= control target key start
LH: loop header
LB: loop body
LE: loop exit
PB: predicated region body
PF: predicated region fallthrough
CT: control target
= control target key end

     0   :  { %v104_v10 = vlaneseq  ;;  %v97_v14 = vld [vmem:[#allocation0 + $0x7] ss:$-1 sm:$0xff]  ;;  %v111_v19 = vld [vmem:[#allocation0 + $0x17] ss:$-1 sm:$0xff]  ;;  %s606_s0 = inlined_call_operand.vmem [shape: f32[8,2,16,7], index: 0, kind: input, shape index: {}]   ;;  %s607_s1 = inlined_call_operand.vmem [shape: f32[8,2,16,7], index: 1, kind: output, shape index: {}]  }
   0x1   :  { %v61_v0 = vld [vmem:[%s606_s0] sm:$0xff]  ;;  %v63_v1 = vld [vmem:[%s606_s0 + $0x8] sm:$0xff]  ;;  %v65_v2 = vld [vmem:[%s606_s0 + $0x10] sm:$0xff]  ;;  %v98_v21 = vrot.slane %v97_v14, 1  ;;  %v112_v25 = vrot.slane %v111_v19, 1 }
   0x2   :  { %62 = vst [vmem:[#allocation0 + $0x8] sm:$0xff] %v61_v0  ;;  %v67_v3 = vld [vmem:[%s606_s0 + $0x18] sm:$0xff]  ;;  %v69_v4 = vld [vmem:[%s606_s0 + $0x20] sm:$0xff]  ;;  %v71_v5 = vld [vmem:[%s606_s0 + $0x28] sm:$0xff]  ;;  %v517_v17 = vshrl.u32 %v104_v10, 7 }
   0x3   :  { %64 = vst [vmem:[#allocation0 + $0x18] sm:$0xff] %v63_v1  ;;  %v73_v6 = vld [vmem:[%s606_s0 + $0x30] sm:$0xff]  ;;  %v75_v7 = vld [vmem:[%s606_s0 + $0x38] sm:$0xff]  ;;  %v77_v8 = vld [vmem:[%s606_s0 + $0x40] sm:$0xff] }
   0x4   :  { %66 = vst [vmem:[#allocation0 + $0x28] sm:$0xff] %v65_v2  ;;  %v79_v9 = vld [vmem:[%s606_s0 + $0x48] sm:$0xff]  ;;  %v81_v11 = vld [vmem:[%s606_s0 + $0x50] sm:$0xff]  ;;  %v83_v12 = vld [vmem:[%s606_s0 + $0x58] sm:$0xff]  ;;  %vm106_vm0 = vcmp.lt.s32.totalorder %v517_v17, 7 }
   0x5   :  { %68 = vst [vmem:[#allocation0 + $0x38] sm:$0xff] %v67_v3  ;;  %v85_v13 = vld [vmem:[%s606_s0 + $0x60] sm:$0xff]  ;;  %v87_v15 = vld [vmem:[%s606_s0 + $0x68] sm:$0xff]  ;;  %v89_v18 = vld [vmem:[%s606_s0 + $0x70] sm:$0xff] }
   0x6   :  { %70 = vst [vmem:[#allocation0 + $0x48] sm:$0xff] %v69_v4  ;;  %v91_v20 = vld [vmem:[%s606_s0 + $0x78] sm:$0xff]  ;;  %v125_v24 = vld [vmem:[#allocation0 + $0x27] ss:$-1 sm:$0xff]  ;;  %v139_v28 = vld [vmem:[#allocation0 + $0x37] ss:$-1 sm:$0xff] }
   0x7   :  { %72 = vst [vmem:[#allocation0 + $0x58] sm:$0xff] %v71_v5  ;;  %v126_v29 = vrot.slane %v125_v24, 1  ;;  %v153_v32 = vld [vmem:[#allocation0 + $0x47] ss:$-1 sm:$0xff]  ;;  %v140_v33 = vrot.slane %v139_v28, 1 }
   0x8   :  { %74 = vst [vmem:[#allocation0 + $0x68] sm:$0xff] %v73_v6  ;;  %v167_v36 = vld [vmem:[#allocation0 + $0x57] ss:$-1 sm:$0xff]  ;;  %v154_v37 = vrot.slane %v153_v32, 1  ;;  %v181_v40 = vld [vmem:[#allocation0 + $0x67] ss:$-1 sm:$0xff] }
   0x9   :  { %76 = vst [vmem:[#allocation0 + $0x78] sm:$0xff] %v75_v7  ;;  %v102_v16 = vld [vmem:[#allocation0 + $0xf] ss:$-1 sm:$0xff]  ;;  %v168_v41 = vrot.slane %v167_v36, 1  ;;  %v195_v44 = vld [vmem:[#allocation0 + $0x77] ss:$-1 sm:$0xff] }
   0xa   :  { %78 = vst [vmem:[#allocation0 + $0x88] sm:$0xff] %v77_v8  ;;  %v116_v22 = vld [vmem:[#allocation0 + $0x1f] ss:$-1 sm:$0xff]  ;;  %v103_v23 = vrot.slane %v102_v16, 1  ;;  %v182_v45 = vrot.slane %v181_v40, 1  ;;  %v196_v49 = vrot.slane %v195_v44, 1 }
   0xb   :  { %80 = vst [vmem:[#allocation0 + $0x98] sm:$0xff] %v79_v9  ;;  %v130_v26 = vld [vmem:[#allocation0 + $0x2f] ss:$-1 sm:$0xff]  ;;  %v117_v27 = vrot.slane %v116_v22, 1  ;;  %v209_v48 = vld [vmem:[#allocation0 + $0x87] ss:$-1 sm:$0xff] }
   0xc   :  { %82 = vst [vmem:[#allocation0 + $0xa8] sm:$0xff] %v81_v11  ;;  %v144_v30 = vld [vmem:[#allocation0 + $0x3f] ss:$-1 sm:$0xff]  ;;  %v131_v31 = vrot.slane %v130_v26, 1  ;;  %v223_v52 = vld [vmem:[#allocation0 + $0x97] ss:$-1 sm:$0xff] }
   0xd   :  { %84 = vst [vmem:[#allocation0 + $0xb8] sm:$0xff] %v83_v12  ;;  %v158_v34 = vld [vmem:[#allocation0 + $0x4f] ss:$-1 sm:$0xff]  ;;  %v145_v35 = vrot.slane %v144_v30, 1  ;;  %v210_v53 = vrot.slane %v209_v48, 1  ;;  %v224_v57 = vrot.slane %v223_v52, 1 }
   0xe   :  { %86 = vst [vmem:[#allocation0 + $0xc8] sm:$0xff] %v85_v13  ;;  %v172_v38 = vld [vmem:[#allocation0 + $0x5f] ss:$-1 sm:$0xff]  ;;  %v159_v39 = vrot.slane %v158_v34, 1  ;;  %v237_v56 = vld [vmem:[#allocation0 + $0xa7] ss:$-1 sm:$0xff] }
   0xf   :  { %88 = vst [vmem:[#allocation0 + $0xd8] sm:$0xff] %v87_v15  ;;  %v186_v42 = vld [vmem:[#allocation0 + $0x6f] ss:$-1 sm:$0xff]  ;;  %v173_v43 = vrot.slane %v172_v38, 1  ;;  %v251_v60 = vld [vmem:[#allocation0 + $0xb7] ss:$-1 sm:$0xff] }
  0x10   :  { %90 = vst [vmem:[#allocation0 + $0xe8] sm:$0xff] %v89_v18  ;;  %v200_v46 = vld [vmem:[#allocation0 + $0x7f] ss:$-1 sm:$0xff]  ;;  %v187_v47 = vrot.slane %v186_v42, 1  ;;  %v238_v61 = vrot.slane %v237_v56, 1  ;;  %v252_v1 = vrot.slane %v251_v60, 1 }
  0x11   :  { %92 = vst [vmem:[#allocation0 + $0xf8] sm:$0xff] %v91_v20  ;;  %v214_v50 = vld [vmem:[#allocation0 + $0x8f] ss:$-1 sm:$0xff]  ;;  %v201_v51 = vrot.slane %v200_v46, 1  ;;  %v265_v0 = vld [vmem:[#allocation0 + $0xc7] ss:$-1 sm:$0xff] }
  0x12   :  { %99 = vst [vmem:[#allocation1] sm:$0xff] %v98_v21  ;;  %v228_v54 = vld [vmem:[#allocation0 + $0x9f] ss:$-1 sm:$0xff]  ;;  %v215_v55 = vrot.slane %v214_v50, 1  ;;  %v279_v4 = vld [vmem:[#allocation0 + $0xd7] ss:$-1 sm:$0xff] }
  0x13   :  { %107 = vst.msk [vmem:[#allocation1] sm:$0xff] %vm106_vm0, %v103_v23  ;;  %v242_v58 = vld [vmem:[#allocation0 + $0xaf] ss:$-1 sm:$0xff]  ;;  %v229_v59 = vrot.slane %v228_v54, 1  ;;  %v266_v5 = vrot.slane %v265_v0, 1  ;;  %v280_v9 = vrot.slane %v279_v4, 1 }
  0x14   :  { %113 = vst [vmem:[#allocation1 + $0x8] sm:$0xff] %v112_v25  ;;  %v256_v62 = vld [vmem:[#allocation0 + $0xbf] ss:$-1 sm:$0xff]  ;;  %v243_v63 = vrot.slane %v242_v58, 1  ;;  %v293_v8 = vld [vmem:[#allocation0 + $0xe7] ss:$-1 sm:$0xff] }
  0x15   :  { %121 = vst.msk [vmem:[#allocation1 + $0x8] sm:$0xff] %vm106_vm0, %v117_v27  ;;  %v270_v2 = vld [vmem:[#allocation0 + $0xcf] ss:$-1 sm:$0xff]  ;;  %v257_v3 = vrot.slane %v256_v62, 1  ;;  %v307_v12 = vld [vmem:[#allocation0 + $0xf7] ss:$-1 sm:$0xff] }
  0x16   :  { %127 = vst [vmem:[#allocation1 + $0x10] sm:$0xff] %v126_v29  ;;  %v284_v6 = vld [vmem:[#allocation0 + $0xdf] ss:$-1 sm:$0xff]  ;;  %v271_v7 = vrot.slane %v270_v2, 1  ;;  %v294_v13 = vrot.slane %v293_v8, 1  ;;  %v308_v16 = vrot.slane %v307_v12, 1 }
  0x17   :  { %135 = vst.msk [vmem:[#allocation1 + $0x10] sm:$0xff] %vm106_vm0, %v131_v31  ;;  %v298_v10 = vld [vmem:[#allocation0 + $0xef] ss:$-1 sm:$0xff]  ;;  %v285_v11 = vrot.slane %v284_v6, 1 }
  0x18   :  { %141 = vst [vmem:[#allocation1 + $0x18] sm:$0xff] %v140_v33  ;;  %v312_v14 = vld [vmem:[#allocation0 + $0xff] ss:$-1 sm:$0xff]  ;;  %v299_v15 = vrot.slane %v298_v10, 1 }
  0x19   :  { %149 = vst.msk [vmem:[#allocation1 + $0x18] sm:$0xff] %vm106_vm0, %v145_v35  ;;  %v313_v18 = vrot.slane %v312_v14, 1 }
  0x1a   :  { %155 = vst [vmem:[#allocation1 + $0x20] sm:$0xff] %v154_v37  ;;  %v376_v19 = vld [vmem:[#allocation1] sm:$0xff] }
  0x1b   :  { %163 = vst.msk [vmem:[#allocation1 + $0x20] sm:$0xff] %vm106_vm0, %v159_v39 }
  0x1c   :  { %169 = vst [vmem:[#allocation1 + $0x28] sm:$0xff] %v168_v41  ;;  %v378_v20 = vld [vmem:[#allocation1 + $0x8] sm:$0xff] }
  0x1d   :  { %177 = vst.msk [vmem:[#allocation1 + $0x28] sm:$0xff] %vm106_vm0, %v173_v43 }
  0x1e   :  { %183 = vst [vmem:[#allocation1 + $0x30] sm:$0xff] %v182_v45  ;;  %v380_v17 = vld [vmem:[#allocation1 + $0x10] sm:$0xff] }
  0x1f   :  { %191 = vst.msk [vmem:[#allocation1 + $0x30] sm:$0xff] %vm106_vm0, %v187_v47 }
  0x20   :  { %197 = vst [vmem:[#allocation1 + $0x38] sm:$0xff] %v196_v49  ;;  %v382_v21 = vld [vmem:[#allocation1 + $0x18] sm:$0xff] }
  0x21   :  { %205 = vst.msk [vmem:[#allocation1 + $0x38] sm:$0xff] %vm106_vm0, %v201_v51 }
  0x22   :  { %211 = vst [vmem:[#allocation1 + $0x40] sm:$0xff] %v210_v53  ;;  %v384_v22 = vld [vmem:[#allocation1 + $0x20] sm:$0xff] }
  0x23   :  { %219 = vst.msk [vmem:[#allocation1 + $0x40] sm:$0xff] %vm106_vm0, %v215_v55 }
  0x24   :  { %225 = vst [vmem:[#allocation1 + $0x48] sm:$0xff] %v224_v57  ;;  %v386_v23 = vld [vmem:[#allocation1 + $0x28] sm:$0xff] }
  0x25   :  { %233 = vst.msk [vmem:[#allocation1 + $0x48] sm:$0xff] %vm106_vm0, %v229_v59 }
  0x26   :  { %239 = vst [vmem:[#allocation1 + $0x50] sm:$0xff] %v238_v61  ;;  %v388_v24 = vld [vmem:[#allocation1 + $0x30] sm:$0xff] }
  0x27   :  { %247 = vst.msk [vmem:[#allocation1 + $0x50] sm:$0xff] %vm106_vm0, %v243_v63 }
  0x28   :  { %253 = vst [vmem:[#allocation1 + $0x58] sm:$0xff] %v252_v1  ;;  %v390_v25 = vld [vmem:[#allocation1 + $0x38] sm:$0xff] }
  0x29   :  { %261 = vst.msk [vmem:[#allocation1 + $0x58] sm:$0xff] %vm106_vm0, %v257_v3 }
  0x2a   :  { %267 = vst [vmem:[#allocation1 + $0x60] sm:$0xff] %v266_v5  ;;  %v392_v26 = vld [vmem:[#allocation1 + $0x40] sm:$0xff] }
  0x2b   :  { %275 = vst.msk [vmem:[#allocation1 + $0x60] sm:$0xff] %vm106_vm0, %v271_v7 }
  0x2c   :  { %281 = vst [vmem:[#allocation1 + $0x68] sm:$0xff] %v280_v9  ;;  %v394_v27 = vld [vmem:[#allocation1 + $0x48] sm:$0xff] }
  0x2d   :  { %289 = vst.msk [vmem:[#allocation1 + $0x68] sm:$0xff] %vm106_vm0, %v285_v11 }
  0x2e   :  { %295 = vst [vmem:[#allocation1 + $0x70] sm:$0xff] %v294_v13  ;;  %v396_v28 = vld [vmem:[#allocation1 + $0x50] sm:$0xff] }
  0x2f   :  { %303 = vst.msk [vmem:[#allocation1 + $0x70] sm:$0xff] %vm106_vm0, %v299_v15 }
  0x30   :  { %309 = vst [vmem:[#allocation1 + $0x78] sm:$0xff] %v308_v16  ;;  %v398_v29 = vld [vmem:[#allocation1 + $0x58] sm:$0xff] }
  0x31   :  { %317 = vst.msk [vmem:[#allocation1 + $0x78] sm:$0xff] %vm106_vm0, %v313_v18 }
  0x32   :  { %377 = vst [vmem:[%s607_s1] sm:$0xff] %v376_v19  ;;  %v400_v30 = vld [vmem:[#allocation1 + $0x60] sm:$0xff] }
  0x33   :  { %379 = vst [vmem:[%s607_s1 + $0x8] sm:$0xff] %v378_v20 }
  0x34   :  { %381 = vst [vmem:[%s607_s1 + $0x10] sm:$0xff] %v380_v17  ;;  %v402_v31 = vld [vmem:[#allocation1 + $0x68] sm:$0xff] }
  0x35   :  { %383 = vst [vmem:[%s607_s1 + $0x18] sm:$0xff] %v382_v21 }
  0x36   :  { %385 = vst [vmem:[%s607_s1 + $0x20] sm:$0xff] %v384_v22  ;;  %v404_v32 = vld [vmem:[#allocation1 + $0x70] sm:$0xff] }
  0x37   :  { %387 = vst [vmem:[%s607_s1 + $0x28] sm:$0xff] %v386_v23 }
  0x38   :  { %389 = vst [vmem:[%s607_s1 + $0x30] sm:$0xff] %v388_v24  ;;  %v406_v33 = vld [vmem:[#allocation1 + $0x78] sm:$0xff] }
  0x39   :  { %391 = vst [vmem:[%s607_s1 + $0x38] sm:$0xff] %v390_v25 }
  0x3a   :  { %393 = vst [vmem:[%s607_s1 + $0x40] sm:$0xff] %v392_v26 }
  0x3b   :  { %395 = vst [vmem:[%s607_s1 + $0x48] sm:$0xff] %v394_v27 }
  0x3c   :  { %397 = vst [vmem:[%s607_s1 + $0x50] sm:$0xff] %v396_v28 }
  0x3d   :  { %399 = vst [vmem:[%s607_s1 + $0x58] sm:$0xff] %v398_v29 }
  0x3e   :  { %401 = vst [vmem:[%s607_s1 + $0x60] sm:$0xff] %v400_v30 }
  0x3f   :  { %403 = vst [vmem:[%s607_s1 + $0x68] sm:$0xff] %v402_v31 }
  0x40   :  { %405 = vst [vmem:[%s607_s1 + $0x70] sm:$0xff] %v404_v32 }
  0x41   :  { %407 = vst [vmem:[%s607_s1 + $0x78] sm:$0xff] %v406_v33 }

// kernel: kno2d_forward.17
= control target key start
LH: loop header
LB: loop body
LE: loop exit
PB: predicated region body
PF: predicated region fallthrough
CT: control target
= control target key end

     0   :  { %s472_s15 = smov 0   ;;  %s505_s0 = inlined_call_operand.vmem [shape: f32[8,512], index: 0, kind: input, shape index: {}]   ;;  %s506_s1 = inlined_call_operand.vmem [shape: f32[8,8], index: 1, kind: input, shape index: {}]   ;;  %s507_s2 = inlined_call_operand.vmem [shape: f32[8,1], index: 2, kind: input, shape index: {}]   ;;  %s508_s3 = inlined_call_operand.vmem [shape: f32[8,512], index: 3, kind: input, shape index: {}]   ;;  %s509_s4 = inlined_call_operand.vmem [shape: f32[8,512], index: 4, kind: output, shape index: {}]  }
   0x1 LB: > { %s389_s16 = sadd.s32 4294967295, %s437_s15   ;;  %p393_p0 = scmp.ge.s32.totalorder %s437_s15, 1  ;;  %s437_s15 = sphi %s472_s15, %s14_s15  }
   0x2   : > { %p174_p1 = scmp.lt.s32.totalorder %s437_s15, 3 }
   0x4   : > { %p175_p2 = pnand %p393_p0, %p174_p1 }
   0x5   : > { %s394_s21 = sshll.u32 (!%p175_p2), %s389_s16, 1 }
   0x6   : > { %178 = sbr.rel (%p175_p2) target bundleno = 166 (0xa6), region = 36  ;;  %p206_p3 = scmp.lt.s32.totalorder (!%p175_p2), %s394_s21, 3 }
   0xb   : > { %v225_v0 = vld [vmem:[%s506_s1] sm:$0xff]  ;;  %v439_v1 = vmov 0   ;;  %v440_v2 = vmov 2   ;;  %v441_v3 = vmov 4   ;;  %v442_v4 = vmov 1   ;;  %s511_s21 = smov (!%p206_p3, %s394_s21), 3 }
   0xc   : > { %418 = vset.pattern.permute.xlu0 %v439_v1  ;;  %420 = vset.pattern.permute.xlu1 %v440_v2  ;;  %v443_v5 = vmov 3   ;;  %v444_v6 = vmov 5   ;;  %v305_v7 = vld [vmem:[%s507_s2] sm:$0xff]  ;;  %v445_v8 = vmov 6   ;;  %v446_v9 = vmov 7   ;;  %s488_s22 = sshll.u32 %s511_s21, 3 }
   0xd   : > { %228 = vperm.xlu0 %418, %v225_v0   ;;  %246 = vperm.xlu1 %420, %v225_v0   ;;  %s209_s25 = scalar_lea.vmem %s505_s0, %s488_s22  ;;  %s215_s28 = scalar_lea.vmem %s508_s3, %s488_s22 }
   0xe   : > { %422 = vset.pattern.permute.xlu2 %v441_v3  ;;  %v223_v13 = vld [vmem:[%s209_s25] sm:$0xff]  ;;  %v224_v14 = vld [vmem:[%s209_s25 + $0x8] sm:$0xff]  ;;  %s221_s5 = scalar_lea.vmem %s509_s4, %s488_s22 }
   0xf   : > { %266 = vperm.xlu2 %422, %v225_v0   ;;  %v231_v15 = vperm.slane %v223_v13, 0  ;;  %v232_v16 = vperm.slane %v224_v14, 0  ;;  %v239_v17 = vperm.slane %v223_v13, 1  ;;  %v240_v18 = vperm.slane %v224_v14, 1  ;;  %v313_v3 = vld [vmem:[%s215_s28] sm:$0xff] }
  0x10   : > { %v249_v20 = vperm.slane %v223_v13, 2  ;;  %v250_v21 = vperm.slane %v224_v14, 2  ;;  %v259_v24 = vperm.slane %v223_v13, 3  ;;  %v260_v25 = vperm.slane %v224_v14, 3 }
  0x11   : > { %v269_v30 = vperm.slane %v223_v13, 4  ;;  %v270_v31 = vperm.slane %v224_v14, 4  ;;  %v279_v36 = vperm.slane %v223_v13, 5  ;;  %v280_v37 = vperm.slane %v224_v14, 5 }
  0x12   : > { %v289_v44 = vperm.slane %v223_v13, 6  ;;  %v290_v45 = vperm.slane %v224_v14, 6  ;;  %v299_v48 = vperm.slane %v223_v13, 7  ;;  %v300_v49 = vperm.slane %v224_v14, 7 }
  0x15   : > { %419 = vset.pattern.permute.xlu0 %v442_v4  ;;  %421 = vset.pattern.permute.xlu1 %v443_v5  ;;  %v314_v4 = vld [vmem:[%s215_s28 + $0x8] sm:$0xff] }
  0x16   : > { %236 = vperm.xlu0 %419, %v225_v0   ;;  %256 = vperm.xlu1 %421, %v225_v0  }
  0x17   : > { %423 = vset.pattern.permute.xlu2 %v444_v6 }
  0x18   : > { %276 = vperm.xlu2 %423, %v225_v0  }
  0x1e   : > { %424 = vset.pattern.permute.xlu1 %v445_v8  ;;  %426 = vset.pattern.permute.xlu0 %v439_v1 }
  0x1f   : > { %286 = vperm.xlu1 %424, %v225_v0   ;;  %308 = vperm.xlu0 %426, %v305_v7  }
  0x20   : > { %425 = vset.pattern.permute.xlu2 %v446_v9 }
  0x21   : > { %296 = vperm.xlu2 %425, %v225_v0  }
  0x69   : > { %v267_v10 = vpop.permute.xlu2 %266 }
  0x6a   : > { %v271_v42 = vmul.f32 %v269_v30, %v267_v10  ;;  %v272_v43 = vmul.f32 %v270_v31, %v267_v10 }
  0x72   : > { %v277_v19 = vpop.permute.xlu2 %276 }
  0x73   : > { %v281_v53 = vmul.f32 %v279_v36, %v277_v19  ;;  %v282_v54 = vmul.f32 %v280_v37, %v277_v19 }
  0x7b   : > { %v297_v50 = vpop.permute.xlu2 %296 }
  0x7c   : > { %v301_v60 = vmul.f32 %v299_v48, %v297_v50  ;;  %v302_v61 = vmul.f32 %v300_v49, %v297_v50 }
  0x7f   : > { %v229_v11 = vpop.permute.xlu0 %228  ;;  %v247_v12 = vpop.permute.xlu1 %246 }
  0x80   : > { %v233_v26 = vmul.f32 %v231_v15, %v229_v11  ;;  %v234_v27 = vmul.f32 %v232_v16, %v229_v11  ;;  %v251_v32 = vmul.f32 %v249_v20, %v247_v12  ;;  %v252_v33 = vmul.f32 %v250_v21, %v247_v12 }
  0x88   : > { %v237_v22 = vpop.permute.xlu0 %236  ;;  %v257_v23 = vpop.permute.xlu1 %256 }
  0x89   : > { %v241_v28 = vmul.f32 %v239_v17, %v237_v22  ;;  %v242_v29 = vmul.f32 %v240_v18, %v237_v22  ;;  %v261_v40 = vmul.f32 %v259_v24, %v257_v23  ;;  %v262_v41 = vmul.f32 %v260_v25, %v257_v23 }
  0x8b   : > { %v243_v34 = vadd.f32 %v241_v28, %v233_v26  ;;  %v244_v35 = vadd.f32 %v242_v29, %v234_v27 }
  0x8d   : > { %v253_v38 = vadd.f32 %v251_v32, %v243_v34  ;;  %v254_v39 = vadd.f32 %v252_v33, %v244_v35 }
  0x8f   : > { %v263_v46 = vadd.f32 %v261_v40, %v253_v38  ;;  %v264_v47 = vadd.f32 %v262_v41, %v254_v39 }
  0x91   : > { %v273_v51 = vadd.f32 %v271_v42, %v263_v46  ;;  %v274_v52 = vadd.f32 %v272_v43, %v264_v47  ;;  %v287_v55 = vpop.permute.xlu1 %286  ;;  %v309_v0 = vpop.permute.xlu0 %308 }
  0x92   : > { %v291_v56 = vmul.f32 %v289_v44, %v287_v55  ;;  %v292_v57 = vmul.f32 %v290_v45, %v287_v55 }
  0x93   : > { %v283_v58 = vadd.f32 %v281_v53, %v273_v51  ;;  %v284_v59 = vadd.f32 %v282_v54, %v274_v52 }
  0x95   : > { %v293_v62 = vadd.f32 %v291_v56, %v283_v58  ;;  %v294_v63 = vadd.f32 %v292_v57, %v284_v59 }
  0x97   : > { %v303_v1 = vadd.f32 %v301_v60, %v293_v62  ;;  %v304_v2 = vadd.f32 %v302_v61, %v294_v63 }
  0x99   : > { %v311_v5 = vadd.f32 %v309_v0, %v303_v1  ;;  %v312_v6 = vadd.f32 %v309_v0, %v304_v2 }
  0x9b   : > { %v315_v7 = vadd.f32 %v313_v3, %v311_v5  ;;  %v316_v8 = vadd.f32 %v314_v4, %v312_v6 }
  0x9d   : > { %427 = vtanh.f32 %v315_v7 }
  0x9e   : > { %429 = vtanh.f32 %v316_v8 }
  0xa3   : > { %v428_v9 = vpop.eup %427 }
  0xa4   : > { %v430_v10 = vpop.eup %429  ;;  %319 = vst [vmem:[%s221_s5] sm:$0xff] %v428_v9 }
  0xa5   : > { %320 = vst [vmem:[%s221_s5 + $0x8] sm:$0xff] %v430_v10 }
  0xa6 PF: > { %s14_s15 = sadd.s32 1, %s437_s15  }
  0xa7   : > { %p11_p4 = scmp.ge.s32.totalorder %s14_s15, 4  }
  0xa9   :  { %13 = sbr.rel (!%p11_p4) target bundleno = 1 (0x1), region = 69 }

// kernel: kno2d_forward.18
= control target key start
LH: loop header
LB: loop body
LE: loop exit
PB: predicated region body
PF: predicated region fallthrough
CT: control target
= control target key end

     0   :  { %s399_s12 = smov 0   ;;  %s428_s0 = inlined_call_operand.vmem [shape: f32[8,512], index: 0, kind: input, shape index: {}]   ;;  %s429_s1 = inlined_call_operand.vmem [shape: f32[4,8], index: 1, kind: input, shape index: {}]   ;;  %s430_s2 = inlined_call_operand.vmem [shape: f32[4,1], index: 2, kind: input, shape index: {}]   ;;  %s431_s3 = inlined_call_operand.vmem [shape: f32[4,512], index: 3, kind: output, shape index: {}]  }
   0x1 LB: > { %s327_s13 = sadd.s32 4294967295, %s369_s12   ;;  %p331_p0 = scmp.ge.s32.totalorder %s369_s12, 1  ;;  %s369_s12 = sphi %s399_s12, %s13_s12  }
   0x2   : > { %p138_p1 = scmp.lt.s32.totalorder %s369_s12, 3 }
   0x4   : > { %p139_p2 = pnand %p331_p0, %p138_p1 }
   0x5   : > { %s332_s18 = sshll.u32 (!%p139_p2), %s327_s13, 1 }
   0x6   : > { %142 = sbr.rel (%p139_p2) target bundleno = 159 (0x9f), region = 32  ;;  %p163_p3 = scmp.lt.s32.totalorder (!%p139_p2), %s332_s18, 3 }
   0xb   : > { %v176_v0 = vld [vmem:[%s429_s1] sm:$0xf]  ;;  %v371_v1 = vmov 0   ;;  %v372_v2 = vmov 2   ;;  %v373_v3 = vmov 4   ;;  %v374_v4 = vmov 1  }
   0xc   : > { %354 = vset.pattern.permute.xlu0 %v371_v1  ;;  %356 = vset.pattern.permute.xlu1 %v372_v2  ;;  %v375_v5 = vmov 3   ;;  %v376_v6 = vmov 5   ;;  %v256_v7 = vld [vmem:[%s430_s2] sm:$0xf]  ;;  %v377_v8 = vmov 6   ;;  %v378_v9 = vmov 7  }
   0xd   : > { %179 = vperm.xlu0 %354, %v176_v0   ;;  %197 = vperm.xlu1 %356, %v176_v0   ;;  %s433_s18 = smov (!%p163_p3, %s332_s18), 3  ;;  %vm267_vm0 = vcmask 1043456  }
   0xe   : > { %358 = vset.pattern.permute.xlu2 %v373_v3  ;;  %s333_s19 = sshll.u32 %s433_s18, 3  ;;  %s335_s23 = sshll.u32 %s433_s18, 2 }
   0xf   : > { %217 = vperm.xlu2 %358, %v176_v0   ;;  %s166_s22 = scalar_lea.vmem %s428_s0, %s333_s19  ;;  %s172_s26 = scalar_lea.vmem %s431_s3, %s335_s23 }
  0x10   : > { %v174_v13 = vld [vmem:[%s166_s22] sm:$0xff]  ;;  %v175_v14 = vld [vmem:[%s166_s22 + $0x8] sm:$0xff] }
  0x11   : > { %v182_v15 = vperm.slane %v174_v13, 0  ;;  %v183_v16 = vperm.slane %v175_v14, 0  ;;  %v190_v17 = vperm.slane %v174_v13, 1  ;;  %v191_v18 = vperm.slane %v175_v14, 1 }
  0x12   : > { %v200_v20 = vperm.slane %v174_v13, 2  ;;  %v201_v21 = vperm.slane %v175_v14, 2  ;;  %v210_v24 = vperm.slane %v174_v13, 3  ;;  %v211_v25 = vperm.slane %v175_v14, 3 }
  0x13   : > { %v220_v30 = vperm.slane %v174_v13, 4  ;;  %v221_v31 = vperm.slane %v175_v14, 4  ;;  %v230_v36 = vperm.slane %v174_v13, 5  ;;  %v231_v37 = vperm.slane %v175_v14, 5 }
  0x14   : > { %v240_v44 = vperm.slane %v174_v13, 6  ;;  %v241_v45 = vperm.slane %v175_v14, 6  ;;  %v250_v48 = vperm.slane %v174_v13, 7  ;;  %v251_v49 = vperm.slane %v175_v14, 7 }
  0x15   : > { %355 = vset.pattern.permute.xlu0 %v374_v4  ;;  %357 = vset.pattern.permute.xlu1 %v375_v5 }
  0x16   : > { %187 = vperm.xlu0 %355, %v176_v0   ;;  %207 = vperm.xlu1 %357, %v176_v0  }
  0x17   : > { %359 = vset.pattern.permute.xlu2 %v376_v6 }
  0x18   : > { %227 = vperm.xlu2 %359, %v176_v0  }
  0x1e   : > { %360 = vset.pattern.permute.xlu1 %v377_v8  ;;  %362 = vset.pattern.permute.xlu0 %v371_v1 }
  0x1f   : > { %237 = vperm.xlu1 %360, %v176_v0   ;;  %259 = vperm.xlu0 %362, %v256_v7  }
  0x20   : > { %361 = vset.pattern.permute.xlu2 %v378_v9 }
  0x21   : > { %247 = vperm.xlu2 %361, %v176_v0  }
  0x69   : > { %v218_v10 = vpop.permute.xlu2 %217 }
  0x6a   : > { %v222_v42 = vmul.f32 %v220_v30, %v218_v10  ;;  %v223_v43 = vmul.f32 %v221_v31, %v218_v10 }
  0x72   : > { %v228_v19 = vpop.permute.xlu2 %227 }
  0x73   : > { %v232_v53 = vmul.f32 %v230_v36, %v228_v19  ;;  %v233_v54 = vmul.f32 %v231_v37, %v228_v19 }
  0x7b   : > { %v248_v50 = vpop.permute.xlu2 %247 }
  0x7c   : > { %v252_v60 = vmul.f32 %v250_v48, %v248_v50  ;;  %v253_v61 = vmul.f32 %v251_v49, %v248_v50 }
  0x7f   : > { %v180_v11 = vpop.permute.xlu0 %179  ;;  %v198_v12 = vpop.permute.xlu1 %197 }
  0x80   : > { %v184_v26 = vmul.f32 %v182_v15, %v180_v11  ;;  %v185_v27 = vmul.f32 %v183_v16, %v180_v11  ;;  %v202_v32 = vmul.f32 %v200_v20, %v198_v12  ;;  %v203_v33 = vmul.f32 %v201_v21, %v198_v12 }
  0x88   : > { %v188_v22 = vpop.permute.xlu0 %187  ;;  %v208_v23 = vpop.permute.xlu1 %207 }
  0x89   : > { %v192_v28 = vmul.f32 %v190_v17, %v188_v22  ;;  %v193_v29 = vmul.f32 %v191_v18, %v188_v22  ;;  %v212_v40 = vmul.f32 %v210_v24, %v208_v23  ;;  %v213_v41 = vmul.f32 %v211_v25, %v208_v23 }
  0x8b   : > { %v194_v34 = vadd.f32 %v192_v28, %v184_v26  ;;  %v195_v35 = vadd.f32 %v193_v29, %v185_v27 }
  0x8d   : > { %v204_v38 = vadd.f32 %v202_v32, %v194_v34  ;;  %v205_v39 = vadd.f32 %v203_v33, %v195_v35 }
  0x8f   : > { %v214_v46 = vadd.f32 %v212_v40, %v204_v38  ;;  %v215_v47 = vadd.f32 %v213_v41, %v205_v39 }
  0x91   : > { %v224_v51 = vadd.f32 %v222_v42, %v214_v46  ;;  %v225_v52 = vadd.f32 %v223_v43, %v215_v47  ;;  %v238_v55 = vpop.permute.xlu1 %237  ;;  %v260_v0 = vpop.permute.xlu0 %259 }
  0x92   : > { %v242_v56 = vmul.f32 %v240_v44, %v238_v55  ;;  %v243_v57 = vmul.f32 %v241_v45, %v238_v55 }
  0x93   : > { %v234_v58 = vadd.f32 %v232_v53, %v224_v51  ;;  %v235_v59 = vadd.f32 %v233_v54, %v225_v52 }
  0x95   : > { %v244_v62 = vadd.f32 %v242_v56, %v234_v58  ;;  %v245_v63 = vadd.f32 %v243_v57, %v235_v59 }
  0x97   : > { %v254_v1 = vadd.f32 %v252_v60, %v244_v62  ;;  %v255_v2 = vadd.f32 %v253_v61, %v245_v63 }
  0x99   : > { %v263_v3 = vadd.f32 %v260_v0, %v255_v2  ;;  %v262_v4 = vadd.f32 %v260_v0, %v254_v1 }
  0x9b   : > { %v266_v5 = vrot.slane %v263_v3, 4 }
  0x9d   : > { %v268_v6 = vsel %vm267_vm0, %v262_v4, %v266_v5 }
  0x9e   : > { %270 = vst [vmem:[%s172_s26] sm:$0xff] %v268_v6 }
  0x9f PF: > { %s13_s12 = sadd.s32 1, %s369_s12  }
  0xa0   : > { %p10_p4 = scmp.ge.s32.totalorder %s13_s12, 4  }
  0xa2   :  { %12 = sbr.rel (!%p10_p4) target bundleno = 1 (0x1), region = 62 }

</bundles_post_ra>
